<compile_context>
chip_gen: v5e
topology: v5e:2x2
jax: 0.10.0
libtpu: 0.0.40
codegen_flags: <defaults>
</compile_context>

<pallas_src>
import functools

import jax
import jax.numpy as jnp
from jax import lax
from jax.experimental import pallas as pl
from jax.experimental.pallas import tpu as pltpu


def _is_v7x():
    try:
        kind = jax.devices()[0].device_kind.lower()
    except Exception:
        return False
    return ("v7" in kind) or ("7x" in kind)


def _bn_residual_store(y, res, gamma, beta, o_ref, *, eps, inv_count):
    """y: (cout_blk, HW) f32 conv output; per-channel batch stats over HW."""
    s = jnp.sum(y, axis=1, keepdims=True)                   # (cout_blk, 1)
    ss = jnp.sum(y * y, axis=1, keepdims=True)              # (cout_blk, 1)
    mean = s * inv_count
    var = jnp.maximum(ss * inv_count - mean * mean, 0.0)    # guard cancellation
    inv = lax.rsqrt(var + eps)                              # EUP slot
    scale = gamma * inv
    shift = beta - mean * scale
    o_ref[...] = (y * scale + shift + res).astype(o_ref.dtype)


def _kernel_cin_reduce(gate_ref, x_ref, wt_ref, res_ref, gamma_ref, beta_ref,
                       o_ref, acc_ref, *, eps, inv_count):
    """Grid axis 0 splits the Cin reduction ('arbitrary').

    Blocks: gate (kb,1), x (kb,HW), w^T (kb,Cout); res/gamma/beta/out are
    resident (constant index_map).  The conv output is accumulated into a
    VMEM scratch; BN + residual + store run only on the last step.
    """
    k = pl.program_id(0)
    gate = jax.nn.sigmoid(gate_ref[...])                    # (kb, 1)
    w_s = wt_ref[...] * gate                                 # (kb, Cout)
    # (Cout, HW): contract over the Cin block (LHS-transposed MXU matmul).
    y_part = lax.dot_general(w_s, x_ref[...],
                             dimension_numbers=(((0,), (0,)), ((), ())),
                             preferred_element_type=jnp.float32)

    @pl.when(k == 0)
    def _():
        acc_ref[...] = y_part

    @pl.when(k > 0)
    def _():
        acc_ref[...] = acc_ref[...] + y_part

    @pl.when(k == pl.num_programs(0) - 1)
    def _():
        _bn_residual_store(acc_ref[...], res_ref[...], gamma_ref[...],
                           beta_ref[...], o_ref, eps=eps, inv_count=inv_count)


def _kernel_cout_parallel(gate_ref, x_ref, w_ref, res_ref, gamma_ref, beta_ref,
                          o_ref, *, eps, inv_count):
    """Grid axis 0 splits Cout ('parallel' -> both v7x TensorCores).

    BN statistics are per output channel, so every Cout block is fully
    independent; gate and x are resident full blocks.
    """
    gate = jax.nn.sigmoid(gate_ref[...])                     # (1, Cin)
    w_s = w_ref[...] * gate                                  # (cb, Cin)
    y = jnp.dot(w_s, x_ref[...], preferred_element_type=jnp.float32)  # (cb, HW)
    _bn_residual_store(y, res_ref[...], gamma_ref[...], beta_ref[...], o_ref,
                       eps=eps, inv_count=inv_count)


def fused_se_conv_bn_add(x39, x35, x29, conv_w, bn_gamma, bn_beta, eps=1e-5):
    """sigmoid(x39)*x35 -> 1x1 conv -> batchnorm (batch stats) -> + x29.

    x39: (N, Cin, 1, 1), x35: (N, Cin, H, W), x29: (N, Cout, H, W),
    conv_w: (Cout, Cin, 1, 1), bn_gamma/bn_beta: (Cout,). Returns (N, Cout, H, W).
    """
    N, Cin, H, W = x35.shape
    Cout = conv_w.shape[0]
    HW = H * W
    if N != 1:
        raise NotImplementedError("module batch is 1; kernel squeezes N")

    # Memory-order-preserving reshapes only (N == 1): 2-D views, H*W lane-dense.
    x2d = x35.reshape(Cin, HW)
    res2d = x29.reshape(Cout, HW)
    gamma = bn_gamma.reshape(Cout, 1)
    beta = bn_beta.reshape(Cout, 1)
    inv_count = 1.0 / float(N * HW)

    flops = int(2 * Cout * Cin * HW + 10 * Cout * HW)
    bytes_accessed = int(4 * (Cin * HW + 2 * Cout * HW + Cin * Cout + Cin + 2 * Cout))
    cost = pl.CostEstimate(flops=flops, transcendentals=int(Cin + Cout),
                           bytes_accessed=bytes_accessed)

    if _is_v7x() and Cout % 8 == 0 and Cout > 8:
        # v7x: 3 'parallel' steps over Cout blocks of 8 -> both TensorCores.
        cb = 8
        out = pl.pallas_call(
            functools.partial(_kernel_cout_parallel, eps=eps, inv_count=inv_count),
            out_shape=jax.ShapeDtypeStruct((Cout, HW), x35.dtype),
            grid=(Cout // cb,),
            in_specs=[
                pl.BlockSpec((1, Cin), lambda j: (0, 0)),       # sigmoid gate
                pl.BlockSpec((Cin, HW), lambda j: (0, 0)),      # x35 (resident)
                pl.BlockSpec((cb, Cin), lambda j: (j, 0)),      # conv weight
                pl.BlockSpec((cb, HW), lambda j: (j, 0)),       # residual x29
                pl.BlockSpec((cb, 1), lambda j: (j, 0)),        # bn gamma
                pl.BlockSpec((cb, 1), lambda j: (j, 0)),        # bn beta
            ],
            out_specs=pl.BlockSpec((cb, HW), lambda j: (j, 0)),
            compiler_params=pltpu.CompilerParams(
                dimension_semantics=("parallel",)),
            cost_estimate=cost,
        )(x39.reshape(1, Cin), x2d, conv_w.reshape(Cout, Cin), res2d, gamma, beta)
    else:
        # v5e/v6e (default): 2-step Cin-reduction grid hides part of the
        # serialized prologue DMA behind MXU compute.
        kb = Cin // 2 if (Cin % 2 == 0 and (Cin // 2) % 8 == 0) else Cin
        w_t = conv_w.reshape(Cout, Cin).T                     # (Cin, Cout), tiny
        out = pl.pallas_call(
            functools.partial(_kernel_cin_reduce, eps=eps, inv_count=inv_count),
            out_shape=jax.ShapeDtypeStruct((Cout, HW), x35.dtype),
            grid=(Cin // kb,),
            in_specs=[
                pl.BlockSpec((kb, 1), lambda k: (k, 0)),        # sigmoid gate
                pl.BlockSpec((kb, HW), lambda k: (k, 0)),       # x35 (Cin block)
                pl.BlockSpec((kb, Cout), lambda k: (k, 0)),     # conv weight^T
                pl.BlockSpec((Cout, HW), lambda k: (0, 0)),     # residual x29
                pl.BlockSpec((Cout, 1), lambda k: (0, 0)),      # bn gamma
                pl.BlockSpec((Cout, 1), lambda k: (0, 0)),      # bn beta
            ],
            out_specs=pl.BlockSpec((Cout, HW), lambda k: (0, 0)),
            scratch_shapes=[pltpu.VMEM((Cout, HW), jnp.float32)],
            compiler_params=pltpu.CompilerParams(
                dimension_semantics=("arbitrary",)),
            cost_estimate=cost,
        )(x39.reshape(Cin, 1), x2d, w_t, res2d, gamma, beta)

    return out.reshape(N, Cout, H, W)


def _reference(x39, x35, x29, conv_w, gamma, beta, eps=1e-5):
    N, Cin, H, W = x35.shape
    Cout = conv_w.shape[0]
    x41 = x35 * jax.nn.sigmoid(x39)
    xf = jnp.transpose(x41, (0, 2, 3, 1)).reshape(-1, Cin)
    y = jnp.dot(xf, conv_w.reshape(Cout, Cin).T)
    mean = jnp.mean(y, axis=0)
    var = jnp.var(y, axis=0)
    y = (y - mean) / jnp.sqrt(var + eps) * gamma + beta
    y = jnp.transpose(y.reshape(N, H, W, Cout), (0, 3, 1, 2))
    return y + x29


if __name__ == "__main__":
    N, Cin, Cout, H, W = 1, 144, 24, 56, 56   # shapes implied by the module

    key = jax.random.PRNGKey(0)
    k1, k2, k3, k4, k5, k6 = jax.random.split(key, 6)
    x39 = jax.random.normal(k1, (N, Cin, 1, 1), jnp.float32)
    x35 = jax.random.normal(k2, (N, Cin, H, W), jnp.float32)
    x29 = jax.random.normal(k3, (N, Cout, H, W), jnp.float32)
    # Deterministic parameter init (Conv2d 144->24 1x1 no bias; BN affine params)
    conv_w = jax.random.normal(k4, (Cout, Cin, 1, 1), jnp.float32) / jnp.sqrt(Cin)
    bn_gamma = 1.0 + 0.1 * jax.random.normal(k5, (Cout,), jnp.float32)
    bn_beta = 0.1 * jax.random.normal(k6, (Cout,), jnp.float32)

    out = fused_se_conv_bn_add(x39, x35, x29, conv_w, bn_gamma, bn_beta)
    out = jax.block_until_ready(out)

    ref = _reference(x39, x35, x29, conv_w, bn_gamma, bn_beta)
    assert out.shape == (N, Cout, H, W) and out.dtype == jnp.float32
    err = float(jnp.max(jnp.abs(out - ref)))
    if not bool(jnp.all(jnp.isfinite(out))) or err > 5e-2:
        raise SystemExit(f"mismatch vs reference: max abs err = {err}")
    print("KERNEL_OK")
</pallas_src>

<mosaic_0001>
module attributes {stable_mosaic.version = 11 : i64} {
  func.func @_kernel_cin_reduce(%arg0: i32, %arg1: memref<72x1xf32, #tpu.memory_space<vmem>>, %arg2: memref<72x3136xf32, #tpu.memory_space<vmem>>, %arg3: memref<72x24xf32, #tpu.memory_space<vmem>>, %arg4: memref<24x3136xf32, #tpu.memory_space<vmem>>, %arg5: memref<24x1xf32, #tpu.memory_space<vmem>>, %arg6: memref<24x1xf32, #tpu.memory_space<vmem>>, %arg7: memref<24x3136xf32, #tpu.memory_space<vmem>>, %arg8: memref<24x3136xf32, #tpu.memory_space<vmem>>) attributes {dimension_semantics = [#tpu.dimension_semantics<arbitrary>], iteration_bounds = array<i64: 2>, scalar_prefetch = 0 : i64, scratch_operands = 1 : i64, tpu.core_type = #tpu.core_type<tc>, window_params = [{transform_indices = @transform_0, window_bounds = array<i64: 72, 1>}, {transform_indices = @transform_1, window_bounds = array<i64: 72, 3136>}, {transform_indices = @transform_2, window_bounds = array<i64: 72, 24>}, {pipeline_mode = #tpu.pipeline_mode<synchronous>, transform_indices = @transform_3, window_bounds = array<i64: 24, 3136>}, {pipeline_mode = #tpu.pipeline_mode<synchronous>, transform_indices = @transform_4, window_bounds = array<i64: 24, 1>}, {pipeline_mode = #tpu.pipeline_mode<synchronous>, transform_indices = @transform_5, window_bounds = array<i64: 24, 1>}, {pipeline_mode = #tpu.pipeline_mode<synchronous>, transform_indices = @transform_6, window_bounds = array<i64: 24, 3136>}]} {
    %c0 = arith.constant 0 : index
    %c0_0 = arith.constant 0 : index
    %0 = vector.load %arg1[%c0, %c0_0] : memref<72x1xf32, #tpu.memory_space<vmem>>, vector<72x1xf32>
    %1 = arith.negf %0 : vector<72x1xf32>
    %2 = math.exp %1 : vector<72x1xf32>
    %cst = arith.constant 1.000000e+00 : f32
    %3 = vector.broadcast %cst : f32 to vector<72x1xf32>
    %4 = arith.addf %3, %2 : vector<72x1xf32>
    %5 = arith.divf %3, %4 : vector<72x1xf32>
    %c0_1 = arith.constant 0 : index
    %c0_2 = arith.constant 0 : index
    %6 = vector.load %arg3[%c0_1, %c0_2] : memref<72x24xf32, #tpu.memory_space<vmem>>, vector<72x24xf32>
    %7 = vector.broadcast %5 : vector<72x1xf32> to vector<72x24xf32>
    %8 = arith.mulf %6, %7 : vector<72x24xf32>
    %c0_3 = arith.constant 0 : index
    %c0_4 = arith.constant 0 : index
    %9 = vector.load %arg2[%c0_3, %c0_4] : memref<72x3136xf32, #tpu.memory_space<vmem>>, vector<72x3136xf32>
    %cst_5 = arith.constant dense<0.000000e+00> : vector<24x3136xf32>
    %10 = tpu.matmul %8, %9, %cst_5 {dimension_numbers = #tpu.dot_dimension_numbers<[0], [0], [1], [1], [0, 1, 1, 1], [], []>} : vector<72x24xf32>, vector<72x3136xf32>, vector<24x3136xf32> -> vector<24x3136xf32>
    %c0_i32 = arith.constant 0 : i32
    %11 = arith.cmpi eq, %arg0, %c0_i32 : i32
    %12 = arith.extui %11 : i1 to i32
    %c0_i32_6 = arith.constant 0 : i32
    %13 = arith.cmpi ne, %12, %c0_i32_6 : i32
    scf.if %13 {
      %c0_10 = arith.constant 0 : index
      %c0_11 = arith.constant 0 : index
      %20 = vector.load %arg8[%c0_10, %c0_11] : memref<24x3136xf32, #tpu.memory_space<vmem>>, vector<24x3136xf32>
      tpu.vector_store %arg8[%c0_10, %c0_11], %10 {strides = array<i32>} : memref<24x3136xf32, #tpu.memory_space<vmem>>, vector<24x3136xf32>,
    } else {
    }
    %c0_i32_7 = arith.constant 0 : i32
    %14 = arith.cmpi sgt, %arg0, %c0_i32_7 : i32
    %15 = arith.extui %14 : i1 to i32
    %c0_i32_8 = arith.constant 0 : i32
    %16 = arith.cmpi ne, %15, %c0_i32_8 : i32
    scf.if %16 {
      %c0_10 = arith.constant 0 : index
      %c0_11 = arith.constant 0 : index
      %20 = vector.load %arg8[%c0_10, %c0_11] : memref<24x3136xf32, #tpu.memory_space<vmem>>, vector<24x3136xf32>
      %21 = arith.addf %20, %10 : vector<24x3136xf32>
      %c0_12 = arith.constant 0 : index
      %c0_13 = arith.constant 0 : index
      %22 = vector.load %arg8[%c0_12, %c0_13] : memref<24x3136xf32, #tpu.memory_space<vmem>>, vector<24x3136xf32>
      tpu.vector_store %arg8[%c0_12, %c0_13], %21 {strides = array<i32>} : memref<24x3136xf32, #tpu.memory_space<vmem>>, vector<24x3136xf32>,
    } else {
    }
    %c1_i32 = arith.constant 1 : i32
    %17 = arith.cmpi eq, %arg0, %c1_i32 : i32
    %18 = arith.extui %17 : i1 to i32
    %c0_i32_9 = arith.constant 0 : i32
    %19 = arith.cmpi ne, %18, %c0_i32_9 : i32
    scf.if %19 {
      %c0_10 = arith.constant 0 : index
      %c0_11 = arith.constant 0 : index
      %20 = vector.load %arg8[%c0_10, %c0_11] : memref<24x3136xf32, #tpu.memory_space<vmem>>, vector<24x3136xf32>
      %c0_12 = arith.constant 0 : index
      %c0_13 = arith.constant 0 : index
      %21 = vector.load %arg4[%c0_12, %c0_13] : memref<24x3136xf32, #tpu.memory_space<vmem>>, vector<24x3136xf32>
      %c0_14 = arith.constant 0 : index
      %c0_15 = arith.constant 0 : index
      %22 = vector.load %arg5[%c0_14, %c0_15] : memref<24x1xf32, #tpu.memory_space<vmem>>, vector<24x1xf32>
      %c0_16 = arith.constant 0 : index
      %c0_17 = arith.constant 0 : index
      %23 = vector.load %arg6[%c0_16, %c0_17] : memref<24x1xf32, #tpu.memory_space<vmem>>, vector<24x1xf32>
      %cst_18 = arith.constant dense<0.000000e+00> : vector<24xf32>
      %24 = vector.multi_reduction <add>, %20, %cst_18 [1] : vector<24x3136xf32> to vector<24xf32>
      %25 = vector.shape_cast %24 : vector<24xf32> to vector<24x1xf32>
      %26 = arith.mulf %20, %20 : vector<24x3136xf32>
      %cst_19 = arith.constant dense<0.000000e+00> : vector<24xf32>
      %27 = vector.multi_reduction <add>, %26, %cst_19 [1] : vector<24x3136xf32> to vector<24xf32>
      %28 = vector.shape_cast %27 : vector<24xf32> to vector<24x1xf32>
      %cst_20 = arith.constant 3.18877544E-4 : f32
      %29 = vector.broadcast %cst_20 : f32 to vector<24x1xf32>
      %30 = arith.mulf %25, %29 : vector<24x1xf32>
      %cst_21 = arith.constant 3.18877544E-4 : f32
      %31 = vector.broadcast %cst_21 : f32 to vector<24x1xf32>
      %32 = arith.mulf %28, %31 : vector<24x1xf32>
      %33 = arith.mulf %30, %30 : vector<24x1xf32>
      %34 = arith.subf %32, %33 : vector<24x1xf32>
      %cst_22 = arith.constant 0.000000e+00 : f32
      %35 = vector.broadcast %cst_22 : f32 to vector<24x1xf32>
      %36 = arith.maximumf %34, %35 : vector<24x1xf32>
      %cst_23 = arith.constant 9.99999974E-6 : f32
      %37 = vector.broadcast %cst_23 : f32 to vector<24x1xf32>
      %38 = arith.addf %36, %37 : vector<24x1xf32>
      %39 = math.rsqrt %38 : vector<24x1xf32>
      %40 = arith.mulf %22, %39 : vector<24x1xf32>
      %41 = arith.mulf %30, %40 : vector<24x1xf32>
      %42 = arith.subf %23, %41 : vector<24x1xf32>
      %43 = vector.broadcast %40 : vector<24x1xf32> to vector<24x3136xf32>
      %44 = arith.mulf %20, %43 : vector<24x3136xf32>
      %45 = vector.broadcast %42 : vector<24x1xf32> to vector<24x3136xf32>
      %46 = arith.addf %44, %45 : vector<24x3136xf32>
      %47 = arith.addf %46, %21 : vector<24x3136xf32>
      %c0_24 = arith.constant 0 : index
      %c0_25 = arith.constant 0 : index
      %48 = vector.load %arg7[%c0_24, %c0_25] : memref<24x3136xf32, #tpu.memory_space<vmem>>, vector<24x3136xf32>
      tpu.vector_store %arg7[%c0_24, %c0_25], %47 {strides = array<i32>} : memref<24x3136xf32, #tpu.memory_space<vmem>>, vector<24x3136xf32>,
    } else {
    }
    return
  }
  func.func @transform_0(%arg0: i32) -> (i32, i32) {
    %c0_i32 = arith.constant 0 : i32
    %c0_i32_0 = arith.constant 0 : i32
    return %arg0, %c0_i32 : i32, i32
  }
  func.func @transform_1(%arg0: i32) -> (i32, i32) {
    %c0_i32 = arith.constant 0 : i32
    %c0_i32_0 = arith.constant 0 : i32
    return %arg0, %c0_i32 : i32, i32
  }
  func.func @transform_2(%arg0: i32) -> (i32, i32) {
    %c0_i32 = arith.constant 0 : i32
    %c0_i32_0 = arith.constant 0 : i32
    return %arg0, %c0_i32 : i32, i32
  }
  func.func @transform_3(%arg0: i32) -> (i32, i32) {
    %c0_i32 = arith.constant 0 : i32
    %c0_i32_0 = arith.constant 0 : i32
    %c0_i32_1 = arith.constant 0 : i32
    return %c0_i32, %c0_i32_0 : i32, i32
  }
  func.func @transform_4(%arg0: i32) -> (i32, i32) {
    %c0_i32 = arith.constant 0 : i32
    %c0_i32_0 = arith.constant 0 : i32
    %c0_i32_1 = arith.constant 0 : i32
    return %c0_i32, %c0_i32_0 : i32, i32
  }
  func.func @transform_5(%arg0: i32) -> (i32, i32) {
    %c0_i32 = arith.constant 0 : i32
    %c0_i32_0 = arith.constant 0 : i32
    %c0_i32_1 = arith.constant 0 : i32
    return %c0_i32, %c0_i32_0 : i32, i32
  }
  func.func @transform_6(%arg0: i32) -> (i32, i32) {
    %c0_i32 = arith.constant 0 : i32
    %c0_i32_0 = arith.constant 0 : i32
    %c0_i32_1 = arith.constant 0 : i32
    return %c0_i32, %c0_i32_0 : i32, i32
  }
}

</mosaic_0001>

<bundles_post_ra>
// kernel: tpu_custom_call.1
= control target key start
LH: loop header
LB: loop body
LE: loop exit
PB: predicated region body
PF: predicated region fallthrough
CT: control target
= control target key end

     0   :  { %11 = vsyncpa [#allocation4], 0  ;;  %s4597_s0 = inlined_call_operand.vmem [shape: f32[144,1], index: 0, kind: input, shape index: {}]   ;;  %s4598_s1 = inlined_call_operand.hbm [shape: f32[144,3136], index: 1, kind: input, shape index: {}]   ;;  %s4599_s2 = inlined_call_operand.vmem [shape: f32[144,24], index: 2, kind: input, shape index: {}]   ;;  %s4600_s3 = inlined_call_operand.hbm [shape: f32[24,3136], index: 3, kind: input, shape index: {}]   ;;  %s4601_s4 = inlined_call_operand.vmem [shape: f32[24,1], index: 4, kind: input, shape index: {}]   ;;  %s4602_s5 = inlined_call_operand.vmem [shape: f32[24,1], index: 5, kind: input, shape index: {}]   ;;  %s4603_s6 = inlined_call_operand.hbm [shape: f32[24,3136], index: 6, kind: output, shape index: {}]  }
   0x1   :  { %13 = vsyncpa [#allocation4 + $0x1], 0 }
   0x2   :  { %14 = vsyncpa [#allocation7], 0 }
   0x3   :  { %15 = vsyncpa [#allocation5], 0  ;;  %s3099_s21 = smov 0   ;;  %s3101_s22 = smov 0  }
   0x4   :  { %s3103_s23 = smov 0   ;;  %s3105_s24 = smov 0  }
   0x5 LB: > { %s3118_s25 = sadd.s32 4294967295, %s3054_s24   ;;  %p67_p0 = scmp.ne.s32.totalorder %s3046_s22, %s3042_s21  ;;  %s3054_s24 = sphi %s3105_s24, %s4766_s24   ;;  %s3050_s23 = sphi %s3103_s23, %s4765_s23   ;;  %s3046_s22 = sphi %s3101_s22, %s4764_s22   ;;  %s3042_s21 = sphi %s3099_s21, %s4763_s21  }
   0x6   : > { %p68_p1 = scmp.eq.s32.totalorder %s3118_s25, 0  ;;  %p2674_p2 = scmp.ge.s32.totalorder %s3054_s24, 1 }
   0x7   : > { %p188_p3 = scmp.lt.s32.totalorder %s3054_s24, 3  ;;  %p2675_p4 = scmp.ne.s32.totalorder %s3118_s25, 0 }
   0x8   : > { %p3127_p5 = por %p68_p1, %p67_p0  ;;  %s199_s29 = sshll.u32 %s4600_s3, 4  ;;  %s200_s29 = int_to_ptr.hbm [resolvable:$true] %s199_s29 }
   0x9   : > { %p3134_p6 = pnand %p2674_p2, %p188_p3  ;;  %s3056_s7 = smov [#allocation6]  }
   0xa   : > { %s201_s8 = sshll.u32 %s3056_s7, 4  ;;  %s3057_s9 = smov 3200   ;;  %s202_s8 = int_to_ptr.vmem [resolvable:$true] %s201_s8 }
   0xb   : > { %p2804_p7 = pneg %p3134_p6  ;;  %s3058_s10 = smov 200  }
   0xc   : > { %s3146_s11 = sadd.s32 1, %s3054_s24   ;;  %s54_s12 = sadd.s32 1, %s3050_s23 }
   0xd   : > { %p2805_p8 = pnand %p2804_p7, %p68_p1  ;;  %s51_s13 = ssub.s32 %s3054_s24, %s3146_s11 }
   0xe   : > { %p61_p9 = scmp.ne.s32.totalorder %s3050_s23, %s3046_s22  ;;  %p52_p10 = scmp.eq.s32.totalorder %s51_s13, 0 }
   0xf   : > { %2807 = dma.hbm_to_vmem [thread:$0]  (!%p2805_p8), %s200_s29, 9600, %s202_s8, [#allocation7], %s3057_s9, %s3057_s9, %s3058_s10  }
  0x10   : > { %p62_p11 = scmp.eq.s32.totalorder %s3054_s24, 0  ;;  %p2813_p12 = scmp.lt.s32.totalorder %s3054_s24, 2 }
  0x11   : > { %s230_s14 = sand.u32 1, %s3050_s23   ;;  %s2814_s17 = smul.u32 1800, %s3054_s24 }
  0x12   : > { %s3157_s15 = scalar_select %p52_p10, %s3050_s23, %s54_s12  }
  0x13   : > { %p63_p13 = por %p62_p11, %p61_p9  ;;  %s2791_s16 = smul.u32 1800, %s230_s14 }
  0x14   : > { %s240_s21 = scalar_lea.hbm %s4598_s1, %s2814_s17  ;;  %s231_s7 = scalar_lea.sflag [#allocation4], %s230_s14 }
  0x15   : > { %p3160_p0 = pnand %p2813_p12, %p63_p13  ;;  %s234_s27 = scalar_lea.vmem [#allocation3], %s2791_s16 }
  0x16   : > { %s243_s28 = sshll.u32 %s234_s27, 4  ;;  %s241_s29 = sshll.u32 %s240_s21, 4  ;;  %s244_s28 = int_to_ptr.vmem [resolvable:$true] %s243_s28  ;;  %s242_s29 = int_to_ptr.hbm [resolvable:$true] %s241_s29 }
  0x17   : > { %s2954_s8 = sshra.s32 %s242_s29, 4  ;;  %p2958_p3 = pneg %p3160_p0  ;;  %s2955_s8 = int_to_ptr.hbm [resolvable:$true] %s2954_s8 }
  0x18   : > { %s2956_s12 = scalar_lea.hbm %s2955_s8, 1800  ;;  %s2961_s19 = scalar_lea.hbm %s4598_s1, 3600 }
  0x19   : > { %p2957_p2 = scmp.ne.s32.totalorder %s2955_s8, %s2956_s12  ;;  %p2962_p9 = scmp.lt.s32.totalorder %s2955_s8, %s4598_s1 }
  0x1a   : > { %p2963_p10 = scmp.lt.s32.totalorder %s2961_s19, %s2956_s12 }
  0x1b   : > { %p2959_p7 = pnand %p2958_p3, %p2957_p2 }
  0x1c   : > { %p2964_p11 = por %p2963_p10, %p2962_p9 }
  0x1d   : > { %p2960_p8 = pneg %p2959_p7 }
  0x1f   : > { %p2965_p12 = pnand %p2964_p11, %p2960_p8 }
  0x21   : > { %2968 = shalt.err (!%p2965_p12)
}
  0x22   : > { %2811 = dma.hbm_to_vmem [thread:$0]  (!%p3160_p0), %s242_s29, 28800, %s244_s28, %s231_s7, %s3057_s9, %s3057_s9, %s3058_s10  }
  0x23   : > { %264 = sbr.rel (%p3134_p6) target bundleno = 1228 (0x4cc), region = 44 }
  0x28   : > { %s266_s14 = sand.u32 1, %s3046_s22  }
  0x29   : > { %s2793_s16 = smul.u32 1800, %s266_s14  ;;  %s267_s21 = scalar_lea.sflag [#allocation4], %s266_s14 }
  0x2b   : > { %s3183_s27 = scalar_lea.vmem [#allocation3], %s2793_s16 }
  0x2c   : > { %3029 = dma.done.wait (%p3127_p5), %s267_s21, 28800  }
  0x2d   : > { %3031 = vsyncadd (%p3127_p5), %s267_s21, 4294938496 }
  0x2e   : > { %3033 = dma.done.wait (%p68_p1), [#allocation7], 9600  }
  0x2f   : > { %3035 = vsyncadd (%p68_p1), [#allocation7], 4294957696  ;;  %s310_s30 = smul.u32 9, %s3118_s25  ;;  %v3059_v0 = vmov 0   ;;  %v717_v34 = vld [vmem:[%s3183_s27 + $0x4b8] sm:$0xff] }
  0x30   : > { %2860 = vset.pattern.permute.xlu1 %v3059_v0  ;;  %2859 = vset.pattern.permute.xlu0 %v3059_v0 }
  0x31   : > { %p311_p6 = scmp.lt.s32.totalorder %s310_s30, 17  ;;  %2861 = vset.pattern.permute.xlu2 %v3059_v0 }
  0x33   : > { %s4768_s30 = smov (!%p311_p6, %s310_s30), 17 }
  0x34   : > { %s2680_s9 = sshll.u32 %s4768_s30, 3 }
  0x35   : > { %s3202_s18 = scalar_lea.vmem %s4597_s0, %s2680_s9  ;;  %s3324_s7 = scalar_lea.vmem %s4599_s2, %s2680_s9 }
  0x36   : > { %v325_v1 = vld [vmem:[%s3202_s18 + $0x10] sm:$0xff]  ;;  %v323_v2 = vld [vmem:[%s3202_s18] sm:$0xff]  ;;  %v326_v3 = vld [vmem:[%s3202_s18 + $0x18] sm:$0xff] }
  0x37   : > { %v2684_v4 = vmul.f32 -1.442695, %v325_v1  ;;  %v2682_v5 = vmul.f32 -1.442695, %v323_v2  ;;  %v2685_v6 = vmul.f32 -1.442695, %v326_v3 }
  0x38   : > { %v324_v7 = vld [vmem:[%s3202_s18 + $0x8] sm:$0xff]  ;;  %v330_v8 = vld [vmem:[%s3202_s18 + $0x38] sm:$0xff]  ;;  %v329_v9 = vld [vmem:[%s3202_s18 + $0x30] sm:$0xff] }
  0x39   : > { %2862 = vpow2.f32 %v2684_v4  ;;  %v2683_v10 = vmul.f32 -1.442695, %v324_v7  ;;  %v2689_v11 = vmul.f32 -1.442695, %v330_v8  ;;  %v2688_v12 = vmul.f32 -1.442695, %v329_v9 }
  0x3a   : > { %2864 = vpow2.f32 %v2682_v5  ;;  %v327_v25 = vld [vmem:[%s3202_s18 + $0x20] sm:$0xff]  ;;  %v328_v48 = vld [vmem:[%s3202_s18 + $0x28] sm:$0xff] }
  0x3b   : > { %2866 = vpow2.f32 %v2685_v6  ;;  %v2686_v31 = vmul.f32 -1.442695, %v327_v25  ;;  %v331_v58 = vld [vmem:[%s3202_s18 + $0x40] sm:$0xff]  ;;  %v2687_v61 = vmul.f32 -1.442695, %v328_v48 }
  0x3c   : > { %2868 = vpow2.f32 %v2683_v10  ;;  %v2690_v2 = vmul.f32 -1.442695, %v331_v58 }
  0x3d   : > { %2870 = vpow2.f32 %v2689_v11  ;;  %v504_v11 = vld [vmem:[%s3324_s7 + $0x8] sm:$0xff] }
  0x3e   : > { %2872 = vpow2.f32 %v2688_v12 }
  0x3f   : > { %v2863_v13 = vpop.eup %2862 }
  0x40   : > { %v2865_v14 = vpop.eup %2864  ;;  %v361_v15 = vadd.f32 1.0, %v2863_v13 }
  0x41   : > { %v2867_v16 = vpop.eup %2866  ;;  %v359_v17 = vadd.f32 1.0, %v2865_v14 }
  0x42   : > { %v2869_v18 = vpop.eup %2868  ;;  %2874 = vrcp.f32 %v361_v15  ;;  %v3210_v21 = vadd.f32 1.0, %v2867_v16  ;;  %v407_v23 = vand.u32 2147483647, %v361_v15  ;;  %v409_v26 = vand.u32 2147483648, %v361_v15 }
  0x43   : > { %v2871_v19 = vpop.eup %2870  ;;  %2876 = vrcp.f32 %v359_v17  ;;  %v3212_v22 = vadd.f32 1.0, %v2869_v18  ;;  %v377_v27 = vand.u32 2147483647, %v359_v17  ;;  %v379_v28 = vand.u32 2147483648, %v359_v17 }
  0x44   : > { %v2873_v20 = vpop.eup %2872  ;;  %v3214_v24 = vadd.f32 1.0, %v2871_v19  ;;  %2878 = vrcp.f32 %v3210_v21  ;;  %vm403_vm0 = vweird.f32 %v361_v15  ;;  %vm3222_vm1 = vcmp.eq.f32.partialorder %v407_v23, 8.507059e+37 }
  0x45   : > { %2880 = vrcp.f32 %v3212_v22  ;;  %v3219_v29 = vadd.f32 1.0, %v2873_v20  ;;  %vm373_vm2 = vweird.f32 %v359_v17  ;;  %v410_v35 = vor.u32 1.1754944e-38, %v409_v26 }
  0x46   : > { %2882 = vrcp.f32 %v3214_v24  ;;  %vm3226_vm3 = vcmp.eq.f32.partialorder %v377_v27, 8.507059e+37  ;;  %v380_v38 = vor.u32 1.1754944e-38, %v379_v28  ;;  %vm418_vm5 = vweird.f32 %v3210_v21 }
  0x47   : > { %2884 = vrcp.f32 %v3219_v29  ;;  %v422_v42 = vand.u32 2147483647, %v3210_v21  ;;  %v424_v43 = vand.u32 2147483648, %v3210_v21  ;;  %vm388_vm7 = vweird.f32 %v3212_v22 }
  0x48   : > { %v2875_v30 = vpop.eup %2874  ;;  %v392_v47 = vand.u32 2147483647, %v3212_v22  ;;  %v394_v53 = vand.u32 2147483648, %v3212_v22  ;;  %2886 = vpow2.f32 %v2686_v31  ;;  %v484_v25 = vand.u32 2147483648, %v3214_v24  ;;  %v742_v31 = vld [vmem:[%s3183_s27 + $0x580] sm:$0xff] }
  0x49   : > { %v2877_v32 = vpop.eup %2876  ;;  %v399_v33 = vmul.f32 %v2875_v30, %v361_v15  ;;  %vm404_vm4 = vweird.f32 %v2875_v30  ;;  %vm3276_vm13 = vcmp.eq.f32.partialorder %v422_v42, 8.507059e+37  ;;  %v425_v12 = vor.u32 1.1754944e-38, %v424_v43 }
  0x4a   : > { %v369_v36 = vmul.f32 %v2877_v32, %v359_v17  ;;  %v2879_v40 = vpop.eup %2878  ;;  %vm374_vm6 = vweird.f32 %v2877_v32  ;;  %vm3242_vm8 = vmor %vm403_vm0, %vm404_vm4  ;;  %2888 = vpow2.f32 %v2687_v61  ;;  %v395_v16 = vor.u32 1.1754944e-38, %v394_v53 }
  0x4b   : > { %v400_v39 = vsub.f32 1.0, %v399_v33  ;;  %v2881_v44 = vpop.eup %2880  ;;  %v414_v46 = vmul.f32 %v2879_v40, %v3210_v21  ;;  %vm419_vm9 = vweird.f32 %v2879_v40  ;;  %vm3250_vm10 = vmor %vm373_vm2, %vm374_vm6  ;;  %2890 = vpow2.f32 %v2690_v2 }
  0x4c   : > { %v370_v41 = vsub.f32 1.0, %v369_v36  ;;  %v3238_v49 = vpop.eup %2882  ;;  %v384_v52 = vmul.f32 %v2881_v44, %v3212_v22  ;;  %vm389_vm11 = vweird.f32 %v2881_v44  ;;  %vm3268_vm12 = vmor %vm418_vm5, %vm419_vm9  ;;  %vm393_vm15 = vcmp.eq.f32.partialorder %v392_v47, 8.507059e+37 }
  0x4d   : > { %v401_v45 = vmul.f32 %v2875_v30, %v400_v39  ;;  %v415_v56 = vsub.f32 1.0, %v414_v46  ;;  %v474_v57 = vmul.f32 %v3238_v49, %v3214_v24  ;;  %v3257_v62 = vpop.eup %2884  ;;  %vm3283_vm14 = vmor %vm388_vm7, %vm389_vm11  ;;  %vm478_vm0 = vweird.f32 %v3214_v24 }
  0x4e   : > { %v371_v51 = vmul.f32 %v2877_v32, %v370_v41  ;;  %v385_v60 = vsub.f32 1.0, %v384_v52  ;;  %v459_v7 = vmul.f32 %v3257_v62, %v3219_v29  ;;  %v2887_v18 = vpop.eup %2886  ;;  %v482_v21 = vand.u32 2147483647, %v3214_v24 }
  0x4f   : > { %v402_v54 = vadd.f32 %v2875_v30, %v401_v45  ;;  %v416_v0 = vmul.f32 %v2879_v40, %v415_v56  ;;  %v475_v1 = vsub.f32 1.0, %v474_v57  ;;  %v363_v22 = vadd.f32 1.0, %v2887_v18 }
  0x50   : > { %v372_v59 = vadd.f32 %v2877_v32, %v371_v51  ;;  %v386_v6 = vmul.f32 %v2881_v44, %v385_v60  ;;  %v460_v14 = vsub.f32 1.0, %v459_v7  ;;  %vm463_vm2 = vweird.f32 %v3219_v29 }
  0x51   : > { %v406_v63 = vsel %vm3242_vm8, %v2875_v30, %v402_v54  ;;  %v417_v9 = vadd.f32 %v2879_v40, %v416_v0  ;;  %v476_v17 = vmul.f32 %v3238_v49, %v475_v1  ;;  %v469_v28 = vand.u32 2147483648, %v3219_v29  ;;  %v2889_v30 = vpop.eup %2888 }
  0x52   : > { %v411_v3 = vsel %vm3222_vm1, %v410_v35, %v406_v63  ;;  %v376_v4 = vsel %vm3250_vm10, %v2877_v32, %v372_v59  ;;  %v387_v13 = vadd.f32 %v2881_v44, %v386_v6  ;;  %v461_v20 = vmul.f32 %v3257_v62, %v460_v14  ;;  %v2891_v24 = vpop.eup %2890  ;;  %v505_v14 = vld [vmem:[%s3324_s7 + $0x10] sm:$0xff] }
  0x53   : > { %524 = vperm.xlu1 %2860, %v411_v3   ;;  %v381_v8 = vsel %vm3226_vm3, %v380_v38, %v376_v4  ;;  %v421_v15 = vsel %vm3268_vm12, %v2879_v40, %v417_v9  ;;  %vm479_vm1 = vweird.f32 %v3238_v49  ;;  %vm464_vm3 = vweird.f32 %v3257_v62 }
  0x54   : > { %514 = vperm.xlu0 %2859, %v381_v8   ;;  %v391_v19 = vsel %vm3283_vm14, %v2881_v44, %v387_v13  ;;  %v426_v23 = vsel %vm3276_vm13, %v425_v12, %v421_v15  ;;  %v477_v27 = vadd.f32 %v3238_v49, %v476_v17  ;;  %2892 = vrcp.f32 %v363_v22  ;;  %vm3303_vm4 = vmor %vm478_vm0, %vm479_vm1  ;;  %v503_v8 = vld [vmem:[%s3324_s7] sm:$0xff]  ;;  %v506_v17 = vld [vmem:[%s3324_s7 + $0x18] sm:$0xff] }
  0x55   : > { %v396_v26 = vsel %vm393_vm15, %v395_v16, %v391_v19  ;;  %v462_v32 = vadd.f32 %v3257_v62, %v461_v20  ;;  %v467_v33 = vand.u32 2147483647, %v3219_v29  ;;  %vm3309_vm5 = vmor %vm463_vm2, %vm464_vm3  ;;  %v364_v35 = vadd.f32 1.0, %v2889_v30  ;;  %v507_v20 = vld [vmem:[%s3324_s7 + $0x20] sm:$0xff]  ;;  %v741_v30 = vld [vmem:[%s3183_s27 + $0x578] sm:$0xff] }
  0x56   : > { %v485_v36 = vor.u32 1.1754944e-38, %v484_v25  ;;  %v367_v37 = vadd.f32 1.0, %v2891_v24  ;;  %v481_v38 = vsel %vm3303_vm4, %v3238_v49, %v477_v27  ;;  %vm483_vm6 = vcmp.eq.f32.partialorder %v482_v21, 8.507059e+37  ;;  %v767_v25 = vld [vmem:[%s3183_s27 + $0x648] sm:$0xff]  ;;  %v716_v24 = vld [vmem:[%s3183_s27 + $0x4b0] sm:$0xff] }
  0x57   : > { %v470_v39 = vor.u32 1.1754944e-38, %v469_v28  ;;  %2894 = vrcp.f32 %v364_v35  ;;  %v466_v29 = vsel %vm3309_vm5, %v3257_v62, %v462_v32  ;;  %vm468_vm7 = vcmp.eq.f32.partialorder %v467_v33, 8.507059e+37  ;;  %v508_v27 = vld [vmem:[%s3324_s7 + $0x28] sm:$0xff]  ;;  %866 = vmatpush.msra.mxu1 %v767_v25  ;;  %v769_v28 = vld [vmem:[%s3183_s27 + $0x658] sm:$0xff] }
  0x58   : > { %2896 = vrcp.f32 %v367_v37  ;;  %v486_v41 = vsel %vm483_vm6, %v485_v36, %v481_v38  ;;  %v437_v44 = vand.u32 2147483647, %v363_v22  ;;  %v439_v45 = vand.u32 2147483648, %v363_v22  ;;  %918 = vmatpush.msra.mxu3 %v769_v28  ;;  %v743_v32 = vld [vmem:[%s3183_s27 + $0x588] sm:$0xff]  ;;  %v744_v33 = vld [vmem:[%s3183_s27 + $0x590] sm:$0xff]  ;;  %v673_v28 = vld [vmem:[%s3183_s27 + $0x358] sm:$0xff] }
  0x59   : > { %v471_v43 = vsel %vm468_vm7, %v470_v39, %v466_v29  ;;  %vm433_vm8 = vweird.f32 %v363_v22  ;;  %vm448_vm12 = vweird.f32 %v364_v35  ;;  %v454_v55 = vand.u32 2147483648, %v364_v35  ;;  %867 = vmatpush.msra.mxu1 %v742_v31  ;;  %v719_v36 = vld [vmem:[%s3183_s27 + $0x4c8] sm:$0xff]  ;;  %v692_v38 = vld [vmem:[%s3183_s27 + $0x3f0] sm:$0xff]  ;;  %v693_v29 = vld [vmem:[%s3183_s27 + $0x3f8] sm:$0xff] }
  0x5a   : > { %v2893_v40 = vpop.eup %2892  ;;  %vm438_vm11 = vcmp.eq.f32.partialorder %v437_v44, 8.507059e+37  ;;  %v440_v51 = vor.u32 1.1754944e-38, %v439_v45  ;;  %v452_v58 = vand.u32 2147483647, %v364_v35  ;;  %vm493_vm0 = vweird.f32 %v367_v37  ;;  %919 = vmatpush.msra.mxu3 %v744_v33  ;;  %v668_v44 = vld [vmem:[%s3183_s27 + $0x330] sm:$0xff]  ;;  %v669_v45 = vld [vmem:[%s3183_s27 + $0x338] sm:$0xff] }
  0x5b   : > { %529 = vperm.xlu1 %2860, %v426_v23   ;;  %v429_v42 = vmul.f32 %v2893_v40, %v363_v22  ;;  %vm434_vm9 = vweird.f32 %v2893_v40  ;;  %v455_v62 = vor.u32 1.1754944e-38, %v454_v55  ;;  %v499_v2 = vand.u32 2147483648, %v367_v37  ;;  %v766_v23 = vld [vmem:[%s3183_s27 + $0x640] sm:$0xff]  ;;  %868 = vmatpush.msra.mxu1 %v717_v34  ;;  %v619_v55 = vld [vmem:[%s3183_s27 + $0x1a8] sm:$0xff]  ;;  %v645_v31 = vld [vmem:[%s3183_s27 + $0x278] sm:$0xff] }
  0x5c   : > { %519 = vperm.xlu0 %2859, %v396_v26   ;;  %vm435_vm10 = vmor %vm433_vm8, %vm434_vm9  ;;  %vm453_vm15 = vcmp.eq.f32.partialorder %v452_v58, 8.507059e+37  ;;  %v497_v4 = vand.u32 2147483647, %v367_v37  ;;  %v768_v26 = vld [vmem:[%s3183_s27 + $0x650] sm:$0xff]  ;;  %840 = vmatpush.msra.mxu0 %v766_v23  ;;  %v698_v23 = vld [vmem:[%s3183_s27 + $0x420] sm:$0xff]  ;;  %vm823_vm4 = vcmask 588800  }
  0x5d   : > { %v430_v46 = vsub.f32 1.0, %v429_v42  ;;  %v2895_v47 = vpop.eup %2894  ;;  %v500_v5 = vor.u32 1.1754944e-38, %v499_v2  ;;  %892 = vmatpush.msra.mxu2 %v768_v26  ;;  %920 = vmatpush.msra.mxu3 %v719_v36  ;;  %v666_v42 = vld [vmem:[%s3183_s27 + $0x320] sm:$0xff]  ;;  %v647_v25 = vld [vmem:[%s3183_s27 + $0x288] sm:$0xff]  ;;  %v648_v33 = vld [vmem:[%s3183_s27 + $0x290] sm:$0xff] }
  0x5e   : > { %v2897_v48 = vpop.eup %2896  ;;  %v444_v50 = vmul.f32 %v2895_v47, %v364_v35  ;;  %vm449_vm13 = vweird.f32 %v2895_v47  ;;  %vm498_vm3 = vcmp.eq.f32.partialorder %v497_v4, 8.507059e+37  ;;  %841 = vmatpush.msra.mxu0 %v741_v30  ;;  %v718_v35 = vld [vmem:[%s3183_s27 + $0x4c0] sm:$0xff]  ;;  %869 = vmatpush.msra.mxu1 %v692_v38  ;;  %v621_v34 = vld [vmem:[%s3183_s27 + $0x1b8] sm:$0xff]  ;;  %v623_v36 = vld [vmem:[%s3183_s27 + $0x1c8] sm:$0xff] }
  0x5f   : > { %v431_v49 = vmul.f32 %v2893_v40, %v430_v46  ;;  %v489_v52 = vmul.f32 %v2897_v48, %v367_v37  ;;  %vm450_vm14 = vmor %vm448_vm12, %vm449_vm13  ;;  %vm494_vm1 = vweird.f32 %v2897_v48  ;;  %893 = vmatpush.msra.mxu2 %v743_v32  ;;  %v691_v37 = vld [vmem:[%s3183_s27 + $0x3e8] sm:$0xff]  ;;  %v641_v46 = vld [vmem:[%s3183_s27 + $0x258] sm:$0xff] }
  0x60   : > { %v445_v54 = vsub.f32 1.0, %v444_v50  ;;  %vm495_vm2 = vmor %vm493_vm0, %vm494_vm1  ;;  %842 = vmatpush.msra.mxu0 %v716_v24  ;;  %v616_v50 = vld [vmem:[%s3183_s27 + $0x190] sm:$0xff]  ;;  %v511_v4 = vld [vmem:[%s3324_s7 + $0x40] sm:$0xff] }
  0x61   : > { %v432_v53 = vadd.f32 %v2893_v40, %v431_v49  ;;  %v490_v59 = vsub.f32 1.0, %v489_v52  ;;  %894 = vmatpush.msra.mxu2 %v718_v35  ;;  %v644_v49 = vld [vmem:[%s3183_s27 + $0x270] sm:$0xff]  ;;  %v670_v26 = vld [vmem:[%s3183_s27 + $0x340] sm:$0xff]  ;;  %v597_v35 = vld [vmem:[%s3183_s27 + $0xf8] sm:$0xff] }
  0x62   : > { %v446_v57 = vmul.f32 %v2895_v47, %v445_v54  ;;  %843 = vmatpush.msra.mxu0 %v691_v37  ;;  %v618_v54 = vld [vmem:[%s3183_s27 + $0x1a0] sm:$0xff]  ;;  %v620_v24 = vld [vmem:[%s3183_s27 + $0x1b0] sm:$0xff]  ;;  %v595_v37 = vld [vmem:[%s3183_s27 + $0xe8] sm:$0xff] }
  0x63   : > { %549 = vperm.xlu1 %2860, %v486_v41   ;;  %v436_v56 = vsel %vm435_vm10, %v2893_v40, %v432_v53  ;;  %v491_v0 = vmul.f32 %v2897_v48, %v490_v59  ;;  %v694_v41 = vld [vmem:[%s3183_s27 + $0x400] sm:$0xff]  ;;  %895 = vmatpush.msra.mxu2 %v693_v29  ;;  %v617_v53 = vld [vmem:[%s3183_s27 + $0x198] sm:$0xff]  ;;  %v596_v38 = vld [vmem:[%s3183_s27 + $0xf0] sm:$0xff] }
  0x64   : > { %544 = vperm.xlu0 %2859, %v471_v43   ;;  %v441_v60 = vsel %vm438_vm11, %v440_v51, %v436_v56  ;;  %v447_v61 = vadd.f32 %v2895_v47, %v446_v57  ;;  %v667_v43 = vld [vmem:[%s3183_s27 + $0x328] sm:$0xff]  ;;  %921 = vmatpush.msra.mxu3 %v694_v41  ;;  %v509_v51 = vld [vmem:[%s3324_s7 + $0x30] sm:$0xff]  ;;  %v622_v30 = vld [vmem:[%s3183_s27 + $0x1c0] sm:$0xff] }
  0x65   : > { %534 = vperm.xlu2 %2861, %v441_v60   ;;  %v492_v3 = vadd.f32 %v2897_v48, %v491_v0  ;;  %844 = vmatpush.msra.mxu0 %v666_v42  ;;  %v591_v56 = vld [vmem:[%s3183_s27 + $0xc8] sm:$0xff]  ;;  %v592_v57 = vld [vmem:[%s3183_s27 + $0xd0] sm:$0xff]  ;;  %v593_v59 = vld [vmem:[%s3183_s27 + $0xd8] sm:$0xff] }
  0x66   : > { %v451_v63 = vsel %vm450_vm14, %v2895_v47, %v447_v61  ;;  %v642_v47 = vld [vmem:[%s3183_s27 + $0x260] sm:$0xff]  ;;  %870 = vmatpush.msra.mxu1 %v667_v43  ;;  %896 = vmatpush.msra.mxu2 %v668_v44  ;;  %v569_v0 = vld [vmem:[%s3183_s27 + $0x18] sm:$0xff]  ;;  %v572_v29 = vld [vmem:[%s3183_s27 + $0x30] sm:$0xff] }
  0x67   : > { %v456_v1 = vsel %vm453_vm15, %v455_v62, %v451_v63  ;;  %v496_v6 = vsel %vm495_vm2, %v2897_v48, %v492_v3  ;;  %v643_v48 = vld [vmem:[%s3183_s27 + $0x268] sm:$0xff]  ;;  %922 = vmatpush.msra.mxu3 %v669_v45  ;;  %845 = vmatpush.msra.mxu0 %v641_v46  ;;  %v594_v60 = vld [vmem:[%s3183_s27 + $0xe0] sm:$0xff]  ;;  %v568_v63 = vld [vmem:[%s3183_s27 + $0x10] sm:$0xff] }
  0x68   : > { %v501_v7 = vsel %vm498_vm3, %v500_v5, %v496_v6  ;;  %871 = vmatpush.msra.mxu1 %v642_v47  ;;  %897 = vmatpush.msra.mxu2 %v643_v48  ;;  %v566_v61 = vld [vmem:[%s3183_s27] sm:$0xff]  ;;  %v567_v62 = vld [vmem:[%s3183_s27 + $0x8] sm:$0xff]  ;;  %v573_v42 = vld [vmem:[%s3183_s27 + $0x38] sm:$0xff] }
  0x69   : > { %923 = vmatpush.msra.mxu3 %v644_v49  ;;  %846 = vmatpush.msra.mxu0 %v616_v50  ;;  %v646_v32 = vld [vmem:[%s3183_s27 + $0x280] sm:$0xff]  ;;  %v571_v41 = vld [vmem:[%s3183_s27 + $0x28] sm:$0xff]  ;;  %v776_v44 = vld [vmem:[%s3183_s27 + $0x690] sm:$0xff] }
  0x6a   : > { %872 = vmatpush.msra.mxu1 %v617_v53  ;;  %898 = vmatpush.msra.mxu2 %v618_v54  ;;  %v774_v45 = vld [vmem:[%s3183_s27 + $0x680] sm:$0xff]  ;;  %v775_v46 = vld [vmem:[%s3183_s27 + $0x688] sm:$0xff]  ;;  %v777_v47 = vld [vmem:[%s3183_s27 + $0x698] sm:$0xff] }
  0x6b   : > { %924 = vmatpush.msra.mxu3 %v619_v55  ;;  %847 = vmatpush.msra.mxu0 %v591_v56  ;;  %v751_v48 = vld [vmem:[%s3183_s27 + $0x5c8] sm:$0xff]  ;;  %v749_v49 = vld [vmem:[%s3183_s27 + $0x5b8] sm:$0xff]  ;;  %v750_v50 = vld [vmem:[%s3183_s27 + $0x5c0] sm:$0xff] }
  0x6c   : > { %873 = vmatpush.msra.mxu1 %v592_v57  ;;  %899 = vmatpush.msra.mxu2 %v593_v59  ;;  %v724_v53 = vld [vmem:[%s3183_s27 + $0x4f0] sm:$0xff]  ;;  %v725_v54 = vld [vmem:[%s3183_s27 + $0x4f8] sm:$0xff]  ;;  %v727_v55 = vld [vmem:[%s3183_s27 + $0x508] sm:$0xff] }
  0x6d   : > { %539 = vperm.xlu2 %2861, %v456_v1   ;;  %925 = vmatpush.msra.mxu3 %v594_v60  ;;  %v510_v1 = vld [vmem:[%s3324_s7 + $0x38] sm:$0xff]  ;;  %v700_v59 = vld [vmem:[%s3183_s27 + $0x430] sm:$0xff] }
  0x6e   : > { %848 = vmatpush.msra.mxu0 %v566_v61  ;;  %874 = vmatpush.msra.mxu1 %v567_v62  ;;  %v701_v57 = vld [vmem:[%s3183_s27 + $0x438] sm:$0xff]  ;;  %v702_v60 = vld [vmem:[%s3183_s27 + $0x440] sm:$0xff]  ;;  %v676_v61 = vld [vmem:[%s3183_s27 + $0x370] sm:$0xff] }
  0x6f   : > { %900 = vmatpush.msra.mxu2 %v568_v63  ;;  %926 = vmatpush.msra.mxu3 %v569_v0  ;;  %v674_v62 = vld [vmem:[%s3183_s27 + $0x360] sm:$0xff]  ;;  %v675_v63 = vld [vmem:[%s3183_s27 + $0x368] sm:$0xff]  ;;  %v677_v0 = vld [vmem:[%s3183_s27 + $0x378] sm:$0xff] }
  0x75   : > { %554 = vperm.xlu2 %2861, %v501_v7   ;;  %v772_v7 = vld [vmem:[%s3183_s27 + $0x670] sm:$0xff] }
  0x76   : > { %996 = vmatpush.msrb.mxu2 %v772_v7  ;;  %v624_v7 = vld [vmem:[%s3183_s27 + $0x1d0] sm:$0xff] }
  0xbf   : > { %v535_v21 = vpop.permute.xlu2 %534 }
  0xc0   : > { %v561_v22 = vmul.f32 %v535_v21, %v507_v20  ;;  %v723_v20 = vld [vmem:[%s3183_s27 + $0x4e8] sm:$0xff] }
  0xc1   : > { %v695_v21 = vld [vmem:[%s3183_s27 + $0x408] sm:$0xff] }
  0xc5   : > { %v525_v15 = vpop.permute.xlu1 %524 }
  0xc6   : > { %v515_v9 = vpop.permute.xlu0 %514  ;;  %v559_v16 = vmul.f32 %v525_v15, %v505_v14  ;;  %v745_v14 = vld [vmem:[%s3183_s27 + $0x598] sm:$0xff]  ;;  %v746_v15 = vld [vmem:[%s3183_s27 + $0x5a0] sm:$0xff] }
  0xc7   : > { %v557_v10 = vmul.f32 %v515_v9, %v503_v8  ;;  %v540_v39 = vpop.permute.xlu2 %539  ;;  %v747_v8 = vld [vmem:[%s3183_s27 + $0x5a8] sm:$0xff]  ;;  %v770_v9 = vld [vmem:[%s3183_s27 + $0x660] sm:$0xff] }
  0xc8   : > { %v562_v40 = vmul.f32 %v540_v39, %v508_v27  ;;  %944 = vmatpush.msrb.mxu0 %v770_v9  ;;  %997 = vmatpush.msrb.mxu2 %v747_v8  ;;  %v671_v27 = vld [vmem:[%s3183_s27 + $0x348] sm:$0xff]  ;;  %v598_v39 = vld [vmem:[%s3183_s27 + $0x100] sm:$0xff]  ;;  %v625_v8 = vld [vmem:[%s3183_s27 + $0x1d8] sm:$0xff] }
  0xc9   : > { %791 = vxpose.xlu0.b32.start [1/9] (short) (narrow) %v557_v10, 24  ;;  %v771_v10 = vld [vmem:[%s3183_s27 + $0x668] sm:$0xff] }
  0xca   : > { %970 = vmatpush.msrb.mxu1 %v771_v10  ;;  %945 = vmatpush.msrb.mxu0 %v745_v14  ;;  %v627_v9 = vld [vmem:[%s3183_s27 + $0x1e8] sm:$0xff]  ;;  %v601_v10 = vld [vmem:[%s3183_s27 + $0x118] sm:$0xff]  ;;  %v576_v14 = vld [vmem:[%s3183_s27 + $0x50] sm:$0xff] }
  0xcc   : > { %971 = vmatpush.msrb.mxu1 %v746_v15  ;;  %v574_v15 = vld [vmem:[%s3183_s27 + $0x40] sm:$0xff] }
  0xcd   : > { %v530_v18 = vpop.permute.xlu1 %529 }
  0xce   : > { %v520_v12 = vpop.permute.xlu0 %519  ;;  %v560_v19 = vmul.f32 %v530_v18, %v506_v17  ;;  %v720_v17 = vld [vmem:[%s3183_s27 + $0x4d0] sm:$0xff]  ;;  %v721_v18 = vld [vmem:[%s3183_s27 + $0x4d8] sm:$0xff] }
  0xcf   : > { %v558_v13 = vmul.f32 %v520_v12, %v504_v11  ;;  %v555_v5 = vpop.permute.xlu2 %554  ;;  %v773_v11 = vld [vmem:[%s3183_s27 + $0x678] sm:$0xff]  ;;  %v722_v12 = vld [vmem:[%s3183_s27 + $0x4e0] sm:$0xff]  ;;  %946 = vmatpush.msrb.mxu0 %v720_v17  ;;  %972 = vmatpush.msrb.mxu1 %v721_v18  ;;  %v780_v18 = vld [vmem:[%s3183_s27 + $0x6b0] sm:$0xff] }
  0xd0   : > { %v565_v6 = vmul.f32 %v555_v5, %v511_v4  ;;  %1022 = vmatpush.msrb.mxu3 %v773_v11  ;;  %998 = vmatpush.msrb.mxu2 %v722_v12  ;;  %v652_v4 = vld [vmem:[%s3183_s27 + $0x2b0] sm:$0xff]  ;;  %v599_v11 = vld [vmem:[%s3183_s27 + $0x108] sm:$0xff]  ;;  %v577_v17 = vld [vmem:[%s3183_s27 + $0x58] sm:$0xff] }
  0xd1   : > { %792 = vxpose.xlu0.b32.cont [2/9] (short) (narrow) %v558_v13, 24  ;;  %v697_v13 = vld [vmem:[%s3183_s27 + $0x418] sm:$0xff]  ;;  %947 = vmatpush.msrb.mxu0 %v695_v21  ;;  %v600_v12 = vld [vmem:[%s3183_s27 + $0x110] sm:$0xff] }
  0xd2   : > { %999 = vmatpush.msrb.mxu2 %v697_v13  ;;  %v602_v13 = vld [vmem:[%s3183_s27 + $0x120] sm:$0xff]  ;;  %v781_v21 = vld [vmem:[%s3183_s27 + $0x6b8] sm:$0xff] }
  0xd3   : > { %948 = vmatpush.msrb.mxu0 %v670_v26  ;;  %v756_v26 = vld [vmem:[%s3183_s27 + $0x5f0] sm:$0xff] }
  0xd5   : > { %v550_v2 = vpop.permute.xlu1 %549  ;;  %949 = vmatpush.msrb.mxu0 %v645_v31  ;;  %v731_v31 = vld [vmem:[%s3183_s27 + $0x528] sm:$0xff] }
  0xd6   : > { %v545_v52 = vpop.permute.xlu0 %544  ;;  %v564_v3 = vmul.f32 %v550_v2, %v510_v1  ;;  %v651_v1 = vld [vmem:[%s3183_s27 + $0x2a8] sm:$0xff]  ;;  %v649_v2 = vld [vmem:[%s3183_s27 + $0x298] sm:$0xff] }
  0xd7   : > { %v563_v58 = vmul.f32 %v545_v52, %v509_v51  ;;  %950 = vmatpush.msrb.mxu0 %v620_v24  ;;  %v752_v51 = vld [vmem:[%s3183_s27 + $0x5d0] sm:$0xff]  ;;  %v726_v52 = vld [vmem:[%s3183_s27 + $0x500] sm:$0xff] }
  0xd8   : > { %v704_v24 = vld [vmem:[%s3183_s27 + $0x450] sm:$0xff] }
  0xd9   : > { %793 = vxpose.xlu0.b32.cont [3/9] (short) (narrow) %v559_v16, 24  ;;  %v748_v16 = vld [vmem:[%s3183_s27 + $0x5b0] sm:$0xff]  ;;  %951 = vmatpush.msrb.mxu0 %v595_v37  ;;  %v679_v37 = vld [vmem:[%s3183_s27 + $0x388] sm:$0xff] }
  0xda   : > { %1023 = vmatpush.msrb.mxu3 %v748_v16  ;;  %v575_v16 = vld [vmem:[%s3183_s27 + $0x48] sm:$0xff] }
  0xdc   : > { %1024 = vmatpush.msrb.mxu3 %v723_v20  ;;  %v779_v20 = vld [vmem:[%s3183_s27 + $0x6a8] sm:$0xff] }
  0xde   : > { %1025 = vmatpush.msrb.mxu3 %v698_v23  ;;  %v753_v23 = vld [vmem:[%s3183_s27 + $0x5d8] sm:$0xff] }
  0xe0   : > { %1026 = vmatpush.msrb.mxu3 %v673_v28  ;;  %v728_v28 = vld [vmem:[%s3183_s27 + $0x510] sm:$0xff] }
  0xe1   : > { %794 = vxpose.xlu0.b32.cont [4/9] (short) (narrow) %v560_v19, 24  ;;  %v672_v19 = vld [vmem:[%s3183_s27 + $0x350] sm:$0xff] }
  0xe2   : > { %1000 = vmatpush.msrb.mxu2 %v672_v19  ;;  %1027 = vmatpush.msrb.mxu3 %v648_v33  ;;  %v778_v19 = vld [vmem:[%s3183_s27 + $0x6a0] sm:$0xff]  ;;  %v703_v33 = vld [vmem:[%s3183_s27 + $0x448] sm:$0xff] }
  0xe4   : > { %1001 = vmatpush.msrb.mxu2 %v647_v25  ;;  %1028 = vmatpush.msrb.mxu3 %v623_v36  ;;  %v754_v25 = vld [vmem:[%s3183_s27 + $0x5e0] sm:$0xff] }
  0xe5   : > { %v678_v36 = vld [vmem:[%s3183_s27 + $0x380] sm:$0xff] }
  0xe6   : > { %1002 = vmatpush.msrb.mxu2 %v622_v30  ;;  %1029 = vmatpush.msrb.mxu3 %v598_v39  ;;  %v729_v30 = vld [vmem:[%s3183_s27 + $0x518] sm:$0xff]  ;;  %v655_v39 = vld [vmem:[%s3183_s27 + $0x2c8] sm:$0xff] }
  0xe8   : > { %1003 = vmatpush.msrb.mxu2 %v597_v35  ;;  %1030 = vmatpush.msrb.mxu3 %v573_v42  ;;  %v680_v35 = vld [vmem:[%s3183_s27 + $0x390] sm:$0xff]  ;;  %v630_v42 = vld [vmem:[%s3183_s27 + $0x200] sm:$0xff] }
  0xe9   : > { %795 = vxpose.xlu0.b32.cont [5/9] (short) (narrow) %v561_v22, 24  ;;  %v696_v22 = vld [vmem:[%s3183_s27 + $0x410] sm:$0xff] }
  0xea   : > { %973 = vmatpush.msrb.mxu1 %v696_v22  ;;  %1004 = vmatpush.msrb.mxu2 %v572_v29  ;;  %v755_v22 = vld [vmem:[%s3183_s27 + $0x5e8] sm:$0xff]  ;;  %v653_v29 = vld [vmem:[%s3183_s27 + $0x2b8] sm:$0xff] }
  0xec   : > { %974 = vmatpush.msrb.mxu1 %v671_v27  ;;  %v730_v27 = vld [vmem:[%s3183_s27 + $0x520] sm:$0xff] }
  0xee   : > { %975 = vmatpush.msrb.mxu1 %v646_v32  ;;  %v705_v32 = vld [vmem:[%s3183_s27 + $0x458] sm:$0xff] }
  0xf0   : > { %976 = vmatpush.msrb.mxu1 %v621_v34  ;;  %v706_v34 = vld [vmem:[%s3183_s27 + $0x460] sm:$0xff] }
  0xf1   : > { %796 = vxpose.xlu0.b32.cont [6/9] (short) (narrow) %v562_v40, 24  ;;  %v570_v40 = vld [vmem:[%s3183_s27 + $0x20] sm:$0xff] }
  0xf2   : > { %977 = vmatpush.msrb.mxu1 %v596_v38  ;;  %952 = vmatpush.msrb.mxu0 %v570_v40  ;;  %v681_v38 = vld [vmem:[%s3183_s27 + $0x398] sm:$0xff]  ;;  %v654_v40 = vld [vmem:[%s3183_s27 + $0x2c0] sm:$0xff] }
  0xf4   : > { %978 = vmatpush.msrb.mxu1 %v571_v41  ;;  %v656_v41 = vld [vmem:[%s3183_s27 + $0x2d0] sm:$0xff] }
  0xf9   : > { %797 = vxpose.xlu0.b32.cont [7/9] (short) (narrow) %v563_v58, 24  ;;  %v699_v58 = vld [vmem:[%s3183_s27 + $0x428] sm:$0xff] }
 0x101   : > { %798 = vxpose.xlu0.b32.cont [8/9] (short) (narrow) %v564_v3, 24  ;;  %v650_v3 = vld [vmem:[%s3183_s27 + $0x2a0] sm:$0xff] }
 0x109   : > { %799 = vxpose.xlu0.b32.end [9/9] (short) (narrow) %v565_v6, 24  ;;  %v626_v6 = vld [vmem:[%s3183_s27 + $0x1e0] sm:$0xff] }
 0x16d   : > { %v3407_v43 = vpop.trf.xlu0 }
 0x16e   : > { %2691 = vmatmul.msk.f32.vlgmr.msra.gmra.mxu0 %vm823_vm4, %v3407_v43  ;;  %2694 = vmatmul.msk.f32.vlgmr.msra.gmra.mxu1 %vm823_vm4, %v3407_v43 }
 0x16f   : > { %2697 = vmatmul.msk.f32.vlgmr.msra.gmra.mxu2 %vm823_vm4, %v3407_v43  ;;  %2700 = vmatmul.msk.f32.vlgmr.msra.gmra.mxu3 %vm823_vm4, %v3407_v43 }
 0x170   : > { %1100 = vmatpush.msra.mxu2 %v776_v44  ;;  %1048 = vmatpush.msra.mxu0 %v774_v45  ;;  %v628_v44 = vld [vmem:[%s3183_s27 + $0x1f0] sm:$0xff]  ;;  %v629_v45 = vld [vmem:[%s3183_s27 + $0x1f8] sm:$0xff] }
 0x171   : > { %1074 = vmatpush.msra.mxu1 %v775_v46  ;;  %1126 = vmatpush.msra.mxu3 %v777_v47  ;;  %v631_v46 = vld [vmem:[%s3183_s27 + $0x208] sm:$0xff]  ;;  %v605_v47 = vld [vmem:[%s3183_s27 + $0x138] sm:$0xff] }
 0x172   : > { %1101 = vmatpush.msra.mxu2 %v751_v48  ;;  %1049 = vmatpush.msra.mxu0 %v749_v49  ;;  %v603_v48 = vld [vmem:[%s3183_s27 + $0x128] sm:$0xff]  ;;  %v604_v49 = vld [vmem:[%s3183_s27 + $0x130] sm:$0xff] }
 0x173   : > { %1075 = vmatpush.msra.mxu1 %v750_v50  ;;  %1127 = vmatpush.msra.mxu3 %v752_v51  ;;  %v606_v50 = vld [vmem:[%s3183_s27 + $0x140] sm:$0xff]  ;;  %v580_v51 = vld [vmem:[%s3183_s27 + $0x70] sm:$0xff] }
 0x174   : > { %1102 = vmatpush.msra.mxu2 %v726_v52  ;;  %1050 = vmatpush.msra.mxu0 %v724_v53  ;;  %v578_v52 = vld [vmem:[%s3183_s27 + $0x60] sm:$0xff]  ;;  %v579_v53 = vld [vmem:[%s3183_s27 + $0x68] sm:$0xff] }
 0x175   : > { %v3429_v56 = vpop.trf.xlu0  ;;  %1076 = vmatpush.msra.mxu1 %v725_v54  ;;  %1128 = vmatpush.msra.mxu3 %v727_v55  ;;  %v581_v54 = vld [vmem:[%s3183_s27 + $0x78] sm:$0xff]  ;;  %v784_v55 = vld [vmem:[%s3183_s27 + $0x6d0] sm:$0xff] }
 0x176   : > { %2692 = vmatmul.msk.f32.gmra.mxu0 %vm823_vm4, %v3429_v56  ;;  %2695 = vmatmul.msk.f32.gmra.mxu1 %vm823_vm4, %v3429_v56 }
 0x177   : > { %2698 = vmatmul.msk.f32.gmra.mxu2 %vm823_vm4, %v3429_v56  ;;  %2701 = vmatmul.msk.f32.gmra.mxu3 %vm823_vm4, %v3429_v56 }
 0x178   : > { %1103 = vmatpush.msra.mxu2 %v701_v57  ;;  %1051 = vmatpush.msra.mxu0 %v699_v58  ;;  %v782_v57 = vld [vmem:[%s3183_s27 + $0x6c0] sm:$0xff]  ;;  %v783_v58 = vld [vmem:[%s3183_s27 + $0x6c8] sm:$0xff] }
 0x179   : > { %1077 = vmatpush.msra.mxu1 %v700_v59  ;;  %1129 = vmatpush.msra.mxu3 %v702_v60  ;;  %v785_v59 = vld [vmem:[%s3183_s27 + $0x6d8] sm:$0xff]  ;;  %v759_v60 = vld [vmem:[%s3183_s27 + $0x608] sm:$0xff] }
 0x17a   : > { %1104 = vmatpush.msra.mxu2 %v676_v61  ;;  %1052 = vmatpush.msra.mxu0 %v674_v62  ;;  %v757_v61 = vld [vmem:[%s3183_s27 + $0x5f8] sm:$0xff]  ;;  %v758_v62 = vld [vmem:[%s3183_s27 + $0x600] sm:$0xff] }
 0x17b   : > { %1078 = vmatpush.msra.mxu1 %v675_v63  ;;  %1130 = vmatpush.msra.mxu3 %v677_v0  ;;  %v760_v63 = vld [vmem:[%s3183_s27 + $0x610] sm:$0xff]  ;;  %v734_v0 = vld [vmem:[%s3183_s27 + $0x540] sm:$0xff] }
 0x17c   : > { %1105 = vmatpush.msra.mxu2 %v651_v1  ;;  %1053 = vmatpush.msra.mxu0 %v649_v2  ;;  %v732_v1 = vld [vmem:[%s3183_s27 + $0x530] sm:$0xff]  ;;  %v733_v2 = vld [vmem:[%s3183_s27 + $0x538] sm:$0xff] }
 0x17d   : > { %v3451_v5 = vpop.trf.xlu0  ;;  %1079 = vmatpush.msra.mxu1 %v650_v3  ;;  %1131 = vmatpush.msra.mxu3 %v652_v4  ;;  %v735_v3 = vld [vmem:[%s3183_s27 + $0x548] sm:$0xff]  ;;  %v709_v4 = vld [vmem:[%s3183_s27 + $0x478] sm:$0xff] }
 0x17e   : > { %2693 = vmatmul.msk.f32.gmra.mxu0 %vm823_vm4, %v3451_v5  ;;  %2696 = vmatmul.msk.f32.gmra.mxu1 %vm823_vm4, %v3451_v5 }
 0x17f   : > { %2699 = vmatmul.msk.f32.gmra.mxu2 %vm823_vm4, %v3451_v5  ;;  %2702 = vmatmul.msk.f32.gmra.mxu3 %vm823_vm4, %v3451_v5 }
 0x180   : > { %1106 = vmatpush.msra.mxu2 %v626_v6  ;;  %1054 = vmatpush.msra.mxu0 %v624_v7  ;;  %v707_v6 = vld [vmem:[%s3183_s27 + $0x468] sm:$0xff]  ;;  %v708_v7 = vld [vmem:[%s3183_s27 + $0x470] sm:$0xff] }
 0x181   : > { %1080 = vmatpush.msra.mxu1 %v625_v8  ;;  %1132 = vmatpush.msra.mxu3 %v627_v9  ;;  %v710_v8 = vld [vmem:[%s3183_s27 + $0x480] sm:$0xff]  ;;  %v684_v9 = vld [vmem:[%s3183_s27 + $0x3b0] sm:$0xff] }
 0x182   : > { %1107 = vmatpush.msra.mxu2 %v601_v10  ;;  %1055 = vmatpush.msra.mxu0 %v599_v11  ;;  %v682_v10 = vld [vmem:[%s3183_s27 + $0x3a0] sm:$0xff]  ;;  %v683_v11 = vld [vmem:[%s3183_s27 + $0x3a8] sm:$0xff] }
 0x183   : > { %1081 = vmatpush.msra.mxu1 %v600_v12  ;;  %1133 = vmatpush.msra.mxu3 %v602_v13  ;;  %v685_v12 = vld [vmem:[%s3183_s27 + $0x3b8] sm:$0xff]  ;;  %v659_v13 = vld [vmem:[%s3183_s27 + $0x2e8] sm:$0xff] }
 0x184   : > { %1108 = vmatpush.msra.mxu2 %v576_v14  ;;  %1056 = vmatpush.msra.mxu0 %v574_v15  ;;  %v657_v14 = vld [vmem:[%s3183_s27 + $0x2d8] sm:$0xff]  ;;  %v658_v15 = vld [vmem:[%s3183_s27 + $0x2e0] sm:$0xff] }
 0x185   : > { %1082 = vmatpush.msra.mxu1 %v575_v16  ;;  %1134 = vmatpush.msra.mxu3 %v577_v17  ;;  %v660_v16 = vld [vmem:[%s3183_s27 + $0x2f0] sm:$0xff]  ;;  %v634_v17 = vld [vmem:[%s3183_s27 + $0x220] sm:$0xff] }
 0x186   : > { %2703 = vmatmul.msk.f32.vlgmr.msrb.gmra.mxu0 %vm823_vm4, %v3407_v43  ;;  %2706 = vmatmul.msk.f32.vlgmr.msrb.gmra.mxu1 %vm823_vm4, %v3407_v43 }
 0x187   : > { %2709 = vmatmul.msk.f32.vlgmr.msrb.gmra.mxu2 %vm823_vm4, %v3407_v43  ;;  %2712 = vmatmul.msk.f32.vlgmr.msrb.gmra.mxu3 %vm823_vm4, %v3407_v43 }
 0x188   : > { %1204 = vmatpush.msrb.mxu2 %v780_v18  ;;  %1152 = vmatpush.msrb.mxu0 %v778_v19  ;;  %v632_v18 = vld [vmem:[%s3183_s27 + $0x210] sm:$0xff]  ;;  %v633_v19 = vld [vmem:[%s3183_s27 + $0x218] sm:$0xff] }
 0x189   : > { %1178 = vmatpush.msrb.mxu1 %v779_v20  ;;  %1230 = vmatpush.msrb.mxu3 %v781_v21  ;;  %v635_v20 = vld [vmem:[%s3183_s27 + $0x228] sm:$0xff]  ;;  %v609_v21 = vld [vmem:[%s3183_s27 + $0x158] sm:$0xff] }
 0x18a   : > { %1205 = vmatpush.msrb.mxu2 %v755_v22  ;;  %1153 = vmatpush.msrb.mxu0 %v753_v23  ;;  %v607_v22 = vld [vmem:[%s3183_s27 + $0x148] sm:$0xff]  ;;  %v608_v23 = vld [vmem:[%s3183_s27 + $0x150] sm:$0xff] }
 0x18b   : > { %1179 = vmatpush.msrb.mxu1 %v754_v25  ;;  %1231 = vmatpush.msrb.mxu3 %v756_v26  ;;  %v610_v25 = vld [vmem:[%s3183_s27 + $0x160] sm:$0xff]  ;;  %v584_v26 = vld [vmem:[%s3183_s27 + $0x90] sm:$0xff] }
 0x18c   : > { %1206 = vmatpush.msrb.mxu2 %v730_v27  ;;  %1154 = vmatpush.msrb.mxu0 %v728_v28  ;;  %v582_v27 = vld [vmem:[%s3183_s27 + $0x80] sm:$0xff]  ;;  %v583_v28 = vld [vmem:[%s3183_s27 + $0x88] sm:$0xff] }
 0x18d   : > { %1180 = vmatpush.msrb.mxu1 %v729_v30  ;;  %1232 = vmatpush.msrb.mxu3 %v731_v31  ;;  %v585_v30 = vld [vmem:[%s3183_s27 + $0x98] sm:$0xff]  ;;  %v788_v31 = vld [vmem:[%s3183_s27 + $0x6f0] sm:$0xff] }
 0x18e   : > { %2704 = vmatmul.msk.f32.gmra.mxu0 %vm823_vm4, %v3429_v56  ;;  %2707 = vmatmul.msk.f32.gmra.mxu1 %vm823_vm4, %v3429_v56 }
 0x18f   : > { %2710 = vmatmul.msk.f32.gmra.mxu2 %vm823_vm4, %v3429_v56  ;;  %2713 = vmatmul.msk.f32.gmra.mxu3 %vm823_vm4, %v3429_v56 }
 0x190   : > { %1207 = vmatpush.msrb.mxu2 %v705_v32  ;;  %1155 = vmatpush.msrb.mxu0 %v703_v33  ;;  %v786_v32 = vld [vmem:[%s3183_s27 + $0x6e0] sm:$0xff]  ;;  %v787_v33 = vld [vmem:[%s3183_s27 + $0x6e8] sm:$0xff] }
 0x191   : > { %1181 = vmatpush.msrb.mxu1 %v704_v24  ;;  %1233 = vmatpush.msrb.mxu3 %v706_v34  ;;  %v789_v24 = vld [vmem:[%s3183_s27 + $0x6f8] sm:$0xff]  ;;  %v763_v34 = vld [vmem:[%s3183_s27 + $0x628] sm:$0xff] }
 0x192   : > { %1208 = vmatpush.msrb.mxu2 %v680_v35  ;;  %1156 = vmatpush.msrb.mxu0 %v678_v36  ;;  %v761_v35 = vld [vmem:[%s3183_s27 + $0x618] sm:$0xff]  ;;  %v762_v36 = vld [vmem:[%s3183_s27 + $0x620] sm:$0xff] }
 0x193   : > { %1182 = vmatpush.msrb.mxu1 %v679_v37  ;;  %1234 = vmatpush.msrb.mxu3 %v681_v38  ;;  %v764_v37 = vld [vmem:[%s3183_s27 + $0x630] sm:$0xff]  ;;  %v738_v38 = vld [vmem:[%s3183_s27 + $0x560] sm:$0xff] }
 0x194   : > { %1209 = vmatpush.msrb.mxu2 %v655_v39  ;;  %1157 = vmatpush.msrb.mxu0 %v653_v29  ;;  %v736_v39 = vld [vmem:[%s3183_s27 + $0x550] sm:$0xff]  ;;  %v737_v29 = vld [vmem:[%s3183_s27 + $0x558] sm:$0xff] }
 0x195   : > { %1183 = vmatpush.msrb.mxu1 %v654_v40  ;;  %1235 = vmatpush.msrb.mxu3 %v656_v41  ;;  %v739_v40 = vld [vmem:[%s3183_s27 + $0x568] sm:$0xff]  ;;  %v713_v41 = vld [vmem:[%s3183_s27 + $0x498] sm:$0xff] }
 0x196   : > { %2705 = vmatmul.msk.f32.gmra.mxu0 %vm823_vm4, %v3451_v5  ;;  %2708 = vmatmul.msk.f32.gmra.mxu1 %vm823_vm4, %v3451_v5 }
 0x197   : > { %2711 = vmatmul.msk.f32.gmra.mxu2 %vm823_vm4, %v3451_v5  ;;  %2714 = vmatmul.msk.f32.gmra.mxu3 %vm823_vm4, %v3451_v5 }
 0x198   : > { %1210 = vmatpush.msrb.mxu2 %v630_v42  ;;  %1158 = vmatpush.msrb.mxu0 %v628_v44  ;;  %v711_v42 = vld [vmem:[%s3183_s27 + $0x488] sm:$0xff]  ;;  %v712_v44 = vld [vmem:[%s3183_s27 + $0x490] sm:$0xff] }
 0x199   : > { %1184 = vmatpush.msrb.mxu1 %v629_v45  ;;  %1236 = vmatpush.msrb.mxu3 %v631_v46  ;;  %v714_v45 = vld [vmem:[%s3183_s27 + $0x4a0] sm:$0xff]  ;;  %v688_v46 = vld [vmem:[%s3183_s27 + $0x3d0] sm:$0xff] }
 0x19a   : > { %1211 = vmatpush.msrb.mxu2 %v605_v47  ;;  %1159 = vmatpush.msrb.mxu0 %v603_v48  ;;  %v686_v47 = vld [vmem:[%s3183_s27 + $0x3c0] sm:$0xff]  ;;  %v687_v48 = vld [vmem:[%s3183_s27 + $0x3c8] sm:$0xff] }
 0x19b   : > { %1185 = vmatpush.msrb.mxu1 %v604_v49  ;;  %1237 = vmatpush.msrb.mxu3 %v606_v50  ;;  %v689_v49 = vld [vmem:[%s3183_s27 + $0x3d8] sm:$0xff]  ;;  %v663_v50 = vld [vmem:[%s3183_s27 + $0x308] sm:$0xff] }
 0x19c   : > { %1212 = vmatpush.msrb.mxu2 %v580_v51  ;;  %1160 = vmatpush.msrb.mxu0 %v578_v52  ;;  %v661_v51 = vld [vmem:[%s3183_s27 + $0x2f8] sm:$0xff]  ;;  %v662_v52 = vld [vmem:[%s3183_s27 + $0x300] sm:$0xff] }
 0x19d   : > { %1186 = vmatpush.msrb.mxu1 %v579_v53  ;;  %1238 = vmatpush.msrb.mxu3 %v581_v54  ;;  %v664_v53 = vld [vmem:[%s3183_s27 + $0x310] sm:$0xff]  ;;  %v638_v54 = vld [vmem:[%s3183_s27 + $0x240] sm:$0xff] }
 0x19e   : > { %2715 = vmatmul.msk.f32.vlgmr.msra.gmra.mxu0 %vm823_vm4, %v3407_v43  ;;  %2718 = vmatmul.msk.f32.vlgmr.msra.gmra.mxu1 %vm823_vm4, %v3407_v43 }
 0x19f   : > { %2721 = vmatmul.msk.f32.vlgmr.msra.gmra.mxu2 %vm823_vm4, %v3407_v43  ;;  %2724 = vmatmul.msk.f32.vlgmr.msra.gmra.mxu3 %vm823_vm4, %v3407_v43 }
 0x1a0   : > { %1308 = vmatpush.msra.mxu2 %v784_v55  ;;  %1256 = vmatpush.msra.mxu0 %v782_v57  ;;  %v636_v55 = vld [vmem:[%s3183_s27 + $0x230] sm:$0xff]  ;;  %v637_v57 = vld [vmem:[%s3183_s27 + $0x238] sm:$0xff] }
 0x1a1   : > { %1282 = vmatpush.msra.mxu1 %v783_v58  ;;  %1334 = vmatpush.msra.mxu3 %v785_v59  ;;  %v639_v58 = vld [vmem:[%s3183_s27 + $0x248] sm:$0xff]  ;;  %v613_v59 = vld [vmem:[%s3183_s27 + $0x178] sm:$0xff] }
 0x1a2   : > { %1309 = vmatpush.msra.mxu2 %v759_v60  ;;  %1257 = vmatpush.msra.mxu0 %v757_v61  ;;  %v611_v60 = vld [vmem:[%s3183_s27 + $0x168] sm:$0xff]  ;;  %v612_v61 = vld [vmem:[%s3183_s27 + $0x170] sm:$0xff] }
 0x1a3   : > { %1283 = vmatpush.msra.mxu1 %v758_v62  ;;  %1335 = vmatpush.msra.mxu3 %v760_v63  ;;  %v614_v62 = vld [vmem:[%s3183_s27 + $0x180] sm:$0xff]  ;;  %v588_v63 = vld [vmem:[%s3183_s27 + $0xb0] sm:$0xff] }
 0x1a4   : > { %1310 = vmatpush.msra.mxu2 %v734_v0  ;;  %1258 = vmatpush.msra.mxu0 %v732_v1  ;;  %v586_v0 = vld [vmem:[%s3183_s27 + $0xa0] sm:$0xff]  ;;  %v587_v1 = vld [vmem:[%s3183_s27 + $0xa8] sm:$0xff] }
 0x1a5   : > { %1284 = vmatpush.msra.mxu1 %v733_v2  ;;  %1336 = vmatpush.msra.mxu3 %v735_v3  ;;  %v589_v2 = vld [vmem:[%s3183_s27 + $0xb8] sm:$0xff]  ;;  %v790_v3 = vld [vmem:[%s3183_s27 + $0x700] sm:$0xff] }
 0x1a6   : > { %2716 = vmatmul.msk.f32.gmra.mxu0 %vm823_vm4, %v3429_v56  ;;  %2719 = vmatmul.msk.f32.gmra.mxu1 %vm823_vm4, %v3429_v56 }
 0x1a7   : > { %2722 = vmatmul.msk.f32.gmra.mxu2 %vm823_vm4, %v3429_v56  ;;  %2725 = vmatmul.msk.f32.gmra.mxu3 %vm823_vm4, %v3429_v56 }
 0x1a8   : > { %1311 = vmatpush.msra.mxu2 %v709_v4  ;;  %1259 = vmatpush.msra.mxu0 %v707_v6  ;;  %v765_v4 = vld [vmem:[%s3183_s27 + $0x638] sm:$0xff]  ;;  %v740_v6 = vld [vmem:[%s3183_s27 + $0x570] sm:$0xff] }
 0x1a9   : > { %1285 = vmatpush.msra.mxu1 %v708_v7  ;;  %1337 = vmatpush.msra.mxu3 %v710_v8  ;;  %v715_v7 = vld [vmem:[%s3183_s27 + $0x4a8] sm:$0xff]  ;;  %v690_v8 = vld [vmem:[%s3183_s27 + $0x3e0] sm:$0xff] }
 0x1aa   : > { %1312 = vmatpush.msra.mxu2 %v684_v9  ;;  %1260 = vmatpush.msra.mxu0 %v682_v10  ;;  %v665_v9 = vld [vmem:[%s3183_s27 + $0x318] sm:$0xff]  ;;  %v640_v10 = vld [vmem:[%s3183_s27 + $0x250] sm:$0xff] }
 0x1ab   : > { %1286 = vmatpush.msra.mxu1 %v683_v11  ;;  %1338 = vmatpush.msra.mxu3 %v685_v12  ;;  %v615_v11 = vld [vmem:[%s3183_s27 + $0x188] sm:$0xff]  ;;  %v590_v12 = vld [vmem:[%s3183_s27 + $0xc0] sm:$0xff] }
 0x1ac   : > { %1313 = vmatpush.msra.mxu2 %v659_v13  ;;  %1261 = vmatpush.msra.mxu0 %v657_v14 }
 0x1ad   : > { %1287 = vmatpush.msra.mxu1 %v658_v15  ;;  %1339 = vmatpush.msra.mxu3 %v660_v16 }
 0x1ae   : > { %2717 = vmatmul.msk.f32.gmra.mxu0 %vm823_vm4, %v3451_v5  ;;  %2720 = vmatmul.msk.f32.gmra.mxu1 %vm823_vm4, %v3451_v5 }
 0x1af   : > { %2723 = vmatmul.msk.f32.gmra.mxu2 %vm823_vm4, %v3451_v5  ;;  %2726 = vmatmul.msk.f32.gmra.mxu3 %vm823_vm4, %v3451_v5 }
 0x1b0   : > { %1314 = vmatpush.msra.mxu2 %v634_v17  ;;  %1262 = vmatpush.msra.mxu0 %v632_v18 }
 0x1b1   : > { %1288 = vmatpush.msra.mxu1 %v633_v19  ;;  %1340 = vmatpush.msra.mxu3 %v635_v20 }
 0x1b2   : > { %1315 = vmatpush.msra.mxu2 %v609_v21  ;;  %1263 = vmatpush.msra.mxu0 %v607_v22 }
 0x1b3   : > { %1289 = vmatpush.msra.mxu1 %v608_v23  ;;  %1341 = vmatpush.msra.mxu3 %v610_v25 }
 0x1b4   : > { %1316 = vmatpush.msra.mxu2 %v584_v26  ;;  %1264 = vmatpush.msra.mxu0 %v582_v27 }
 0x1b5   : > { %1290 = vmatpush.msra.mxu1 %v583_v28  ;;  %1342 = vmatpush.msra.mxu3 %v585_v30 }
 0x1b6   : > { %2727 = vmatmul.msk.f32.vlgmr.msrb.gmra.mxu0 %vm823_vm4, %v3407_v43  ;;  %2730 = vmatmul.msk.f32.vlgmr.msrb.gmra.mxu1 %vm823_vm4, %v3407_v43 }
 0x1b7   : > { %2733 = vmatmul.msk.f32.vlgmr.msrb.gmra.mxu2 %vm823_vm4, %v3407_v43  ;;  %2736 = vmatmul.msk.f32.vlgmr.msrb.gmra.mxu3 %vm823_vm4, %v3407_v43 }
 0x1b8   : > { %1412 = vmatpush.msrb.mxu2 %v788_v31  ;;  %1360 = vmatpush.msrb.mxu0 %v786_v32 }
 0x1b9   : > { %1386 = vmatpush.msrb.mxu1 %v787_v33  ;;  %1438 = vmatpush.msrb.mxu3 %v789_v24 }
 0x1ba   : > { %1413 = vmatpush.msrb.mxu2 %v763_v34  ;;  %1361 = vmatpush.msrb.mxu0 %v761_v35 }
 0x1bb   : > { %1387 = vmatpush.msrb.mxu1 %v762_v36  ;;  %1439 = vmatpush.msrb.mxu3 %v764_v37 }
 0x1bc   : > { %1414 = vmatpush.msrb.mxu2 %v738_v38  ;;  %1362 = vmatpush.msrb.mxu0 %v736_v39 }
 0x1bd   : > { %1388 = vmatpush.msrb.mxu1 %v737_v29  ;;  %1440 = vmatpush.msrb.mxu3 %v739_v40 }
 0x1be   : > { %2728 = vmatmul.msk.f32.gmra.mxu0 %vm823_vm4, %v3429_v56  ;;  %2731 = vmatmul.msk.f32.gmra.mxu1 %vm823_vm4, %v3429_v56 }
 0x1bf   : > { %2734 = vmatmul.msk.f32.gmra.mxu2 %vm823_vm4, %v3429_v56  ;;  %2737 = vmatmul.msk.f32.gmra.mxu3 %vm823_vm4, %v3429_v56 }
 0x1c0   : > { %1415 = vmatpush.msrb.mxu2 %v713_v41  ;;  %1363 = vmatpush.msrb.mxu0 %v711_v42 }
 0x1c1   : > { %1389 = vmatpush.msrb.mxu1 %v712_v44  ;;  %1441 = vmatpush.msrb.mxu3 %v714_v45 }
 0x1c2   : > { %1416 = vmatpush.msrb.mxu2 %v688_v46  ;;  %1364 = vmatpush.msrb.mxu0 %v686_v47 }
 0x1c3   : > { %1390 = vmatpush.msrb.mxu1 %v687_v48  ;;  %1442 = vmatpush.msrb.mxu3 %v689_v49 }
 0x1c4   : > { %1417 = vmatpush.msrb.mxu2 %v663_v50  ;;  %1365 = vmatpush.msrb.mxu0 %v661_v51 }
 0x1c5   : > { %1391 = vmatpush.msrb.mxu1 %v662_v52  ;;  %1443 = vmatpush.msrb.mxu3 %v664_v53 }
 0x1c6   : > { %2729 = vmatmul.msk.f32.gmra.mxu0 %vm823_vm4, %v3451_v5  ;;  %2732 = vmatmul.msk.f32.gmra.mxu1 %vm823_vm4, %v3451_v5 }
 0x1c7   : > { %2735 = vmatmul.msk.f32.gmra.mxu2 %vm823_vm4, %v3451_v5  ;;  %2738 = vmatmul.msk.f32.gmra.mxu3 %vm823_vm4, %v3451_v5 }
 0x1c8   : > { %1418 = vmatpush.msrb.mxu2 %v638_v54  ;;  %1366 = vmatpush.msrb.mxu0 %v636_v55 }
 0x1c9   : > { %1392 = vmatpush.msrb.mxu1 %v637_v57  ;;  %1444 = vmatpush.msrb.mxu3 %v639_v58 }
 0x1ca   : > { %1419 = vmatpush.msrb.mxu2 %v613_v59  ;;  %1367 = vmatpush.msrb.mxu0 %v611_v60 }
 0x1cb   : > { %1393 = vmatpush.msrb.mxu1 %v612_v61  ;;  %1445 = vmatpush.msrb.mxu3 %v614_v62 }
 0x1cc   : > { %1420 = vmatpush.msrb.mxu2 %v588_v63  ;;  %1368 = vmatpush.msrb.mxu0 %v586_v0 }
 0x1cd   : > { %1394 = vmatpush.msrb.mxu1 %v587_v1  ;;  %1446 = vmatpush.msrb.mxu3 %v589_v2 }
 0x1ce   : > { %2739 = vmatmul.msk.f32.vlgmr.msra.gmra.mxu0 %vm823_vm4, %v3407_v43  ;;  %2742 = vmatmul.msk.f32.vlgmr.msra.gmra.mxu1 %vm823_vm4, %v3407_v43 }
 0x1cf   : > { %2745 = vmatmul.msk.f32.vlgmr.msra.gmra.mxu2 %vm823_vm4, %v3407_v43  ;;  %2748 = vmatmul.msk.f32.vlgmr.msra.gmra.mxu3 %vm823_vm4, %v3407_v43 }
 0x1d0   : > { %2774 = vmatpush.msra.mxu2 %v790_v3  ;;  %1464 = vmatpush.msra.mxu0 %v790_v3 }
 0x1d1   : > { %2773 = vmatpush.msra.mxu1 %v790_v3 }
 0x1d2   : > { %2776 = vmatpush.msra.mxu2 %v765_v4  ;;  %1465 = vmatpush.msra.mxu0 %v765_v4 }
 0x1d3   : > { %2775 = vmatpush.msra.mxu1 %v765_v4 }
 0x1d4   : > { %2778 = vmatpush.msra.mxu2 %v740_v6  ;;  %1466 = vmatpush.msra.mxu0 %v740_v6 }
 0x1d5   : > { %2777 = vmatpush.msra.mxu1 %v740_v6 }
 0x1d6   : > { %2740 = vmatmul.msk.f32.gmra.mxu0 %vm823_vm4, %v3429_v56  ;;  %2743 = vmatmul.msk.f32.gmra.mxu1 %vm823_vm4, %v3429_v56 }
 0x1d7   : > { %2746 = vmatmul.msk.f32.gmra.mxu2 %vm823_vm4, %v3429_v56  ;;  %2749 = vmatmul.msk.f32.gmra.mxu3 %vm823_vm4, %v3429_v56 }
 0x1d8   : > { %2780 = vmatpush.msra.mxu2 %v715_v7  ;;  %1467 = vmatpush.msra.mxu0 %v715_v7 }
 0x1d9   : > { %2779 = vmatpush.msra.mxu1 %v715_v7 }
 0x1da   : > { %2782 = vmatpush.msra.mxu2 %v690_v8  ;;  %1468 = vmatpush.msra.mxu0 %v690_v8 }
 0x1db   : > { %2781 = vmatpush.msra.mxu1 %v690_v8 }
 0x1dc   : > { %2784 = vmatpush.msra.mxu2 %v665_v9  ;;  %1469 = vmatpush.msra.mxu0 %v665_v9 }
 0x1dd   : > { %2783 = vmatpush.msra.mxu1 %v665_v9 }
 0x1de   : > { %2741 = vmatmul.msk.f32.gmra.mxu0 %vm823_vm4, %v3451_v5  ;;  %2744 = vmatmul.msk.f32.gmra.mxu1 %vm823_vm4, %v3451_v5 }
 0x1df   : > { %2747 = vmatmul.msk.f32.gmra.mxu2 %vm823_vm4, %v3451_v5  ;;  %2750 = vmatmul.msk.f32.gmra.mxu3 %vm823_vm4, %v3451_v5 }
 0x1e0   : > { %2786 = vmatpush.msra.mxu2 %v640_v10  ;;  %1470 = vmatpush.msra.mxu0 %v640_v10 }
 0x1e1   : > { %2785 = vmatpush.msra.mxu1 %v640_v10 }
 0x1e2   : > { %2788 = vmatpush.msra.mxu2 %v615_v11  ;;  %1471 = vmatpush.msra.mxu0 %v615_v11 }
 0x1e3   : > { %2787 = vmatpush.msra.mxu1 %v615_v11 }
 0x1e4   : > { %2790 = vmatpush.msra.mxu2 %v590_v12  ;;  %1472 = vmatpush.msra.mxu0 %v590_v12 }
 0x1e5   : > { %2789 = vmatpush.msra.mxu1 %v590_v12 }
 0x1e6   : > { %2751 = vmatmul.msk.f32.vlgmr.msrb.gmra.mxu0 %vm823_vm4, %v3407_v43  ;;  %2754 = vmatmul.msk.f32.vlgmr.msrb.gmra.mxu1 %vm823_vm4, %v3407_v43 }
 0x1e7   : > { %2757 = vmatmul.msk.f32.vlgmr.msrb.gmra.mxu2 %vm823_vm4, %v3407_v43  ;;  %2760 = vmatmul.msk.f32.vlgmr.msrb.gmra.mxu3 %vm823_vm4, %v3407_v43 }
 0x1eb   : > { %v3694_v13 = vpop.f32.mrf.mxu0  ;;  %v3696_v14 = vpop.f32.mrf.mxu1 }
 0x1ee   : > { %2752 = vmatmul.msk.f32.gmra.mxu0 %vm823_vm4, %v3429_v56  ;;  %2755 = vmatmul.msk.f32.gmra.mxu1 %vm823_vm4, %v3429_v56 }
 0x1ef   : > { %2758 = vmatmul.msk.f32.gmra.mxu2 %vm823_vm4, %v3429_v56  ;;  %2761 = vmatmul.msk.f32.gmra.mxu3 %vm823_vm4, %v3429_v56 }
 0x1f2   : > { %v3706_v15 = vpop.f32.mrf.mxu2  ;;  %v3708_v16 = vpop.f32.mrf.mxu3 }
 0x1f3   : > { %v3710_v17 = vpop.f32.mrf.mxu0  ;;  %v3712_v18 = vpop.f32.mrf.mxu1 }
 0x1f6   : > { %2753 = vmatmul.msk.f32.gmra.mxu0 %vm823_vm4, %v3451_v5  ;;  %2756 = vmatmul.msk.f32.gmra.mxu1 %vm823_vm4, %v3451_v5 }
 0x1f7   : > { %2759 = vmatmul.msk.f32.gmra.mxu2 %vm823_vm4, %v3451_v5  ;;  %2762 = vmatmul.msk.f32.gmra.mxu3 %vm823_vm4, %v3451_v5 }
 0x1fa   : > { %v3722_v19 = vpop.f32.mrf.mxu2  ;;  %v3724_v20 = vpop.f32.mrf.mxu3 }
 0x1fb   : > { %v3726_v21 = vpop.f32.mrf.mxu0  ;;  %v3728_v22 = vpop.f32.mrf.mxu1 }
 0x1fc   : > { %4660 = vst [vmem:[#allocation12_spill] sm:$0xff] %v3726_v21 }
 0x1fd   : > { %4661 = vst [vmem:[#allocation13_spill] sm:$0xff] %v3728_v22 }
 0x1fe   : > { %2763 = vmatmul.msk.f32.vlgmr.msra.gmra.mxu0 %vm823_vm4, %v3407_v43  ;;  %2764 = vmatmul.msk.f32.vlgmr.msra.gmra.mxu1 %vm823_vm4, %v3429_v56 }
 0x1ff   : > { %2765 = vmatmul.msk.f32.vlgmr.msra.gmra.mxu2 %vm823_vm4, %v3451_v5 }
 0x202   : > { %v3736_v23 = vpop.f32.mrf.mxu2  ;;  %v3738_v25 = vpop.f32.mrf.mxu3 }
 0x203   : > { %4662 = vst [vmem:[#allocation14_spill] sm:$0xff] %v3736_v23  ;;  %v3740_v26 = vpop.f32.mrf.mxu0  ;;  %v3742_v27 = vpop.f32.mrf.mxu1 }
 0x204   : > { %4663 = vst [vmem:[#allocation15_spill] sm:$0xff] %v3738_v25 }
 0x20a   : > { %v3744_v28 = vpop.f32.mrf.mxu2  ;;  %v3746_v30 = vpop.f32.mrf.mxu3 }
 0x20b   : > { %v3748_v31 = vpop.f32.mrf.mxu0  ;;  %v3750_v43 = vpop.f32.mrf.mxu1 }
 0x212   : > { %v3752_v56 = vpop.f32.mrf.mxu2  ;;  %v3754_v32 = vpop.f32.mrf.mxu3 }
 0x213   : > { %v3756_v5 = vpop.f32.mrf.mxu0  ;;  %v3758_v33 = vpop.f32.mrf.mxu1 }
 0x214   : > { %4664 = vst [vmem:[#allocation16_spill] sm:$0xff] %v3756_v5 }
 0x215   : > { %4665 = vst [vmem:[#allocation17_spill] sm:$0xff] %v3758_v33 }
 0x21a   : > { %v3760_v24 = vpop.f32.mrf.mxu2  ;;  %v3762_v34 = vpop.f32.mrf.mxu3 }
 0x21b   : > { %4666 = vst [vmem:[#allocation18_spill] sm:$0xff] %v3760_v24  ;;  %v3764_v35 = vpop.f32.mrf.mxu0  ;;  %v3766_v36 = vpop.f32.mrf.mxu1 }
 0x21c   : > { %4667 = vst [vmem:[#allocation19_spill] sm:$0xff] %v3762_v34 }
 0x222   : > { %v3768_v37 = vpop.f32.mrf.mxu2  ;;  %v3770_v38 = vpop.f32.mrf.mxu3 }
 0x223   : > { %v3772_v39 = vpop.f32.mrf.mxu0  ;;  %v3774_v29 = vpop.f32.mrf.mxu1 }
 0x22a   : > { %v3776_v40 = vpop.f32.mrf.mxu2  ;;  %v3778_v41 = vpop.f32.mrf.mxu3 }
 0x22b   : > { %v3780_v42 = vpop.f32.mrf.mxu0  ;;  %v3782_v44 = vpop.f32.mrf.mxu1 }
 0x22c   : > { %4668 = vst [vmem:[#allocation20_spill] sm:$0xff] %v3780_v42 }
 0x22d   : > { %4669 = vst [vmem:[#allocation21_spill] sm:$0xff] %v3782_v44 }
 0x232   : > { %v3784_v45 = vpop.f32.mrf.mxu2  ;;  %v3786_v46 = vpop.f32.mrf.mxu3 }
 0x233   : > { %4670 = vst [vmem:[#allocation22_spill] sm:$0xff] %v3784_v45  ;;  %v3788_v47 = vpop.f32.mrf.mxu0  ;;  %v3790_v48 = vpop.f32.mrf.mxu1 }
 0x234   : > { %4671 = vst [vmem:[#allocation23_spill] sm:$0xff] %v3786_v46 }
 0x23a   : > { %v3792_v49 = vpop.f32.mrf.mxu2  ;;  %v3794_v50 = vpop.f32.mrf.mxu3 }
 0x23b   : > { %v3796_v51 = vpop.f32.mrf.mxu0  ;;  %v3798_v52 = vpop.f32.mrf.mxu1 }
 0x242   : > { %v3800_v53 = vpop.f32.mrf.mxu2  ;;  %v3802_v54 = vpop.f32.mrf.mxu3 }
 0x243   : > { %v3804_v55 = vpop.f32.mrf.mxu0  ;;  %v3806_v57 = vpop.f32.mrf.mxu1 }
 0x244   : > { %4672 = vst [vmem:[#allocation24_spill] sm:$0xff] %v3804_v55 }
 0x245   : > { %4673 = vst [vmem:[#allocation25_spill] sm:$0xff] %v3806_v57 }
 0x24a   : > { %v3808_v58 = vpop.f32.mrf.mxu2  ;;  %v3810_v59 = vpop.f32.mrf.mxu3 }
 0x24b   : > { %4674 = vst [vmem:[#allocation26_spill] sm:$0xff] %v3808_v58  ;;  %v3812_v60 = vpop.f32.mrf.mxu0  ;;  %v3814_v61 = vpop.f32.mrf.mxu1 }
 0x24c   : > { %4675 = vst [vmem:[#allocation27_spill] sm:$0xff] %v3810_v59 }
 0x252   : > { %v3816_v62 = vpop.f32.mrf.mxu2  ;;  %v3818_v63 = vpop.f32.mrf.mxu3 }
 0x253   : > { %v3820_v0 = vpop.f32.mrf.mxu0  ;;  %v3822_v1 = vpop.f32.mrf.mxu1 }
 0x25a   : > { %v3824_v2 = vpop.f32.mrf.mxu2  ;;  %v3826_v3 = vpop.f32.mrf.mxu3 }
 0x25b   : > { %v3828_v4 = vpop.f32.mrf.mxu0  ;;  %v3830_v6 = vpop.f32.mrf.mxu1 }
 0x25c   : > { %4676 = vst [vmem:[#allocation28_spill] sm:$0xff] %v3828_v4 }
 0x25d   : > { %4677 = vst [vmem:[#allocation29_spill] sm:$0xff] %v3830_v6 }
 0x262   : > { %v3832_v7 = vpop.f32.mrf.mxu2  ;;  %v3834_v8 = vpop.f32.mrf.mxu3 }
 0x263   : > { %4678 = vst [vmem:[#allocation30_spill] sm:$0xff] %v3832_v7  ;;  %v3836_v9 = vpop.f32.mrf.mxu0  ;;  %v3838_v10 = vpop.f32.mrf.mxu1 }
 0x264   : > { %4679 = vst [vmem:[#allocation31_spill] sm:$0xff] %v3834_v8 }
 0x26a   : > { %v3840_v11 = vpop.f32.mrf.mxu2  ;;  %v3842_v12 = vpop.f32.mrf.mxu3 }
 0x26b   : > { %v3844_v59 = vpop.f32.mrf.mxu0  ;;  %v3846_v58 = vpop.f32.mrf.mxu1 }
 0x272   : > { %v3848_v57 = vpop.f32.mrf.mxu2  ;;  %v3850_v4 = vpop.f32.mrf.mxu3 }
 0x273   : > { %v3852_v6 = vpop.f32.mrf.mxu0  ;;  %v3854_v7 = vpop.f32.mrf.mxu1 }
 0x274   : > { %4680 = vst [vmem:[#allocation32_spill] sm:$0xff] %v3852_v6 }
 0x275   : > { %4681 = vst [vmem:[#allocation33_spill] sm:$0xff] %v3854_v7 }
 0x27a   : > { %v3856_v8 = vpop.f32.mrf.mxu2  ;;  %v3858_v55 = vpop.f32.mrf.mxu3 }
 0x27b   : > { %4682 = vst [vmem:[#allocation34_spill] sm:$0xff] %v3856_v8  ;;  %v3860_v46 = vpop.f32.mrf.mxu0  ;;  %v3862_v45 = vpop.f32.mrf.mxu1 }
 0x27c   : > { %4683 = vst [vmem:[#allocation35_spill] sm:$0xff] %v3858_v55 }
 0x27d   : > { %4684 = vst [vmem:[#allocation36_spill] sm:$0xff] %v3862_v45 }
 0x27f   : > { %1486 = sbr.rel (%p2675_p4) target bundleno = 719 (0x2cf), region = 56 }
 0x282   : > { %v3864_v44 = vpop.f32.mrf.mxu2 }
 0x283   : > { %4685 = vst [vmem:[#allocation37_spill] sm:$0xff] %v3864_v44 }
 0x284   : > { %1487 = vst [vmem:[#allocation2] sm:$0xff] %v3694_v13  ;;  %vm1511_vm5 = vcmask 523264  }
 0x285   : > { %1488 = vst [vmem:[#allocation2 + $0x8] sm:$0xff] %v3696_v14 }
 0x286   : > { %1489 = vst [vmem:[#allocation2 + $0x10] sm:$0xff] %v3706_v15 }
 0x287   : > { %1490 = vst [vmem:[#allocation2 + $0x18] sm:$0xff] %v3708_v16 }
 0x288   : > { %1491 = vst [vmem:[#allocation2 + $0x20] sm:$0xff] %v3740_v26 }
 0x289   : > { %1492 = vst [vmem:[#allocation2 + $0x28] sm:$0xff] %v3742_v27 }
 0x28a   : > { %1493 = vst [vmem:[#allocation2 + $0x30] sm:$0xff] %v3744_v28 }
 0x28b   : > { %1494 = vst [vmem:[#allocation2 + $0x38] sm:$0xff] %v3746_v30 }
 0x28c   : > { %1495 = vst [vmem:[#allocation2 + $0x40] sm:$0xff] %v3764_v35 }
 0x28d   : > { %1496 = vst [vmem:[#allocation2 + $0x48] sm:$0xff] %v3766_v36 }
 0x28e   : > { %1497 = vst [vmem:[#allocation2 + $0x50] sm:$0xff] %v3768_v37 }
 0x28f   : > { %1498 = vst [vmem:[#allocation2 + $0x58] sm:$0xff] %v3770_v38 }
 0x290   : > { %1499 = vst [vmem:[#allocation2 + $0x60] sm:$0xff] %v3788_v47 }
 0x291   : > { %1500 = vst [vmem:[#allocation2 + $0x68] sm:$0xff] %v3790_v48 }
 0x292   : > { %1501 = vst [vmem:[#allocation2 + $0x70] sm:$0xff] %v3792_v49 }
 0x293   : > { %1502 = vst [vmem:[#allocation2 + $0x78] sm:$0xff] %v3794_v50 }
 0x294   : > { %1503 = vst [vmem:[#allocation2 + $0x80] sm:$0xff] %v3812_v60 }
 0x295   : > { %1504 = vst [vmem:[#allocation2 + $0x88] sm:$0xff] %v3814_v61 }
 0x296   : > { %1505 = vst [vmem:[#allocation2 + $0x90] sm:$0xff] %v3816_v62 }
 0x297   : > { %1506 = vst [vmem:[#allocation2 + $0x98] sm:$0xff] %v3818_v63 }
 0x298   : > { %1507 = vst [vmem:[#allocation2 + $0xa0] sm:$0xff] %v3836_v9 }
 0x299   : > { %1508 = vst [vmem:[#allocation2 + $0xa8] sm:$0xff] %v3838_v10 }
 0x29a   : > { %1509 = vst [vmem:[#allocation2 + $0xb0] sm:$0xff] %v3840_v11 }
 0x29b   : > { %1510 = vst [vmem:[#allocation2 + $0xb8] sm:$0xff] %v3842_v12 }
 0x29c   : > { %1512 = vst.msk [vmem:[#allocation2 + $0xc0] sm:$0xff] %vm1511_vm5, %v3860_v46 }
 0x29d   : > { %1537 = vst.msk [vmem:[#allocation2 + $0x188] sm:$0xff] %vm1511_vm5, %v3862_v45  ;;  %v4687_v45 = vld [vmem:[#allocation22_spill] sm:$0xff] }
 0x29e   : > { %1562 = vst.msk [vmem:[#allocation2 + $0x250] sm:$0xff] %vm1511_vm5, %v3864_v44  ;;  %v4686_v44 = vld [vmem:[#allocation21_spill] sm:$0xff] }
 0x29f   : > { %1513 = vst [vmem:[#allocation2 + $0xc8] sm:$0xff] %v3710_v17 }
 0x2a0   : > { %1514 = vst [vmem:[#allocation2 + $0xd0] sm:$0xff] %v3712_v18 }
 0x2a1   : > { %1515 = vst [vmem:[#allocation2 + $0xd8] sm:$0xff] %v3722_v19 }
 0x2a2   : > { %1516 = vst [vmem:[#allocation2 + $0xe0] sm:$0xff] %v3724_v20 }
 0x2a3   : > { %1517 = vst [vmem:[#allocation2 + $0xe8] sm:$0xff] %v3748_v31 }
 0x2a4   : > { %1518 = vst [vmem:[#allocation2 + $0xf0] sm:$0xff] %v3750_v43 }
 0x2a5   : > { %1519 = vst [vmem:[#allocation2 + $0xf8] sm:$0xff] %v3752_v56 }
 0x2a6   : > { %1520 = vst [vmem:[#allocation2 + $0x100] sm:$0xff] %v3754_v32 }
 0x2a7   : > { %1521 = vst [vmem:[#allocation2 + $0x108] sm:$0xff] %v3772_v39 }
 0x2a8   : > { %1522 = vst [vmem:[#allocation2 + $0x110] sm:$0xff] %v3774_v29 }
 0x2a9   : > { %1523 = vst [vmem:[#allocation2 + $0x118] sm:$0xff] %v3776_v40 }
 0x2aa   : > { %1524 = vst [vmem:[#allocation2 + $0x120] sm:$0xff] %v3778_v41 }
 0x2ab   : > { %1525 = vst [vmem:[#allocation2 + $0x128] sm:$0xff] %v3796_v51 }
 0x2ac   : > { %1526 = vst [vmem:[#allocation2 + $0x130] sm:$0xff] %v3798_v52 }
 0x2ad   : > { %1527 = vst [vmem:[#allocation2 + $0x138] sm:$0xff] %v3800_v53 }
 0x2ae   : > { %1528 = vst [vmem:[#allocation2 + $0x140] sm:$0xff] %v3802_v54 }
 0x2af   : > { %1529 = vst [vmem:[#allocation2 + $0x148] sm:$0xff] %v3820_v0 }
 0x2b0   : > { %1530 = vst [vmem:[#allocation2 + $0x150] sm:$0xff] %v3822_v1 }
 0x2b1   : > { %1531 = vst [vmem:[#allocation2 + $0x158] sm:$0xff] %v3824_v2 }
 0x2b2   : > { %1532 = vst [vmem:[#allocation2 + $0x160] sm:$0xff] %v3826_v3 }
 0x2b3   : > { %1533 = vst [vmem:[#allocation2 + $0x168] sm:$0xff] %v3844_v59 }
 0x2b4   : > { %1534 = vst [vmem:[#allocation2 + $0x170] sm:$0xff] %v3846_v58 }
 0x2b5   : > { %1535 = vst [vmem:[#allocation2 + $0x178] sm:$0xff] %v3848_v57 }
 0x2b6   : > { %1536 = vst [vmem:[#allocation2 + $0x180] sm:$0xff] %v3850_v4 }
 0x2b7   : > { %1538 = vst [vmem:[#allocation2 + $0x190] sm:$0xff] %v3726_v21  ;;  %v4688_v21 = vld [vmem:[#allocation23_spill] sm:$0xff] }
 0x2b8   : > { %1539 = vst [vmem:[#allocation2 + $0x198] sm:$0xff] %v3728_v22  ;;  %v4689_v22 = vld [vmem:[#allocation24_spill] sm:$0xff] }
 0x2b9   : > { %1540 = vst [vmem:[#allocation2 + $0x1a0] sm:$0xff] %v3736_v23  ;;  %v4690_v23 = vld [vmem:[#allocation25_spill] sm:$0xff] }
 0x2ba   : > { %1541 = vst [vmem:[#allocation2 + $0x1a8] sm:$0xff] %v3738_v25  ;;  %v4691_v25 = vld [vmem:[#allocation26_spill] sm:$0xff] }
 0x2bb   : > { %1542 = vst [vmem:[#allocation2 + $0x1b0] sm:$0xff] %v3756_v5  ;;  %v4692_v5 = vld [vmem:[#allocation27_spill] sm:$0xff] }
 0x2bc   : > { %1543 = vst [vmem:[#allocation2 + $0x1b8] sm:$0xff] %v3758_v33  ;;  %v4693_v33 = vld [vmem:[#allocation28_spill] sm:$0xff] }
 0x2bd   : > { %1544 = vst [vmem:[#allocation2 + $0x1c0] sm:$0xff] %v3760_v24  ;;  %v4694_v24 = vld [vmem:[#allocation29_spill] sm:$0xff] }
 0x2be   : > { %1545 = vst [vmem:[#allocation2 + $0x1c8] sm:$0xff] %v3762_v34  ;;  %v4695_v34 = vld [vmem:[#allocation30_spill] sm:$0xff] }
 0x2bf   : > { %1546 = vst [vmem:[#allocation2 + $0x1d0] sm:$0xff] %v3780_v42  ;;  %v4696_v42 = vld [vmem:[#allocation31_spill] sm:$0xff] }
 0x2c0   : > { %1547 = vst [vmem:[#allocation2 + $0x1d8] sm:$0xff] %v4686_v44 }
 0x2c1   : > { %1548 = vst [vmem:[#allocation2 + $0x1e0] sm:$0xff] %v4687_v45 }
 0x2c2   : > { %1549 = vst [vmem:[#allocation2 + $0x1e8] sm:$0xff] %v4688_v21 }
 0x2c3   : > { %1550 = vst [vmem:[#allocation2 + $0x1f0] sm:$0xff] %v4689_v22 }
 0x2c4   : > { %1551 = vst [vmem:[#allocation2 + $0x1f8] sm:$0xff] %v4690_v23 }
 0x2c5   : > { %1552 = vst [vmem:[#allocation2 + $0x200] sm:$0xff] %v4691_v25 }
 0x2c6   : > { %1553 = vst [vmem:[#allocation2 + $0x208] sm:$0xff] %v4692_v5 }
 0x2c7   : > { %1554 = vst [vmem:[#allocation2 + $0x210] sm:$0xff] %v4693_v33 }
 0x2c8   : > { %1555 = vst [vmem:[#allocation2 + $0x218] sm:$0xff] %v4694_v24 }
 0x2c9   : > { %1556 = vst [vmem:[#allocation2 + $0x220] sm:$0xff] %v4695_v34 }
 0x2ca   : > { %1557 = vst [vmem:[#allocation2 + $0x228] sm:$0xff] %v4696_v42 }
 0x2cb   : > { %1558 = vst [vmem:[#allocation2 + $0x230] sm:$0xff] %v3852_v6 }
 0x2cc   : > { %1559 = vst [vmem:[#allocation2 + $0x238] sm:$0xff] %v3854_v7 }
 0x2cd   : > { %1560 = vst [vmem:[#allocation2 + $0x240] sm:$0xff] %v3856_v8 }
 0x2ce   : > { %1561 = vst [vmem:[#allocation2 + $0x248] sm:$0xff] %v3858_v55 }
 0x2cf PF: > { %p2767_p1 = scmp.le.s32.totalorder %s3118_s25, 0 }
 0x2d1   : > { %1566 = sbr.rel (%p2767_p1) target bundleno = 804 (0x324), region = 60 }
 0x2d6   : > { %v1567_v21 = vld [vmem:[#allocation2] sm:$0xff]  ;;  %v1568_v22 = vld [vmem:[#allocation2 + $0x8] sm:$0xff]  ;;  %v1569_v23 = vld [vmem:[#allocation2 + $0x10] sm:$0xff]  ;;  %vm1741_vm6 = vcmask 523264  }
 0x2d7   : > { %v1642_v25 = vadd.f32 %v1567_v21, %v3694_v13  ;;  %v1643_v5 = vadd.f32 %v1568_v22, %v3696_v14  ;;  %v1644_v33 = vadd.f32 %v1569_v23, %v3706_v15  ;;  %v1570_v24 = vld [vmem:[#allocation2 + $0x18] sm:$0xff]  ;;  %v1571_v34 = vld [vmem:[#allocation2 + $0x20] sm:$0xff]  ;;  %v1572_v42 = vld [vmem:[#allocation2 + $0x28] sm:$0xff] }
 0x2d8   : > { %v1645_v44 = vadd.f32 %v1570_v24, %v3708_v16  ;;  %v1573_v45 = vld [vmem:[#allocation2 + $0x30] sm:$0xff]  ;;  %v1646_v55 = vadd.f32 %v1571_v34, %v3740_v26  ;;  %v1574_v8 = vld [vmem:[#allocation2 + $0x38] sm:$0xff]  ;;  %v1647_v7 = vadd.f32 %v1572_v42, %v3742_v27  ;;  %v1575_v6 = vld [vmem:[#allocation2 + $0x40] sm:$0xff] }
 0x2d9   : > { %1717 = vst [vmem:[#allocation2] sm:$0xff] %v1642_v25  ;;  %v1648_v13 = vadd.f32 %v1573_v45, %v3744_v28  ;;  %v1576_v14 = vld [vmem:[#allocation2 + $0x48] sm:$0xff]  ;;  %v1649_v15 = vadd.f32 %v1574_v8, %v3746_v30  ;;  %v1577_v21 = vld [vmem:[#allocation2 + $0x50] sm:$0xff]  ;;  %v1650_v16 = vadd.f32 %v1575_v6, %v3764_v35  ;;  %v1578_v22 = vld [vmem:[#allocation2 + $0x58] sm:$0xff] }
 0x2da   : > { %1718 = vst [vmem:[#allocation2 + $0x8] sm:$0xff] %v1643_v5  ;;  %v1651_v26 = vadd.f32 %v1576_v14, %v3766_v36  ;;  %v1579_v23 = vld [vmem:[#allocation2 + $0x60] sm:$0xff]  ;;  %v1652_v27 = vadd.f32 %v1577_v21, %v3768_v37  ;;  %v1580_v25 = vld [vmem:[#allocation2 + $0x68] sm:$0xff]  ;;  %v1653_v28 = vadd.f32 %v1578_v22, %v3770_v38  ;;  %v1581_v5 = vld [vmem:[#allocation2 + $0x70] sm:$0xff] }
 0x2db   : > { %1719 = vst [vmem:[#allocation2 + $0x10] sm:$0xff] %v1644_v33  ;;  %v1654_v30 = vadd.f32 %v1579_v23, %v3788_v47  ;;  %v1582_v8 = vld [vmem:[#allocation2 + $0x78] sm:$0xff]  ;;  %v1655_v35 = vadd.f32 %v1580_v25, %v3790_v48  ;;  %v1656_v36 = vadd.f32 %v1581_v5, %v3792_v49  ;;  %v1584_v6 = vld [vmem:[#allocation2 + $0x88] sm:$0xff]  ;;  %v1587_v24 = vld [vmem:[#allocation2 + $0xa0] sm:$0xff] }
 0x2dc   : > { %1720 = vst [vmem:[#allocation2 + $0x18] sm:$0xff] %v1645_v44  ;;  %v1657_v37 = vadd.f32 %v1582_v8, %v3794_v50  ;;  %v1586_v33 = vld [vmem:[#allocation2 + $0x98] sm:$0xff]  ;;  %v1659_v47 = vadd.f32 %v1584_v6, %v3814_v61  ;;  %v1588_v34 = vld [vmem:[#allocation2 + $0xa8] sm:$0xff]  ;;  %v1589_v42 = vld [vmem:[#allocation2 + $0xb0] sm:$0xff]  ;;  %v1662_v50 = vadd.f32 %v1587_v24, %v3836_v9 }
 0x2dd   : > { %1721 = vst [vmem:[#allocation2 + $0x20] sm:$0xff] %v1646_v55  ;;  %v1583_v55 = vld [vmem:[#allocation2 + $0x80] sm:$0xff]  ;;  %v1661_v49 = vadd.f32 %v1586_v33, %v3818_v63  ;;  %v1590_v44 = vld [vmem:[#allocation2 + $0xb8] sm:$0xff]  ;;  %v1664_v61 = vadd.f32 %v1589_v42, %v3840_v11  ;;  %v1593_v14 = vld [vmem:[#allocation2 + $0xd0] sm:$0xff] }
 0x2de   : > { %1722 = vst [vmem:[#allocation2 + $0x28] sm:$0xff] %v1647_v7  ;;  %v1585_v7 = vld [vmem:[#allocation2 + $0x90] sm:$0xff]  ;;  %v1658_v38 = vadd.f32 %v1583_v55, %v3812_v60  ;;  %v1663_v60 = vadd.f32 %v1588_v34, %v3838_v10  ;;  %v1591_v45 = vld [vmem:[#allocation2 + $0xc0] sm:$0xff]  ;;  %v1668_v10 = vadd.f32 %v1593_v14, %v3712_v18  ;;  %v4697_v42 = vld [vmem:[#allocation36_spill] sm:$0xff] }
 0x2df   : > { %1723 = vst [vmem:[#allocation2 + $0x30] sm:$0xff] %v1648_v13  ;;  %v1660_v48 = vadd.f32 %v1585_v7, %v3816_v62  ;;  %v1592_v13 = vld [vmem:[#allocation2 + $0xc8] sm:$0xff]  ;;  %v1665_v62 = vadd.f32 %v1590_v44, %v3842_v12  ;;  %v1666_v63 = vadd.f32 %v1591_v45, %v3860_v46  ;;  %v1595_v21 = vld [vmem:[#allocation2 + $0xe0] sm:$0xff]  ;;  %v1597_v22 = vld [vmem:[#allocation2 + $0xf0] sm:$0xff] }
 0x2e0   : > { %1724 = vst [vmem:[#allocation2 + $0x38] sm:$0xff] %v1649_v15  ;;  %v1594_v15 = vld [vmem:[#allocation2 + $0xd8] sm:$0xff]  ;;  %v1667_v9 = vadd.f32 %v1592_v13, %v3710_v17  ;;  %v1670_v12 = vadd.f32 %v1595_v21, %v3724_v20  ;;  %v1599_v23 = vld [vmem:[#allocation2 + $0x100] sm:$0xff]  ;;  %v1672_v17 = vadd.f32 %v1597_v22, %v3750_v43  ;;  %v1601_v25 = vld [vmem:[#allocation2 + $0x110] sm:$0xff] }
 0x2e1   : > { %1725 = vst [vmem:[#allocation2 + $0x40] sm:$0xff] %v1650_v16  ;;  %v1596_v16 = vld [vmem:[#allocation2 + $0xe8] sm:$0xff]  ;;  %v1669_v11 = vadd.f32 %v1594_v15, %v3722_v19  ;;  %v1674_v19 = vadd.f32 %v1599_v23, %v3754_v32  ;;  %v1603_v5 = vld [vmem:[#allocation2 + $0x120] sm:$0xff]  ;;  %v1605_v8 = vld [vmem:[#allocation2 + $0x130] sm:$0xff] }
 0x2e2   : > { %1726 = vst [vmem:[#allocation2 + $0x48] sm:$0xff] %v1651_v26  ;;  %v1598_v26 = vld [vmem:[#allocation2 + $0xf8] sm:$0xff]  ;;  %v1671_v46 = vadd.f32 %v1596_v16, %v3748_v31  ;;  %v1676_v31 = vadd.f32 %v1601_v25, %v3774_v29  ;;  %v1607_v55 = vld [vmem:[#allocation2 + $0x140] sm:$0xff]  ;;  %v1609_v6 = vld [vmem:[#allocation2 + $0x150] sm:$0xff] }
 0x2e3   : > { %1727 = vst [vmem:[#allocation2 + $0x50] sm:$0xff] %v1652_v27  ;;  %v1600_v27 = vld [vmem:[#allocation2 + $0x108] sm:$0xff]  ;;  %v1673_v18 = vadd.f32 %v1598_v26, %v3752_v56  ;;  %v1678_v56 = vadd.f32 %v1603_v5, %v3778_v41  ;;  %v1611_v7 = vld [vmem:[#allocation2 + $0x160] sm:$0xff]  ;;  %v1613_v33 = vld [vmem:[#allocation2 + $0x170] sm:$0xff] }
 0x2e4   : > { %1728 = vst [vmem:[#allocation2 + $0x58] sm:$0xff] %v1653_v28  ;;  %v1602_v28 = vld [vmem:[#allocation2 + $0x118] sm:$0xff]  ;;  %v1675_v20 = vadd.f32 %v1600_v27, %v3772_v39  ;;  %v1680_v39 = vadd.f32 %v1605_v8, %v3798_v52  ;;  %v1615_v24 = vld [vmem:[#allocation2 + $0x180] sm:$0xff]  ;;  %v1617_v34 = vld [vmem:[#allocation2 + $0x190] sm:$0xff] }
 0x2e5   : > { %1729 = vst [vmem:[#allocation2 + $0x60] sm:$0xff] %v1654_v30  ;;  %v1604_v30 = vld [vmem:[#allocation2 + $0x128] sm:$0xff]  ;;  %v1677_v43 = vadd.f32 %v1602_v28, %v3776_v40  ;;  %v1682_v40 = vadd.f32 %v1607_v55, %v3802_v54  ;;  %v4698_v44 = vld [vmem:[#allocation12_spill] sm:$0xff]  ;;  %v4699_v45 = vld [vmem:[#allocation13_spill] sm:$0xff] }
 0x2e6   : > { %1730 = vst [vmem:[#allocation2 + $0x68] sm:$0xff] %v1655_v35  ;;  %v1606_v35 = vld [vmem:[#allocation2 + $0x138] sm:$0xff]  ;;  %v1679_v32 = vadd.f32 %v1604_v30, %v3796_v51  ;;  %v1684_v51 = vadd.f32 %v1609_v6, %v3822_v1  ;;  %v4700_v13 = vld [vmem:[#allocation14_spill] sm:$0xff] }
 0x2e7   : > { %1731 = vst [vmem:[#allocation2 + $0x70] sm:$0xff] %v1656_v36  ;;  %v1608_v36 = vld [vmem:[#allocation2 + $0x148] sm:$0xff]  ;;  %v1681_v29 = vadd.f32 %v1606_v35, %v3800_v53  ;;  %v1686_v53 = vadd.f32 %v1611_v7, %v3826_v3  ;;  %v4702_v15 = vld [vmem:[#allocation16_spill] sm:$0xff] }
 0x2e8   : > { %1732 = vst [vmem:[#allocation2 + $0x78] sm:$0xff] %v1657_v37  ;;  %v1610_v37 = vld [vmem:[#allocation2 + $0x158] sm:$0xff]  ;;  %v1683_v41 = vadd.f32 %v1608_v36, %v3820_v0  ;;  %v1688_v0 = vadd.f32 %v1613_v33, %v3846_v58  ;;  %v1624_v21 = vld [vmem:[#allocation2 + $0x1c8] sm:$0xff] }
 0x2e9   : > { %1733 = vst [vmem:[#allocation2 + $0x80] sm:$0xff] %v1658_v38  ;;  %v1612_v38 = vld [vmem:[#allocation2 + $0x168] sm:$0xff]  ;;  %v1685_v52 = vadd.f32 %v1610_v37, %v3824_v2  ;;  %v1690_v2 = vadd.f32 %v1615_v24, %v3850_v4  ;;  %v4701_v4 = vld [vmem:[#allocation15_spill] sm:$0xff]  ;;  %v1626_v26 = vld [vmem:[#allocation2 + $0x1d8] sm:$0xff] }
 0x2ea   : > { %1734 = vst [vmem:[#allocation2 + $0x88] sm:$0xff] %v1659_v47  ;;  %v1614_v47 = vld [vmem:[#allocation2 + $0x178] sm:$0xff]  ;;  %v1687_v54 = vadd.f32 %v1612_v38, %v3844_v59  ;;  %v1692_v59 = vadd.f32 %v1617_v34, %v4698_v44  ;;  %v4704_v22 = vld [vmem:[#allocation18_spill] sm:$0xff] }
 0x2eb   : > { %1735 = vst [vmem:[#allocation2 + $0x90] sm:$0xff] %v1660_v48  ;;  %v1616_v48 = vld [vmem:[#allocation2 + $0x188] sm:$0xff]  ;;  %v1689_v1 = vadd.f32 %v1614_v47, %v3848_v57  ;;  %v4706_v27 = vld [vmem:[#allocation20_spill] sm:$0xff] }
 0x2ec   : > { %1736 = vst [vmem:[#allocation2 + $0x98] sm:$0xff] %v1661_v49  ;;  %v1618_v49 = vld [vmem:[#allocation2 + $0x198] sm:$0xff]  ;;  %v1691_v3 = vadd.f32 %v1616_v48, %v4697_v42  ;;  %v1628_v25 = vld [vmem:[#allocation2 + $0x1e8] sm:$0xff] }
 0x2ed   : > { %1737 = vst [vmem:[#allocation2 + $0xa0] sm:$0xff] %v1662_v50  ;;  %v1619_v50 = vld [vmem:[#allocation2 + $0x1a0] sm:$0xff]  ;;  %v1693_v58 = vadd.f32 %v1618_v49, %v4699_v45  ;;  %v4708_v5 = vld [vmem:[#allocation22_spill] sm:$0xff]  ;;  %v1630_v30 = vld [vmem:[#allocation2 + $0x1f8] sm:$0xff] }
 0x2ee   : > { %1738 = vst [vmem:[#allocation2 + $0xa8] sm:$0xff] %v1663_v60  ;;  %v1620_v60 = vld [vmem:[#allocation2 + $0x1a8] sm:$0xff]  ;;  %v1694_v57 = vadd.f32 %v1619_v50, %v4700_v13  ;;  %v4710_v35 = vld [vmem:[#allocation24_spill] sm:$0xff]  ;;  %v4719_v50 = vld [vmem:[#allocation33_spill] sm:$0xff] }
 0x2ef   : > { %1739 = vst [vmem:[#allocation2 + $0xb0] sm:$0xff] %v1664_v61  ;;  %v1621_v61 = vld [vmem:[#allocation2 + $0x1b0] sm:$0xff]  ;;  %v1695_v14 = vadd.f32 %v1620_v60, %v4701_v4  ;;  %v1632_v55 = vld [vmem:[#allocation2 + $0x208] sm:$0xff]  ;;  %v1634_v37 = vld [vmem:[#allocation2 + $0x218] sm:$0xff] }
 0x2f0   : > { %1740 = vst [vmem:[#allocation2 + $0xb8] sm:$0xff] %v1665_v62  ;;  %v1622_v62 = vld [vmem:[#allocation2 + $0x1b8] sm:$0xff]  ;;  %v4712_v6 = vld [vmem:[#allocation26_spill] sm:$0xff]  ;;  %v4722_v13 = vld [vmem:[#allocation37_spill] sm:$0xff] }
 0x2f1   : > { %1742 = vst.msk [vmem:[#allocation2 + $0xc0] sm:$0xff] %vm1741_vm6, %v1666_v63  ;;  %v1623_v63 = vld [vmem:[#allocation2 + $0x1c0] sm:$0xff]  ;;  %v4714_v38 = vld [vmem:[#allocation28_spill] sm:$0xff]  ;;  %v1636_v33 = vld [vmem:[#allocation2 + $0x228] sm:$0xff] }
 0x2f2   : > { %1743 = vst [vmem:[#allocation2 + $0xc8] sm:$0xff] %v1667_v9  ;;  %v1696_v9 = vadd.f32 %v1621_v61, %v4702_v15  ;;  %v4716_v24 = vld [vmem:[#allocation30_spill] sm:$0xff]  ;;  %v1638_v48 = vld [vmem:[#allocation2 + $0x238] sm:$0xff] }
 0x2f3   : > { %1744 = vst [vmem:[#allocation2 + $0xd0] sm:$0xff] %v1668_v10  ;;  %v4703_v10 = vld [vmem:[#allocation17_spill] sm:$0xff]  ;;  %v4718_v49 = vld [vmem:[#allocation32_spill] sm:$0xff]  ;;  %v1713_v44 = vadd.f32 %v1638_v48, %v4719_v50  ;;  %v4720_v60 = vld [vmem:[#allocation34_spill] sm:$0xff] }
 0x2f4   : > { %1745 = vst [vmem:[#allocation2 + $0xd8] sm:$0xff] %v1669_v11  ;;  %v1697_v16 = vadd.f32 %v1622_v62, %v4703_v10  ;;  %v1625_v11 = vld [vmem:[#allocation2 + $0x1d0] sm:$0xff] }
 0x2f5   : > { %1746 = vst [vmem:[#allocation2 + $0xe0] sm:$0xff] %v1670_v12  ;;  %v1698_v12 = vadd.f32 %v1623_v63, %v4704_v22 }
 0x2f6   : > { %1747 = vst [vmem:[#allocation2 + $0xe8] sm:$0xff] %v1671_v46  ;;  %v4705_v46 = vld [vmem:[#allocation19_spill] sm:$0xff] }
 0x2f7   : > { %1748 = vst [vmem:[#allocation2 + $0xf0] sm:$0xff] %v1672_v17  ;;  %v1699_v23 = vadd.f32 %v1624_v21, %v4705_v46  ;;  %v1627_v17 = vld [vmem:[#allocation2 + $0x1e0] sm:$0xff] }
 0x2f8   : > { %1749 = vst [vmem:[#allocation2 + $0xf8] sm:$0xff] %v1673_v18  ;;  %v1700_v18 = vadd.f32 %v1625_v11, %v4706_v27 }
 0x2f9   : > { %1750 = vst [vmem:[#allocation2 + $0x100] sm:$0xff] %v1674_v19  ;;  %v4707_v19 = vld [vmem:[#allocation21_spill] sm:$0xff] }
 0x2fa   : > { %1751 = vst [vmem:[#allocation2 + $0x108] sm:$0xff] %v1675_v20  ;;  %v1701_v28 = vadd.f32 %v1626_v26, %v4707_v19  ;;  %v1629_v20 = vld [vmem:[#allocation2 + $0x1f0] sm:$0xff] }
 0x2fb   : > { %1752 = vst [vmem:[#allocation2 + $0x110] sm:$0xff] %v1676_v31  ;;  %v1702_v31 = vadd.f32 %v1627_v17, %v4708_v5 }
 0x2fc   : > { %1753 = vst [vmem:[#allocation2 + $0x118] sm:$0xff] %v1677_v43  ;;  %v4709_v43 = vld [vmem:[#allocation23_spill] sm:$0xff] }
 0x2fd   : > { %1754 = vst [vmem:[#allocation2 + $0x120] sm:$0xff] %v1678_v56  ;;  %v1703_v8 = vadd.f32 %v1628_v25, %v4709_v43  ;;  %v1631_v56 = vld [vmem:[#allocation2 + $0x200] sm:$0xff] }
 0x2fe   : > { %1755 = vst [vmem:[#allocation2 + $0x128] sm:$0xff] %v1679_v32  ;;  %v1704_v32 = vadd.f32 %v1629_v20, %v4710_v35 }
 0x2ff   : > { %1756 = vst [vmem:[#allocation2 + $0x130] sm:$0xff] %v1680_v39  ;;  %v4711_v39 = vld [vmem:[#allocation25_spill] sm:$0xff] }
 0x300   : > { %1757 = vst [vmem:[#allocation2 + $0x138] sm:$0xff] %v1681_v29  ;;  %v1705_v36 = vadd.f32 %v1630_v30, %v4711_v39  ;;  %v1633_v29 = vld [vmem:[#allocation2 + $0x210] sm:$0xff] }
 0x301   : > { %1758 = vst [vmem:[#allocation2 + $0x140] sm:$0xff] %v1682_v40  ;;  %v1706_v40 = vadd.f32 %v1631_v56, %v4712_v6 }
 0x302   : > { %1759 = vst [vmem:[#allocation2 + $0x148] sm:$0xff] %v1683_v41  ;;  %v4713_v41 = vld [vmem:[#allocation27_spill] sm:$0xff] }
 0x303   : > { %1760 = vst [vmem:[#allocation2 + $0x150] sm:$0xff] %v1684_v51  ;;  %v1707_v7 = vadd.f32 %v1632_v55, %v4713_v41  ;;  %v1635_v51 = vld [vmem:[#allocation2 + $0x220] sm:$0xff] }
 0x304   : > { %1761 = vst [vmem:[#allocation2 + $0x158] sm:$0xff] %v1685_v52  ;;  %v1708_v52 = vadd.f32 %v1633_v29, %v4714_v38 }
 0x305   : > { %1762 = vst [vmem:[#allocation2 + $0x160] sm:$0xff] %v1686_v53  ;;  %v4715_v53 = vld [vmem:[#allocation29_spill] sm:$0xff] }
 0x306   : > { %1763 = vst [vmem:[#allocation2 + $0x168] sm:$0xff] %v1687_v54  ;;  %v1709_v47 = vadd.f32 %v1634_v37, %v4715_v53  ;;  %v1637_v54 = vld [vmem:[#allocation2 + $0x230] sm:$0xff] }
 0x307   : > { %1764 = vst [vmem:[#allocation2 + $0x170] sm:$0xff] %v1688_v0  ;;  %v1710_v0 = vadd.f32 %v1635_v51, %v4716_v24  ;;  %v1712_v42 = vadd.f32 %v1637_v54, %v4718_v49 }
 0x308   : > { %1765 = vst [vmem:[#allocation2 + $0x178] sm:$0xff] %v1689_v1  ;;  %v4717_v1 = vld [vmem:[#allocation31_spill] sm:$0xff] }
 0x309   : > { %1766 = vst [vmem:[#allocation2 + $0x180] sm:$0xff] %v1690_v2  ;;  %v1711_v34 = vadd.f32 %v1636_v33, %v4717_v1  ;;  %v1639_v2 = vld [vmem:[#allocation2 + $0x240] sm:$0xff] }
 0x30a   : > { %1767 = vst.msk [vmem:[#allocation2 + $0x188] sm:$0xff] %vm1741_vm6, %v1691_v3  ;;  %v1640_v3 = vld [vmem:[#allocation2 + $0x248] sm:$0xff]  ;;  %v1714_v45 = vadd.f32 %v1639_v2, %v4720_v60 }
 0x30b   : > { %1768 = vst [vmem:[#allocation2 + $0x190] sm:$0xff] %v1692_v59  ;;  %v1641_v59 = vld [vmem:[#allocation2 + $0x250] sm:$0xff] }
 0x30c   : > { %1769 = vst [vmem:[#allocation2 + $0x198] sm:$0xff] %v1693_v58  ;;  %v4721_v58 = vld [vmem:[#allocation35_spill] sm:$0xff] }
 0x30d   : > { %1770 = vst [vmem:[#allocation2 + $0x1a0] sm:$0xff] %v1694_v57  ;;  %v1715_v61 = vadd.f32 %v1640_v3, %v4721_v58  ;;  %v1716_v57 = vadd.f32 %v1641_v59, %v4722_v13 }
 0x30e   : > { %1771 = vst [vmem:[#allocation2 + $0x1a8] sm:$0xff] %v1695_v14 }
 0x30f   : > { %1772 = vst [vmem:[#allocation2 + $0x1b0] sm:$0xff] %v1696_v9 }
 0x310   : > { %1773 = vst [vmem:[#allocation2 + $0x1b8] sm:$0xff] %v1697_v16 }
 0x311   : > { %1774 = vst [vmem:[#allocation2 + $0x1c0] sm:$0xff] %v1698_v12 }
 0x312   : > { %1775 = vst [vmem:[#allocation2 + $0x1c8] sm:$0xff] %v1699_v23 }
 0x313   : > { %1776 = vst [vmem:[#allocation2 + $0x1d0] sm:$0xff] %v1700_v18 }
 0x314   : > { %1777 = vst [vmem:[#allocation2 + $0x1d8] sm:$0xff] %v1701_v28 }
 0x315   : > { %1778 = vst [vmem:[#allocation2 + $0x1e0] sm:$0xff] %v1702_v31 }
 0x316   : > { %1779 = vst [vmem:[#allocation2 + $0x1e8] sm:$0xff] %v1703_v8 }
 0x317   : > { %1780 = vst [vmem:[#allocation2 + $0x1f0] sm:$0xff] %v1704_v32 }
 0x318   : > { %1781 = vst [vmem:[#allocation2 + $0x1f8] sm:$0xff] %v1705_v36 }
 0x319   : > { %1782 = vst [vmem:[#allocation2 + $0x200] sm:$0xff] %v1706_v40 }
 0x31a   : > { %1783 = vst [vmem:[#allocation2 + $0x208] sm:$0xff] %v1707_v7 }
 0x31b   : > { %1784 = vst [vmem:[#allocation2 + $0x210] sm:$0xff] %v1708_v52 }
 0x31c   : > { %1785 = vst [vmem:[#allocation2 + $0x218] sm:$0xff] %v1709_v47 }
 0x31d   : > { %1786 = vst [vmem:[#allocation2 + $0x220] sm:$0xff] %v1710_v0 }
 0x31e   : > { %1787 = vst [vmem:[#allocation2 + $0x228] sm:$0xff] %v1711_v34 }
 0x31f   : > { %1788 = vst [vmem:[#allocation2 + $0x230] sm:$0xff] %v1712_v42 }
 0x320   : > { %1789 = vst [vmem:[#allocation2 + $0x238] sm:$0xff] %v1713_v44 }
 0x321   : > { %1790 = vst [vmem:[#allocation2 + $0x240] sm:$0xff] %v1714_v45 }
 0x322   : > { %1791 = vst [vmem:[#allocation2 + $0x248] sm:$0xff] %v1715_v61 }
 0x323   : > { %1792 = vst.msk [vmem:[#allocation2 + $0x250] sm:$0xff] %vm1741_vm6, %v1716_v57 }
 0x324 PF: > { %p2768_p4 = scmp.ne.s32.totalorder %s3118_s25, 1 }
 0x326   : > { %1796 = sbr.rel (%p2768_p4) target bundleno = 1222 (0x4c6), region = 64 }
 0x32b   : > { %v4023_v62 = vld [vmem:[#allocation2 + $0x190] sm:$0xff]  ;;  %v4025_v4 = vld [vmem:[#allocation2 + $0x198] sm:$0xff]  ;;  %v4027_v14 = vld [vmem:[#allocation2 + $0x1a0] sm:$0xff]  ;;  %vm1976_vm7 = vcmask 523264  }
 0x32c   : > { %v2008_v63 = vadd.f32 %v4025_v4, %v4023_v62  ;;  %v4031_v15 = vld [vmem:[#allocation2 + $0x1a8] sm:$0xff]  ;;  %v4034_v21 = vld [vmem:[#allocation2 + $0x1b0] sm:$0xff]  ;;  %v4037_v16 = vld [vmem:[#allocation2 + $0x1b8] sm:$0xff]  ;;  %v2085_v49 = vmul.f32 %v4023_v62, %v4023_v62  ;;  %v2086_v42 = vmul.f32 %v4025_v4, %v4025_v4 }
 0x32d   : > { %v4040_v22 = vld [vmem:[#allocation2 + $0x1c0] sm:$0xff]  ;;  %v4044_v26 = vld [vmem:[#allocation2 + $0x8] sm:$0xff]  ;;  %v4047_v23 = vld [vmem:[#allocation2 + $0x10] sm:$0xff] }
 0x32e   : > { %v2009_v9 = vadd.f32 %v2008_v63, %v4027_v14  ;;  %4723 = vst [vmem:[#allocation38_spill] sm:$0xff] %v4040_v22  ;;  %v4042_v12 = vld [vmem:[#allocation2] sm:$0xff]  ;;  %v2036_v18 = vmul.f32 %v4044_v26, %v4044_v26  ;;  %v4055_v25 = vld [vmem:[#allocation2 + $0x1c8] sm:$0xff]  ;;  %v4057_v19 = vld [vmem:[#allocation2 + $0x18] sm:$0xff]  ;;  %v2037_v30 = vmul.f32 %v4047_v23, %v4047_v23 }
 0x32f   : > { %4724 = vst [vmem:[#allocation39_spill] sm:$0xff] %v4042_v12  ;;  %v1953_v17 = vadd.f32 %v4044_v26, %v4042_v12  ;;  %v2035_v27 = vmul.f32 %v4042_v12, %v4042_v12  ;;  %v4061_v5 = vld [vmem:[#allocation2 + $0x1d0] sm:$0xff]  ;;  %v4063_v31 = vld [vmem:[#allocation2 + $0x20] sm:$0xff]  ;;  %v4069_v35 = vld [vmem:[#allocation2 + $0x1d8] sm:$0xff]  ;;  %v2038_v37 = vmul.f32 %v4057_v19, %v4057_v19 }
 0x330   : > { %v2010_v10 = vadd.f32 %v2009_v9, %v4031_v15  ;;  %4725 = vst [vmem:[#allocation40_spill] sm:$0xff] %v4044_v26  ;;  %v4071_v32 = vld [vmem:[#allocation2 + $0x28] sm:$0xff]  ;;  %v1823_v29 = vld [vmem:[#allocation2 + $0xd0] sm:$0xff]  ;;  %v4075_v6 = vld [vmem:[#allocation2 + $0x1e0] sm:$0xff]  ;;  %v2039_v34 = vmul.f32 %v4063_v31, %v4063_v31 }
 0x331   : > { %4726 = vst [vmem:[#allocation41_spill] sm:$0xff] %v4047_v23  ;;  %v1954_v20 = vadd.f32 %v1953_v17, %v4047_v23  ;;  %v2110_v43 = vadd.f32 %v2036_v18, %v2035_v27  ;;  %v1822_v36 = vld [vmem:[#allocation2 + $0xc8] sm:$0xff]  ;;  %v4077_v40 = vld [vmem:[#allocation2 + $0x30] sm:$0xff]  ;;  %v2061_v52 = vmul.f32 %v1823_v29, %v1823_v29  ;;  %v4085_v53 = vld [vmem:[#allocation2 + $0x38] sm:$0xff]  ;;  %v2087_v27 = vmul.f32 %v4027_v14, %v4027_v14 }
 0x332   : > { %v2011_v11 = vadd.f32 %v2010_v10, %v4034_v21  ;;  %4727 = vst [vmem:[#allocation42_spill] sm:$0xff] %v4055_v25  ;;  %v2060_v38 = vmul.f32 %v1822_v36, %v1822_v36  ;;  %v4083_v33 = vld [vmem:[#allocation2 + $0x1e8] sm:$0xff]  ;;  %v1824_v47 = vld [vmem:[#allocation2 + $0xd8] sm:$0xff]  ;;  %v4089_v0 = vld [vmem:[#allocation2 + $0x1f0] sm:$0xff]  ;;  %v1981_v61 = vadd.f32 %v1823_v29, %v1822_v36  ;;  %v2164_v18 = vadd.f32 %v2086_v42, %v2085_v49 }
 0x333   : > { %4728 = vst [vmem:[#allocation43_spill] sm:$0xff] %v4057_v19  ;;  %v1955_v56 = vadd.f32 %v1954_v20, %v4057_v19  ;;  %v2111_v41 = vadd.f32 %v2110_v43, %v2037_v30  ;;  %v4091_v48 = vld [vmem:[#allocation2 + $0x40] sm:$0xff]  ;;  %v2062_v44 = vmul.f32 %v1824_v47, %v1824_v47  ;;  %v4101_v60 = vld [vmem:[#allocation2 + $0x1f8] sm:$0xff]  ;;  %v4103_v45 = vld [vmem:[#allocation2 + $0x48] sm:$0xff]  ;;  %v2088_v29 = vmul.f32 %v4031_v15, %v4031_v15 }
 0x334   : > { %v2012_v46 = vadd.f32 %v2011_v11, %v4037_v16  ;;  %4729 = vst [vmem:[#allocation44_spill] sm:$0xff] %v4061_v5  ;;  %v1825_v1 = vld [vmem:[#allocation2 + $0xe0] sm:$0xff]  ;;  %v2137_v59 = vadd.f32 %v2061_v52, %v2060_v38  ;;  %v1826_v58 = vld [vmem:[#allocation2 + $0xe8] sm:$0xff]  ;;  %v4109_v10 = vld [vmem:[#allocation2 + $0x50] sm:$0xff]  ;;  %v1982_v36 = vadd.f32 %v1981_v61, %v1824_v47  ;;  %v2042_v47 = vmul.f32 %v4085_v53, %v4085_v53 }
 0x335   : > { %4730 = vst [vmem:[#allocation45_spill] sm:$0xff] %v4063_v31  ;;  %v1956_v39 = vadd.f32 %v1955_v56, %v4063_v31  ;;  %v2112_v2 = vadd.f32 %v2111_v41, %v2038_v37  ;;  %v2063_v63 = vmul.f32 %v1825_v1, %v1825_v1  ;;  %v4107_v9 = vld [vmem:[#allocation2 + $0x200] sm:$0xff]  ;;  %v1827_v11 = vld [vmem:[#allocation2 + $0xf0] sm:$0xff]  ;;  %v2064_v30 = vmul.f32 %v1826_v58, %v1826_v58  ;;  %v4119_v56 = vld [vmem:[#allocation2 + $0x58] sm:$0xff] }
 0x336   : > { %v2013_v28 = vadd.f32 %v2012_v46, %v4040_v22  ;;  %4731 = vst [vmem:[#allocation46_spill] sm:$0xff] %v4069_v35  ;;  %v2040_v46 = vmul.f32 %v4071_v32, %v4071_v32  ;;  %v2138_v43 = vadd.f32 %v2137_v59, %v2062_v44  ;;  %v4127_v37 = vmul.f32 %v4034_v21, %v4034_v21  ;;  %v4131_v52 = vld [vmem:[#allocation2 + $0x210] sm:$0xff]  ;;  %v4143_v59 = vld [vmem:[#allocation2 + $0x218] sm:$0xff]  ;;  %v4145_v61 = vld [vmem:[#allocation2 + $0x68] sm:$0xff] }
 0x337   : > { %4732 = vst [vmem:[#allocation47_spill] sm:$0xff] %v4071_v32  ;;  %v1957_v51 = vadd.f32 %v1956_v39, %v4071_v32  ;;  %v2113_v17 = vadd.f32 %v2112_v2, %v2039_v34  ;;  %v2041_v39 = vmul.f32 %v4077_v40, %v4077_v40  ;;  %v4139_v2 = vmul.f32 %v4037_v16, %v4037_v16  ;;  %v1834_v32 = vld [vmem:[#allocation2 + $0x128] sm:$0xff] }
 0x338   : > { %v2014_v8 = vadd.f32 %v2013_v28, %v4055_v25  ;;  %4733 = vst [vmem:[#allocation48_spill] sm:$0xff] %v4077_v40  ;;  %v2139_v38 = vadd.f32 %v2138_v43, %v2063_v63  ;;  %v2165_v49 = vadd.f32 %v2164_v18, %v2087_v27  ;;  %v4157_v43 = vld [vmem:[#allocation2 + $0x70] sm:$0xff] }
 0x339   : > { %4734 = vst [vmem:[#allocation49_spill] sm:$0xff] %v4085_v53  ;;  %v1958_v24 = vadd.f32 %v1957_v51, %v4077_v40  ;;  %v2065_v51 = vmul.f32 %v1827_v11, %v1827_v11  ;;  %v2114_v34 = vadd.f32 %v2113_v17, %v2040_v46  ;;  %v1983_v46 = vadd.f32 %v1982_v36, %v1825_v1 }
 0x33a   : > { %v2015_v55 = vadd.f32 %v2014_v8, %v4061_v5  ;;  %4735 = vst [vmem:[#allocation50_spill] sm:$0xff] %v4091_v48  ;;  %v4117_v8 = vld [vmem:[#allocation2 + $0x208] sm:$0xff]  ;;  %v2140_v44 = vadd.f32 %v2139_v38, %v2064_v30  ;;  %v4151_v17 = vmul.f32 %v4040_v22, %v4040_v22  ;;  %v4155_v30 = vld [vmem:[#allocation2 + $0x220] sm:$0xff]  ;;  %v2166_v36 = vadd.f32 %v2165_v49, %v2088_v29  ;;  %v4161_v38 = vld [vmem:[#allocation2 + $0x250] sm:$0xff] }
 0x33b   : > { %v1959_v50 = vadd.f32 %v1958_v24, %v4085_v53  ;;  %4736 = vst [vmem:[#allocation51_spill] sm:$0xff] %v4103_v45  ;;  %v1829_v24 = vld [vmem:[#allocation2 + $0x100] sm:$0xff]  ;;  %v2115_v63 = vadd.f32 %v2114_v34, %v2041_v39  ;;  %v1984_v1 = vadd.f32 %v1983_v46, %v1826_v58  ;;  %v1832_v53 = vld [vmem:[#allocation2 + $0x118] sm:$0xff]  ;;  %v2045_v40 = vmul.f32 %v4109_v10, %v4109_v10  ;;  %v4177_v46 = vld [vmem:[#allocation2 + $0x230] sm:$0xff] }
 0x33c   : > { %v2016_v7 = vadd.f32 %v2015_v55, %v4069_v35  ;;  %4737 = vst [vmem:[#allocation52_spill] sm:$0xff] %v4109_v10  ;;  %v1828_v55 = vld [vmem:[#allocation2 + $0xf8] sm:$0xff]  ;;  %v4173_v58 = vmul.f32 %v4055_v25, %v4055_v25  ;;  %v2049_v12 = vmul.f32 %v4157_v43, %v4157_v43 }
 0x33d   : > { %v1960_v57 = vadd.f32 %v1959_v50, %v4091_v48  ;;  %4738 = vst [vmem:[#allocation53_spill] sm:$0xff] %v4119_v56  ;;  %v2066_v50 = vmul.f32 %v1828_v55, %v1828_v55  ;;  %v2116_v39 = vadd.f32 %v2115_v63, %v2042_v47  ;;  %v1985_v47 = vadd.f32 %v1984_v1, %v1827_v11 }
 0x33e   : > { %v2017_v54 = vadd.f32 %v2016_v7, %v4075_v6  ;;  %4740 = vst [vmem:[#allocation55_spill] sm:$0xff] %v4145_v61  ;;  %v2046_v11 = vmul.f32 %v4119_v56, %v4119_v56 }
 0x33f   : > { %v1961_v20 = vadd.f32 %v1960_v57, %v4103_v45  ;;  %v2043_v57 = vmul.f32 %v4091_v48, %v4091_v48  ;;  %4741 = vst [vmem:[#allocation56_spill] sm:$0xff] %v4157_v43 }
 0x340   : > { %v2018_v3 = vadd.f32 %v2017_v54, %v4083_v33  ;;  %v4133_v54 = vld [vmem:[#allocation2 + $0x60] sm:$0xff] }
 0x341   : > { %v1962_v7 = vadd.f32 %v1961_v20, %v4109_v10  ;;  %4739 = vst [vmem:[#allocation54_spill] sm:$0xff] %v4133_v54  ;;  %v2141_v20 = vadd.f32 %v2140_v44, %v2065_v51  ;;  %v4165_v51 = vld [vmem:[#allocation2 + $0x228] sm:$0xff]  ;;  %v4167_v44 = vld [vmem:[#allocation2 + $0x78] sm:$0xff]  ;;  %v2047_v31 = vmul.f32 %v4133_v54, %v4133_v54 }
 0x342   : > { %v2019_v13 = vadd.f32 %v2018_v3, %v4089_v0  ;;  %4742 = vst [vmem:[#allocation57_spill] sm:$0xff] %v4167_v44 }
 0x343   : > { %v1963_v3 = vadd.f32 %v1962_v7, %v4119_v56  ;;  %v2044_v7 = vmul.f32 %v4103_v45, %v4103_v45  ;;  %v2142_v48 = vadd.f32 %v2141_v20, %v2066_v50  ;;  %v2117_v45 = vadd.f32 %v2116_v39, %v2043_v57  ;;  %v1833_v20 = vld [vmem:[#allocation2 + $0x120] sm:$0xff]  ;;  %v1836_v56 = vld [vmem:[#allocation2 + $0x138] sm:$0xff] }
 0x344   : > { %v2020_v28 = vadd.f32 %v2019_v13, %v4101_v60  ;;  %v1830_v13 = vld [vmem:[#allocation2 + $0x108] sm:$0xff]  ;;  %v1986_v39 = vadd.f32 %v1985_v47, %v1828_v55  ;;  %v2071_v47 = vmul.f32 %v1833_v20, %v1833_v20 }
 0x345   : > { %v1964_v18 = vadd.f32 %v1963_v3, %v4133_v54  ;;  %v2068_v3 = vmul.f32 %v1830_v13, %v1830_v13  ;;  %v2118_v57 = vadd.f32 %v2117_v45, %v2044_v7  ;;  %v4195_v45 = vmul.f32 %v4061_v5, %v4061_v5 }
 0x346   : > { %v2021_v41 = vadd.f32 %v2020_v28, %v4107_v9  ;;  %v2067_v28 = vmul.f32 %v1829_v24, %v1829_v24  ;;  %v1987_v23 = vadd.f32 %v1986_v39, %v1829_v24  ;;  %v2048_v54 = vmul.f32 %v4145_v61, %v4145_v61 }
 0x347   : > { %v2119_v19 = vadd.f32 %v2118_v57, %v2045_v40  ;;  %v2167_v57 = vadd.f32 %v2166_v36, %v4127_v37 }
 0x348   : > { %v2022_v42 = vadd.f32 %v2021_v41, %v4117_v8  ;;  %v1831_v41 = vld [vmem:[#allocation2 + $0x110] sm:$0xff]  ;;  %v2143_v50 = vadd.f32 %v2142_v48, %v2067_v28  ;;  %v4187_v48 = vld [vmem:[#allocation2 + $0x238] sm:$0xff]  ;;  %v4189_v28 = vld [vmem:[#allocation2 + $0x88] sm:$0xff]  ;;  %v1988_v24 = vadd.f32 %v1987_v23, %v1830_v13  ;;  %v2094_v23 = vmul.f32 %v4069_v35, %v4069_v35 }
 0x349   : > { %v2069_v63 = vmul.f32 %v1831_v41, %v1831_v41  ;;  %v2120_v40 = vadd.f32 %v2119_v19, %v2046_v11  ;;  %v1837_v13 = vld [vmem:[#allocation2 + $0x140] sm:$0xff] }
 0x34a   : > { %v2023_v27 = vadd.f32 %v2022_v42, %v4131_v52  ;;  %v1965_v42 = vadd.f32 %v1964_v18, %v4145_v61  ;;  %v4181_v18 = vld [vmem:[#allocation2 + $0x80] sm:$0xff]  ;;  %v2144_v10 = vadd.f32 %v2143_v50, %v2068_v3  ;;  %v1835_v50 = vld [vmem:[#allocation2 + $0x130] sm:$0xff]  ;;  %v1989_v61 = vadd.f32 %v1988_v24, %v1831_v41 }
 0x34b   : > { %v2121_v5 = vadd.f32 %v2120_v40, %v2047_v31  ;;  %v2073_v36 = vmul.f32 %v1835_v50, %v1835_v50  ;;  %v2168_v24 = vadd.f32 %v2167_v57, %v4139_v2  ;;  %v2075_v35 = vmul.f32 %v1837_v13, %v1837_v13  ;;  %v4235_v2 = vld [vmem:[#allocation2 + $0x150] sm:$0xff] }
 0x34c   : > { %v2024_v34 = vadd.f32 %v2023_v27, %v4143_v59  ;;  %v1966_v49 = vadd.f32 %v1965_v42, %v4157_v43  ;;  %v2031_v27 = vsel %vm1976_vm7, %v4161_v38, 0.0  ;;  %v2070_v42 = vmul.f32 %v1832_v53, %v1832_v53 }
 0x34d   : > { %v2145_v3 = vadd.f32 %v2144_v10, %v2069_v63  ;;  %v4208_v10 = vld [vmem:[#allocation2 + $0x248] sm:$0xff]  ;;  %v4210_v63 = vld [vmem:[#allocation2 + $0x98] sm:$0xff]  ;;  %v1990_v43 = vadd.f32 %v1989_v61, %v1832_v53  ;;  %v4233_v61 = vld [vmem:[#allocation2 + $0xb0] sm:$0xff]  ;;  %v2052_v57 = vmul.f32 %v4189_v28, %v4189_v28 }
 0x34e   : > { %v2025_v29 = vadd.f32 %v2024_v34, %v4155_v30  ;;  %v1967_v34 = vadd.f32 %v1966_v49, %v4167_v44  ;;  %v4201_v49 = vld [vmem:[#allocation2 + $0x90] sm:$0xff] }
 0x34f   : > { %v2146_v26 = vadd.f32 %v2145_v3, %v2070_v42  ;;  %v4218_v42 = vld [vmem:[#allocation2 + $0xa0] sm:$0xff]  ;;  %v2122_v3 = vadd.f32 %v2121_v5, %v2048_v54  ;;  %v1991_v25 = vadd.f32 %v1990_v43, %v1833_v20  ;;  %v2169_v54 = vadd.f32 %v2168_v24, %v4151_v17 }
 0x350   : > { %v2026_v1 = vadd.f32 %v2025_v29, %v4165_v51  ;;  %v1968_v7 = vadd.f32 %v1967_v34, %v4181_v18  ;;  %v4199_v29 = vld [vmem:[#allocation2 + $0x240] sm:$0xff]  ;;  %v2072_v34 = vmul.f32 %v1834_v32, %v1834_v32 }
 0x351   : > { %v2147_v11 = vadd.f32 %v2146_v26, %v2071_v47  ;;  %v2051_v26 = vmul.f32 %v4181_v18, %v4181_v18  ;;  %v2123_v47 = vadd.f32 %v2122_v3, %v2049_v12  ;;  %v2095_v12 = vmul.f32 %v4075_v6, %v4075_v6  ;;  %v4252_v3 = vld [vmem:[#allocation2 + $0x160] sm:$0xff] }
 0x352   : > { %v2027_v55 = vadd.f32 %v2026_v1, %v4177_v46  ;;  %v1969_v1 = vadd.f32 %v1968_v7, %v4189_v28  ;;  %v2050_v7 = vmul.f32 %v4167_v44, %v4167_v44  ;;  %v4229_v44 = vld [vmem:[#allocation2 + $0xc0] sm:$0xff]  ;;  %v2170_v17 = vadd.f32 %v2169_v54, %v4173_v58  ;;  %v4264_v54 = vld [vmem:[#allocation2 + $0x168] sm:$0xff] }
 0x353   : > { %v2148_v40 = vadd.f32 %v2147_v11, %v2072_v34  ;;  %v1977_v11 = vsel %vm1976_vm7, %v4229_v44, 0.0 }
 0x354   : > { %v2028_v39 = vadd.f32 %v2027_v55, %v4187_v48  ;;  %v1970_v37 = vadd.f32 %v1969_v1, %v4201_v49  ;;  %v2074_v55 = vmul.f32 %v1836_v56, %v1836_v56  ;;  %v1838_v1 = vld [vmem:[#allocation2 + $0x148] sm:$0xff]  ;;  %v2124_v34 = vadd.f32 %v2123_v47, %v2050_v7 }
 0x355   : > { %v2149_v53 = vadd.f32 %v2148_v40, %v2073_v36  ;;  %v2076_v20 = vmul.f32 %v1838_v1, %v1838_v1  ;;  %v4245_v36 = vld [vmem:[#allocation2 + $0xb8] sm:$0xff]  ;;  %v2171_v58 = vadd.f32 %v2170_v17, %v4195_v45  ;;  %v2054_v40 = vmul.f32 %v4210_v63, %v4210_v63 }
 0x356   : > { %v2029_v19 = vadd.f32 %v2028_v39, %v4199_v29  ;;  %v1971_v41 = vadd.f32 %v1970_v37, %v4210_v63  ;;  %v4225_v39 = vld [vmem:[#allocation2 + $0xa8] sm:$0xff]  ;;  %v2055_v45 = vmul.f32 %v4218_v42, %v4218_v42 }
 0x357   : > { %v2150_v37 = vadd.f32 %v2149_v53, %v2074_v55  ;;  %v2172_v53 = vadd.f32 %v2171_v58, %v2094_v23  ;;  %v2056_v23 = vmul.f32 %v4225_v39, %v4225_v39  ;;  %v4287_v58 = vld [vmem:[#allocation2 + $0x180] sm:$0xff] }
 0x358   : > { %v2030_v31 = vadd.f32 %v2029_v19, %v4208_v10  ;;  %v1972_v5 = vadd.f32 %v1971_v41, %v4218_v42  ;;  %v1992_v19 = vadd.f32 %v1991_v25, %v1834_v32  ;;  %v2053_v25 = vmul.f32 %v4201_v49, %v4201_v49 }
 0x359   : > { %v2125_v32 = vadd.f32 %v2124_v34, %v2051_v26  ;;  %v2151_v55 = vadd.f32 %v2150_v37, %v2075_v35  ;;  %v2079_v35 = vmul.f32 %v4252_v3, %v4252_v3  ;;  %v2173_v37 = vadd.f32 %v2172_v53, %v2095_v12 }
 0x35a   : > { %v2032_v22 = vadd.f32 %v2031_v27, %v2030_v31  ;;  %v1973_v43 = vadd.f32 %v1972_v5, %v4225_v39  ;;  %v4242_v27 = vld [vmem:[#allocation2 + $0x158] sm:$0xff]  ;;  %v1993_v7 = vadd.f32 %v1992_v19, %v1835_v50  ;;  %v2077_v31 = vmul.f32 %v4235_v2, %v4235_v2 }
 0x35b   : > { %v2078_v41 = vmul.f32 %v4242_v27, %v4242_v27  ;;  %v2126_v24 = vadd.f32 %v2125_v32, %v2052_v57  ;;  %v2152_v26 = vadd.f32 %v2151_v55, %v2076_v20  ;;  %v2096_v5 = vmul.f32 %v4083_v33, %v4083_v33  ;;  %v4270_v57 = vld [vmem:[#allocation2 + $0x170] sm:$0xff] }
 0x35c   : > { %2033 = vadd.xlane.f32.xlu1 %v2032_v22  ;;  %v1974_v22 = vadd.f32 %v1973_v43, %v4233_v61  ;;  %v1994_v47 = vadd.f32 %v1993_v7, %v1836_v56  ;;  %v2097_v20 = vmul.f32 %v4089_v0, %v4089_v0  ;;  %v2080_v7 = vmul.f32 %v4264_v54, %v4264_v54 }
 0x35d   : > { %v2127_v34 = vadd.f32 %v2126_v24, %v2053_v25  ;;  %v2153_v56 = vadd.f32 %v2152_v26, %v2077_v31  ;;  %v4280_v25 = vld [vmem:[#allocation2 + $0x178] sm:$0xff]  ;;  %v2081_v31 = vmul.f32 %v4270_v57, %v4270_v57  ;;  %v2057_v12 = vmul.f32 %v4233_v61, %v4233_v61 }
 0x35e   : > { %v1975_v50 = vadd.f32 %v1974_v22, %v4245_v36  ;;  %v1995_v19 = vadd.f32 %v1994_v47, %v1837_v13  ;;  %v2098_v13 = vmul.f32 %v4101_v60, %v4101_v60  ;;  %v2059_v24 = vmul.f32 %v4229_v44, %v4229_v44 }
 0x35f   : > { %v2128_v17 = vadd.f32 %v2127_v34, %v2054_v40  ;;  %v2154_v22 = vadd.f32 %v2153_v56, %v2078_v41  ;;  %v4289_v40 = vld [vmem:[#allocation2 + $0x188] sm:$0xff]  ;;  %v2099_v47 = vmul.f32 %v4107_v9, %v4107_v9  ;;  %v2058_v26 = vmul.f32 %v4245_v36, %v4245_v36 }
 0x360   : > { %v1978_v43 = vadd.f32 %v1977_v11, %v1975_v50  ;;  %v1996_v32 = vadd.f32 %v1995_v19, %v1838_v1  ;;  %v2174_v11 = vadd.f32 %v2173_v37, %v2096_v5  ;;  %v2084_v56 = vmul.f32 %v4289_v40, %v4289_v40 }
 0x361   : > { %v2129_v55 = vadd.f32 %v2128_v17, %v2055_v45  ;;  %v2155_v41 = vadd.f32 %v2154_v22, %v2079_v35  ;;  %v2082_v45 = vmul.f32 %v4280_v25, %v4280_v25  ;;  %v2100_v35 = vmul.f32 %v4117_v8, %v4117_v8 }
 0x362   : > { %1979 = vadd.xlane.f32.xlu0 %v1978_v43  ;;  %v1997_v1 = vadd.f32 %v1996_v32, %v4235_v2  ;;  %v2175_v50 = vadd.f32 %v2174_v11, %v2097_v20  ;;  %v2083_v43 = vmul.f32 %v4287_v58, %v4287_v58  ;;  %v2133_v17 = vsel %vm1976_vm7, %v2059_v24, 0.0 }
 0x363   : > { %v2130_v5 = vadd.f32 %v2129_v55, %v2056_v23  ;;  %v2156_v34 = vadd.f32 %v2155_v41, %v2080_v7  ;;  %v2101_v32 = vmul.f32 %v4131_v52, %v4131_v52  ;;  %v2102_v55 = vmul.f32 %v4143_v59, %v4143_v59 }
 0x364   : > { %v1998_v53 = vadd.f32 %v1997_v1, %v4242_v27  ;;  %v2176_v19 = vadd.f32 %v2175_v50, %v2098_v13  ;;  %v2160_v41 = vsel %vm1976_vm7, %v2084_v56, 0.0  ;;  %v2103_v24 = vmul.f32 %v4155_v30, %v4155_v30 }
 0x365   : > { %v2131_v20 = vadd.f32 %v2130_v5, %v2057_v12  ;;  %v2157_v23 = vadd.f32 %v2156_v34, %v2081_v31 }
 0x366   : > { %v1999_v37 = vadd.f32 %v1998_v53, %v4252_v3  ;;  %v2177_v7 = vadd.f32 %v2176_v19, %v2099_v47  ;;  %v2004_v53 = vsel %vm1976_vm7, %v4289_v40, 0.0  ;;  %v2105_v19 = vmul.f32 %v4177_v46, %v4177_v46 }
 0x367   : > { %v2132_v22 = vadd.f32 %v2131_v20, %v2058_v26  ;;  %v2158_v13 = vadd.f32 %v2157_v23, %v2082_v45  ;;  %v2104_v45 = vmul.f32 %v4165_v51, %v4165_v51  ;;  %v2106_v20 = vmul.f32 %v4187_v48, %v4187_v48 }
 0x368   : > { %v2000_v11 = vadd.f32 %v1999_v37, %v4264_v54  ;;  %v2178_v1 = vadd.f32 %v2177_v7, %v2100_v35  ;;  %v2107_v23 = vmul.f32 %v4199_v29, %v4199_v29  ;;  %v2108_v7 = vmul.f32 %v4208_v10, %v4208_v10 }
 0x369   : > { %v2134_v12 = vadd.f32 %v2133_v17, %v2132_v22  ;;  %v2159_v31 = vadd.f32 %v2158_v13, %v2083_v43 }
 0x36a   : > { %v2001_v50 = vadd.f32 %v2000_v11, %v4270_v57  ;;  %v2179_v5 = vadd.f32 %v2178_v1, %v2101_v32  ;;  %v2109_v32 = vmul.f32 %v4161_v38, %v4161_v38 }
 0x36b   : > { %2135 = vadd.xlane.f32.xlu1 %v2134_v12  ;;  %v2161_v26 = vadd.f32 %v2160_v41, %v2159_v31 }
 0x36c   : > { %v2002_v47 = vadd.f32 %v2001_v50, %v4280_v25  ;;  %v2180_v34 = vadd.f32 %v2179_v5, %v2102_v55  ;;  %v2187_v13 = vsel %vm1976_vm7, %v2109_v32, 0.0 }
 0x36d   : > { %2162 = vadd.xlane.f32.xlu2 %v2161_v26 }
 0x36e   : > { %v2003_v35 = vadd.f32 %v2002_v47, %v4287_v58  ;;  %v2181_v43 = vadd.f32 %v2180_v34, %v2103_v24 }
 0x370   : > { %v2005_v56 = vadd.f32 %v2004_v53, %v2003_v35  ;;  %v2182_v37 = vadd.f32 %v2181_v43, %v2104_v45  ;;  %v3060_v43 = vmov 0  }
 0x371   : > { %2898 = vset.pattern.permute.xlu0 %v3060_v43  ;;  %2900 = vset.pattern.permute.xlu2 %v3060_v43 }
 0x372   : > { %2006 = vadd.xlane.f32.xlu0 %v2005_v56  ;;  %v2183_v17 = vadd.f32 %v2182_v37, %v2105_v19  ;;  %2899 = vset.pattern.permute.xlu1 %v3060_v43 }
 0x374   : > { %v2184_v22 = vadd.f32 %v2183_v17, %v2106_v20 }
 0x376   : > { %v2185_v11 = vadd.f32 %v2184_v22, %v2107_v23 }
 0x378   : > { %v2186_v55 = vadd.f32 %v2185_v11, %v2108_v7 }
 0x37a   : > { %v2188_v1 = vadd.f32 %v2187_v13, %v2186_v55 }
 0x37c   : > { %2189 = vadd.xlane.f32.xlu2 %v2188_v1 }
 0x3cf   : > { %v2034_v41 = vpop.xlane.xlu1 %2033 }
 0x3d0   : > { %v2193_v37 = vmul.f32 0.00031887754, %v2034_v41  ;;  %v1947_v41 = vld [vmem:[%s4601_s4] sm:$0xff] }
 0x3d2   : > { %v2199_v7 = vmul.f32 %v2193_v37, %v2193_v37 }
 0x3d5   : > { %v1980_v12 = vpop.xlane.xlu0 %1979 }
 0x3d6   : > { %v4334_v50 = vmul.f32 0.00031887754, %v1980_v12 }
 0x3d8   : > { %v2197_v24 = vmul.f32 %v4334_v50, %v4334_v50 }
 0x3de   : > { %v2136_v31 = vpop.xlane.xlu1 %2135 }
 0x3df   : > { %v2194_v5 = vmul.f32 0.00031887754, %v2136_v31 }
 0x3e0   : > { %v2163_v26 = vpop.xlane.xlu2 %2162 }
 0x3e1   : > { %v2200_v47 = vsub.f32 %v2194_v5, %v2197_v24  ;;  %v2195_v45 = vmul.f32 0.00031887754, %v2163_v26 }
 0x3e3   : > { %v2203_v53 = vmax.f32 %v2200_v47, 0.0 }
 0x3e5   : > { %v2007_v34 = vpop.xlane.xlu0 %2006  ;;  %v2206_v35 = vadd.f32 1e-05, %v2203_v53 }
 0x3e6   : > { %v2192_v19 = vmul.f32 0.00031887754, %v2007_v34 }
 0x3e7   : > { %2901 = vrsqrt.f32 %v2206_v35  ;;  %vm2215_vm9 = vweird.f32 %v2206_v35 }
 0x3e8   : > { %v2198_v56 = vmul.f32 %v2192_v19, %v2192_v19 }
 0x3ea   : > { %v2201_v20 = vsub.f32 %v2195_v45, %v2198_v56 }
 0x3ec   : > { %v2204_v23 = vmax.f32 %v2201_v20, 0.0 }
 0x3ed   : > { %v2902_v17 = vpop.eup %2901 }
 0x3ee   : > { %v2207_v32 = vadd.f32 1e-05, %v2204_v23  ;;  %v2210_v22 = vmul.f32 %v2902_v17, %v2206_v35  ;;  %vm2216_vm8 = vweird.f32 %v2902_v17  ;;  %v1948_v35 = vld [vmem:[%s4601_s4 + $0x8] sm:$0xff] }
 0x3ef   : > { %v2190_v11 = vpop.xlane.xlu2 %2189  ;;  %vm2217_vm10 = vmor %vm2215_vm9, %vm2216_vm8 }
 0x3f0   : > { %2903 = vrsqrt.f32 %v2207_v32  ;;  %v2211_v13 = vmul.f32 %v2902_v17, %v2210_v22  ;;  %v2196_v55 = vmul.f32 0.00031887754, %v2190_v11  ;;  %vm2225_vm12 = vweird.f32 %v2207_v32 }
 0x3f2   : > { %v2212_v1 = vmul.f32 0.5, %v2211_v13  ;;  %v2202_v12 = vsub.f32 %v2196_v55, %v2199_v7 }
 0x3f4   : > { %v2213_v31 = vsub.f32 1.5, %v2212_v1  ;;  %v2205_v24 = vmax.f32 %v2202_v12, 0.0 }
 0x3f6   : > { %v2904_v5 = vpop.eup %2903  ;;  %v2208_v26 = vadd.f32 1e-05, %v2205_v24  ;;  %v2214_v53 = vmul.f32 %v2902_v17, %v2213_v31  ;;  %v1951_v31 = vld [vmem:[%s4602_s5 + $0x8] sm:$0xff]  ;;  %v1949_v24 = vld [vmem:[%s4601_s4 + $0x10] sm:$0xff] }
 0x3f7   : > { %v2220_v47 = vmul.f32 %v2904_v5, %v2207_v32  ;;  %vm2226_vm11 = vweird.f32 %v2904_v5 }
 0x3f8   : > { %2905 = vrsqrt.f32 %v2208_v26  ;;  %v2218_v34 = vsel %vm2217_vm10, %v2902_v17, %v2214_v53  ;;  %vm2227_vm13 = vmor %vm2225_vm12, %vm2226_vm11  ;;  %vm2235_vm15 = vweird.f32 %v2208_v26  ;;  %v1950_v53 = vld [vmem:[%s4602_s5] sm:$0xff] }
 0x3f9   : > { %v2221_v45 = vmul.f32 %v2904_v5, %v2220_v47  ;;  %v2239_v43 = vmul.f32 %v2218_v34, %v1947_v41  ;;  %v1952_v34 = vld [vmem:[%s4602_s5 + $0x10] sm:$0xff] }
 0x3fb   : > { %v2222_v56 = vmul.f32 0.5, %v2221_v45  ;;  %2250 = vperm.xlu0 %2898, %v2239_v43  }
 0x3fd   : > { %v2223_v20 = vsub.f32 1.5, %v2222_v56 }
 0x3fe   : > { %v2906_v23 = vpop.eup %2905 }
 0x3ff   : > { %v2224_v7 = vmul.f32 %v2904_v5, %v2223_v20  ;;  %v2230_v22 = vmul.f32 %v2906_v23, %v2208_v26  ;;  %vm2236_vm14 = vweird.f32 %v2906_v23 }
 0x400   : > { %vm2237_vm0 = vmor %vm2235_vm15, %vm2236_vm14 }
 0x401   : > { %v2228_v11 = vsel %vm2227_vm13, %v2904_v5, %v2224_v7  ;;  %v2231_v55 = vmul.f32 %v2906_v23, %v2230_v22 }
 0x402   : > { %v2240_v13 = vmul.f32 %v2228_v11, %v1948_v35 }
 0x403   : > { %v2232_v1 = vmul.f32 0.5, %v2231_v55 }
 0x404   : > { %2255 = vperm.xlu1 %2899, %v2240_v13   ;;  %v2243_v17 = vmul.f32 %v2240_v13, %v2192_v19  ;;  %v2242_v19 = vmul.f32 %v2239_v43, %v4334_v50 }
 0x405   : > { %v2233_v12 = vsub.f32 1.5, %v2232_v1  ;;  %v1922_v1 = vld [vmem:[#allocation6 + $0x190] sm:$0xff] }
 0x406   : > { %v2246_v5 = vsub.f32 %v1951_v31, %v2243_v17  ;;  %v2245_v45 = vsub.f32 %v1950_v53, %v2242_v19  ;;  %v1924_v17 = vld [vmem:[#allocation6 + $0x1a0] sm:$0xff]  ;;  %v1927_v53 = vld [vmem:[#allocation6 + $0x1b8] sm:$0xff] }
 0x407   : > { %v2234_v32 = vmul.f32 %v2906_v23, %v2233_v12  ;;  %v1925_v12 = vld [vmem:[#allocation6 + $0x1a8] sm:$0xff]  ;;  %v4743_v31 = vld [vmem:[#allocation38_spill] sm:$0xff] }
 0x409   : > { %v2238_v47 = vsel %vm2237_vm0, %v2906_v23, %v2234_v32  ;;  %v4744_v32 = vld [vmem:[#allocation42_spill] sm:$0xff] }
 0x40a   : > { %v2241_v41 = vmul.f32 %v2238_v47, %v1949_v24  ;;  %v1926_v24 = vld [vmem:[#allocation6 + $0x1b0] sm:$0xff] }
 0x40c   : > { %2345 = vperm.xlu1 %2899, %v2246_v5   ;;  %2260 = vperm.xlu2 %2900, %v2241_v41   ;;  %v2244_v26 = vmul.f32 %v2241_v41, %v2193_v37  ;;  %v4745_v5 = vld [vmem:[#allocation44_spill] sm:$0xff] }
 0x40e   : > { %v2247_v56 = vsub.f32 %v1952_v34, %v2244_v26 }
 0x414   : > { %2340 = vperm.xlu2 %2900, %v2245_v45  }
 0x41c   : > { %2350 = vperm.xlu2 %2900, %v2247_v56   ;;  %v1928_v56 = vld [vmem:[#allocation6 + $0x1c0] sm:$0xff] }
 0x466   : > { %v4357_v20 = vpop.permute.xlu2 %2260 }
 0x467   : > { %v2313_v50 = vmul.f32 %v4357_v20, %v4023_v62  ;;  %v2314_v43 = vmul.f32 %v4357_v20, %v4025_v4  ;;  %v2315_v37 = vmul.f32 %v4357_v20, %v4027_v14  ;;  %v2316_v7 = vmul.f32 %v4357_v20, %v4031_v15  ;;  %v1923_v62 = vld [vmem:[#allocation6 + $0x198] sm:$0xff] }
 0x468   : > { %v2317_v22 = vmul.f32 %v4357_v20, %v4034_v21  ;;  %v2318_v4 = vmul.f32 %v4357_v20, %v4037_v16  ;;  %v2319_v15 = vmul.f32 %v4357_v20, %v4743_v31  ;;  %v2320_v47 = vmul.f32 %v4357_v20, %v4744_v32 }
 0x469   : > { %v2321_v41 = vmul.f32 %v4357_v20, %v4745_v5  ;;  %v2323_v31 = vmul.f32 %v4357_v20, %v4075_v6  ;;  %v1930_v5 = vld [vmem:[#allocation6 + $0x1d0] sm:$0xff]  ;;  %v1932_v6 = vld [vmem:[#allocation6 + $0x1e0] sm:$0xff] }
 0x46e   : > { %v4359_v23 = vpop.permute.xlu2 %2340 }
 0x476   : > { %v4361_v35 = vpop.permute.xlu2 %2350 }
 0x477   : > { %v2403_v11 = vadd.f32 %v4361_v35, %v2313_v50  ;;  %v2404_v13 = vadd.f32 %v4361_v35, %v2314_v43  ;;  %v2405_v55 = vadd.f32 %v4361_v35, %v2315_v37  ;;  %v2406_v14 = vadd.f32 %v4361_v35, %v2316_v7  ;;  %v4746_v50 = vld [vmem:[#allocation46_spill] sm:$0xff] }
 0x478   : > { %v2407_v21 = vadd.f32 %v4361_v35, %v2317_v22  ;;  %v2408_v19 = vadd.f32 %v4361_v35, %v2318_v4  ;;  %v2409_v16 = vadd.f32 %v4361_v35, %v2319_v15  ;;  %v2322_v43 = vmul.f32 %v4357_v20, %v4746_v50  ;;  %v1929_v22 = vld [vmem:[#allocation6 + $0x1c8] sm:$0xff] }
 0x479   : > { %v2478_v45 = vadd.f32 %v2403_v11, %v1922_v1  ;;  %v2479_v26 = vadd.f32 %v2404_v13, %v1923_v62  ;;  %v2480_v34 = vadd.f32 %v2405_v55, %v1924_v17  ;;  %v2410_v37 = vadd.f32 %v4361_v35, %v2320_v47  ;;  %v1931_v1 = vld [vmem:[#allocation6 + $0x1d8] sm:$0xff] }
 0x47a   : > { %v2481_v7 = vadd.f32 %v2406_v14, %v1925_v12  ;;  %v2411_v32 = vadd.f32 %v4361_v35, %v2321_v41  ;;  %v2482_v4 = vadd.f32 %v2407_v21, %v1926_v24  ;;  %v2324_v11 = vmul.f32 %v4357_v20, %v4083_v33  ;;  %v1933_v33 = vld [vmem:[#allocation6 + $0x1e8] sm:$0xff] }
 0x47b   : > { %2553 = vst [vmem:[#allocation8 + $0x190] sm:$0xff] %v2478_v45  ;;  %v2412_v13 = vadd.f32 %v4361_v35, %v2322_v43  ;;  %v2483_v55 = vadd.f32 %v2408_v19, %v1927_v53  ;;  %v2325_v62 = vmul.f32 %v4357_v20, %v4089_v0  ;;  %v2413_v17 = vadd.f32 %v4361_v35, %v2323_v31  ;;  %v1934_v0 = vld [vmem:[#allocation6 + $0x1f0] sm:$0xff] }
 0x47c   : > { %2554 = vst [vmem:[#allocation8 + $0x198] sm:$0xff] %v2479_v26  ;;  %v2484_v14 = vadd.f32 %v2409_v16, %v1928_v56  ;;  %v2326_v12 = vmul.f32 %v4357_v20, %v4101_v60  ;;  %v2414_v15 = vadd.f32 %v4361_v35, %v2324_v11  ;;  %v2485_v21 = vadd.f32 %v2410_v37, %v1929_v22  ;;  %v1935_v60 = vld [vmem:[#allocation6 + $0x1f8] sm:$0xff] }
 0x47d   : > { %2555 = vst [vmem:[#allocation8 + $0x1a0] sm:$0xff] %v2480_v34  ;;  %v2327_v24 = vmul.f32 %v4357_v20, %v4107_v9  ;;  %v2415_v47 = vadd.f32 %v4361_v35, %v2325_v62  ;;  %v2486_v41 = vadd.f32 %v2411_v32, %v1930_v5  ;;  %v2328_v19 = vmul.f32 %v4357_v20, %v4117_v8  ;;  %v1936_v9 = vld [vmem:[#allocation6 + $0x200] sm:$0xff]  ;;  %v1937_v8 = vld [vmem:[#allocation6 + $0x208] sm:$0xff] }
 0x47e   : > { %2556 = vst [vmem:[#allocation8 + $0x1a8] sm:$0xff] %v2481_v7  ;;  %v2416_v53 = vadd.f32 %v4361_v35, %v2326_v12  ;;  %v2487_v16 = vadd.f32 %v2412_v13, %v1931_v1  ;;  %v2329_v45 = vmul.f32 %v4357_v20, %v4131_v52  ;;  %v2488_v34 = vadd.f32 %v2413_v17, %v1932_v6  ;;  %v1938_v52 = vld [vmem:[#allocation6 + $0x210] sm:$0xff]  ;;  %v1941_v17 = vld [vmem:[#allocation6 + $0x228] sm:$0xff] }
 0x47f   : > { %2557 = vst [vmem:[#allocation8 + $0x1b0] sm:$0xff] %v2482_v4  ;;  %v2417_v26 = vadd.f32 %v4361_v35, %v2327_v24  ;;  %v2330_v56 = vmul.f32 %v4357_v20, %v4143_v59  ;;  %v2418_v50 = vadd.f32 %v4361_v35, %v2328_v19  ;;  %v2489_v43 = vadd.f32 %v2414_v15, %v1933_v33  ;;  %v1939_v59 = vld [vmem:[#allocation6 + $0x218] sm:$0xff]  ;;  %v1942_v12 = vld [vmem:[#allocation6 + $0x230] sm:$0xff] }
 0x480   : > { %2558 = vst [vmem:[#allocation8 + $0x1b8] sm:$0xff] %v2483_v55  ;;  %v2331_v37 = vmul.f32 %v4357_v20, %v4155_v30  ;;  %v2419_v7 = vadd.f32 %v4361_v35, %v2329_v45  ;;  %v2490_v22 = vadd.f32 %v2415_v47, %v1934_v0  ;;  %v2332_v31 = vmul.f32 %v4357_v20, %v4165_v51  ;;  %v4424_v30 = vpop.permute.xlu0 %2250  ;;  %v1940_v55 = vld [vmem:[#allocation6 + $0x220] sm:$0xff]  ;;  %v1943_v47 = vld [vmem:[#allocation6 + $0x238] sm:$0xff]  ;;  %v4748_v19 = vld [vmem:[#allocation40_spill] sm:$0xff] }
 0x481   : > { %2559 = vst [vmem:[#allocation8 + $0x1c0] sm:$0xff] %v2484_v14  ;;  %v2420_v32 = vadd.f32 %v4361_v35, %v2330_v56  ;;  %v2491_v4 = vadd.f32 %v2416_v53, %v1935_v60  ;;  %v2333_v5 = vmul.f32 %v4357_v20, %v4177_v46  ;;  %v2492_v13 = vadd.f32 %v2417_v26, %v1936_v9  ;;  %v4749_v45 = vld [vmem:[#allocation41_spill] sm:$0xff] }
 0x482   : > { %2560 = vst [vmem:[#allocation8 + $0x1c8] sm:$0xff] %v2485_v21  ;;  %v2421_v11 = vadd.f32 %v4361_v35, %v2331_v37  ;;  %v2334_v1 = vmul.f32 %v4357_v20, %v4187_v48  ;;  %v2422_v51 = vadd.f32 %v4361_v35, %v2332_v31  ;;  %v2493_v62 = vadd.f32 %v2418_v50, %v1937_v8  ;;  %v4747_v48 = vld [vmem:[#allocation39_spill] sm:$0xff]  ;;  %v1946_v50 = vld [vmem:[#allocation6 + $0x250] sm:$0xff]  ;;  %v4751_v8 = vld [vmem:[#allocation45_spill] sm:$0xff] }
 0x483   : > { %2561 = vst [vmem:[#allocation8 + $0x1d0] sm:$0xff] %v2486_v41  ;;  %v2335_v14 = vmul.f32 %v4357_v20, %v4199_v29  ;;  %v2423_v46 = vadd.f32 %v4361_v35, %v2333_v5  ;;  %v2494_v6 = vadd.f32 %v2419_v7, %v1938_v52  ;;  %v2336_v15 = vmul.f32 %v4357_v20, %v4208_v10  ;;  %v1872_v52 = vld [vmem:[#allocation6] sm:$0xff]  ;;  %v4752_v31 = vld [vmem:[#allocation47_spill] sm:$0xff]  ;;  %v4753_v5 = vld [vmem:[#allocation48_spill] sm:$0xff] }
 0x484   : > { %2562 = vst [vmem:[#allocation8 + $0x1d8] sm:$0xff] %v2487_v16  ;;  %v2424_v21 = vadd.f32 %v4361_v35, %v2334_v1  ;;  %v2495_v33 = vadd.f32 %v2420_v32, %v1939_v59  ;;  %v2263_v24 = vmul.f32 %v4424_v30, %v4747_v48  ;;  %v2337_v41 = vmul.f32 %v4357_v20, %v4161_v38  ;;  %v1944_v16 = vld [vmem:[#allocation6 + $0x240] sm:$0xff]  ;;  %v4750_v38 = vld [vmem:[#allocation43_spill] sm:$0xff]  ;;  %v1874_v1 = vld [vmem:[#allocation6 + $0x10] sm:$0xff] }
 0x485   : > { %2563 = vst [vmem:[#allocation8 + $0x1e0] sm:$0xff] %v2488_v34  ;;  %v2425_v29 = vadd.f32 %v4361_v35, %v2335_v14  ;;  %v2496_v0 = vadd.f32 %v2421_v11, %v1940_v55  ;;  %v2264_v53 = vmul.f32 %v4424_v30, %v4748_v19  ;;  %v2426_v10 = vadd.f32 %v4361_v35, %v2336_v15  ;;  %v1945_v34 = vld [vmem:[#allocation6 + $0x248] sm:$0xff]  ;;  %v1875_v14 = vld [vmem:[#allocation6 + $0x18] sm:$0xff] }
 0x486   : > { %2564 = vst [vmem:[#allocation8 + $0x1e8] sm:$0xff] %v2489_v43  ;;  %v2497_v60 = vadd.f32 %v2422_v51, %v1941_v17  ;;  %v2265_v26 = vmul.f32 %v4424_v30, %v4749_v45  ;;  %v2427_v9 = vadd.f32 %v4361_v35, %v2337_v41  ;;  %v2498_v56 = vadd.f32 %v2423_v46, %v1942_v12  ;;  %v1873_v59 = vld [vmem:[#allocation6 + $0x8] sm:$0xff]  ;;  %v4754_v51 = vld [vmem:[#allocation49_spill] sm:$0xff]  ;;  %v4755_v46 = vld [vmem:[#allocation50_spill] sm:$0xff] }
 0x487   : > { %2565 = vst [vmem:[#allocation8 + $0x1f0] sm:$0xff] %v2490_v22  ;;  %v2266_v20 = vmul.f32 %v4424_v30, %v4750_v38  ;;  %v2499_v43 = vadd.f32 %v2424_v21, %v1943_v47  ;;  %v2267_v37 = vmul.f32 %v4424_v30, %v4751_v8  ;;  %v2353_v7 = vadd.f32 %v4359_v23, %v2263_v24  ;;  %v1876_v21 = vld [vmem:[#allocation6 + $0x20] sm:$0xff]  ;;  %v1877_v41 = vld [vmem:[#allocation6 + $0x28] sm:$0xff] }
 0x488   : > { %2566 = vst [vmem:[#allocation8 + $0x1f8] sm:$0xff] %v2491_v4  ;;  %v2500_v22 = vadd.f32 %v2425_v29, %v1944_v16  ;;  %v2268_v32 = vmul.f32 %v4424_v30, %v4752_v31  ;;  %v2354_v35 = vadd.f32 %v4359_v23, %v2264_v53  ;;  %v2501_v4 = vadd.f32 %v2426_v10, %v1945_v34  ;;  %v4757_v29 = vld [vmem:[#allocation52_spill] sm:$0xff]  ;;  %v4758_v10 = vld [vmem:[#allocation53_spill] sm:$0xff] }
 0x489   : > { %2567 = vst [vmem:[#allocation8 + $0x200] sm:$0xff] %v2492_v13  ;;  %v2269_v11 = vmul.f32 %v4424_v30, %v4753_v5  ;;  %v2355_v13 = vadd.f32 %v4359_v23, %v2265_v26  ;;  %v2502_v55 = vadd.f32 %v2427_v9, %v1946_v50  ;;  %v2356_v17 = vadd.f32 %v4359_v23, %v2266_v20  ;;  %v1878_v16 = vld [vmem:[#allocation6 + $0x30] sm:$0xff]  ;;  %v1879_v34 = vld [vmem:[#allocation6 + $0x38] sm:$0xff]  ;;  %v4759_v9 = vld [vmem:[#allocation54_spill] sm:$0xff] }
 0x48a   : > { %2568 = vst [vmem:[#allocation8 + $0x208] sm:$0xff] %v2493_v62  ;;  %v2270_v62 = vmul.f32 %v4424_v30, %v4754_v51  ;;  %v2357_v12 = vadd.f32 %v4359_v23, %v2267_v37  ;;  %v2428_v15 = vadd.f32 %v2353_v7, %v1872_v52  ;;  %v2358_v24 = vadd.f32 %v4359_v23, %v2268_v32  ;;  %v1880_v50 = vld [vmem:[#allocation6 + $0x40] sm:$0xff]  ;;  %v4761_v52 = vld [vmem:[#allocation56_spill] sm:$0xff] }
 0x48b   : > { %2569 = vst [vmem:[#allocation8 + $0x210] sm:$0xff] %v2494_v6  ;;  %v2271_v6 = vmul.f32 %v4424_v30, %v4755_v46  ;;  %v2429_v47 = vadd.f32 %v2354_v35, %v1873_v59  ;;  %v2359_v19 = vadd.f32 %v4359_v23, %v2269_v11  ;;  %v2430_v53 = vadd.f32 %v2355_v13, %v1874_v1  ;;  %v4762_v59 = vld [vmem:[#allocation57_spill] sm:$0xff] }
 0x48c   : > { %2570 = vst [vmem:[#allocation8 + $0x218] sm:$0xff] %v2495_v33  ;;  %v4756_v33 = vld [vmem:[#allocation51_spill] sm:$0xff]  ;;  %v2360_v45 = vadd.f32 %v4359_v23, %v2270_v62  ;;  %v2431_v26 = vadd.f32 %v2356_v17, %v1875_v14  ;;  %v2432_v20 = vadd.f32 %v2357_v12, %v1876_v21  ;;  %v2433_v7 = vadd.f32 %v2358_v24, %v1877_v41  ;;  %v4488_v17 = vpop.permute.xlu1 %2255  ;;  %v1884_v14 = vld [vmem:[#allocation6 + $0x60] sm:$0xff] }
 0x48d   : > { %2571 = vst [vmem:[#allocation8 + $0x220] sm:$0xff] %v2496_v0  ;;  %v2272_v48 = vmul.f32 %v4424_v30, %v4756_v33  ;;  %v2273_v0 = vmul.f32 %v4424_v30, %v4757_v29  ;;  %v2361_v38 = vadd.f32 %v4359_v23, %v2271_v6  ;;  %v2277_v31 = vmul.f32 %v4424_v30, %v4761_v52  ;;  %v1894_v52 = vld [vmem:[#allocation6 + $0xb0] sm:$0xff] }
 0x48e   : > { %2572 = vst [vmem:[#allocation8 + $0x228] sm:$0xff] %v2497_v60  ;;  %v2274_v60 = vmul.f32 %v4424_v30, %v4758_v10  ;;  %v2434_v35 = vadd.f32 %v2359_v19, %v1878_v16  ;;  %v2278_v5 = vmul.f32 %v4424_v30, %v4762_v59  ;;  %v2435_v13 = vadd.f32 %v2360_v45, %v1879_v34 }
 0x48f   : > { %2573 = vst [vmem:[#allocation8 + $0x230] sm:$0xff] %v2498_v56  ;;  %v2275_v56 = vmul.f32 %v4424_v30, %v4759_v9  ;;  %v2362_v37 = vadd.f32 %v4359_v23, %v2272_v48  ;;  %v2363_v32 = vadd.f32 %v4359_v23, %v2273_v0  ;;  %v2279_v1 = vmul.f32 %v4424_v30, %v4181_v18  ;;  %v1886_v48 = vld [vmem:[#allocation6 + $0x70] sm:$0xff] }
 0x490   : > { %2574 = vst [vmem:[#allocation8 + $0x238] sm:$0xff] %v2499_v43  ;;  %v4760_v43 = vld [vmem:[#allocation55_spill] sm:$0xff]  ;;  %v2364_v11 = vadd.f32 %v4359_v23, %v2274_v60  ;;  %v2436_v62 = vadd.f32 %v2361_v38, %v1880_v50  ;;  %v2280_v46 = vmul.f32 %v4424_v30, %v4189_v28  ;;  %v2281_v21 = vmul.f32 %v4424_v30, %v4201_v49  ;;  %v1887_v28 = vld [vmem:[#allocation6 + $0x78] sm:$0xff]  ;;  %v1888_v49 = vld [vmem:[#allocation6 + $0x80] sm:$0xff] }
 0x491   : > { %2575 = vst [vmem:[#allocation8 + $0x240] sm:$0xff] %v2500_v22  ;;  %v2276_v8 = vmul.f32 %v4424_v30, %v4760_v43  ;;  %v1881_v22 = vld [vmem:[#allocation6 + $0x48] sm:$0xff]  ;;  %v2365_v51 = vadd.f32 %v4359_v23, %v2275_v56  ;;  %v2367_v18 = vadd.f32 %v4359_v23, %v2277_v31  ;;  %v2282_v24 = vmul.f32 %v4424_v30, %v4210_v63 }
 0x492   : > { %2576 = vst [vmem:[#allocation8 + $0x248] sm:$0xff] %v2501_v4  ;;  %v1882_v4 = vld [vmem:[#allocation6 + $0x50] sm:$0xff]  ;;  %v2437_v12 = vadd.f32 %v2362_v37, %v1881_v22  ;;  %v2283_v29 = vmul.f32 %v4424_v30, %v4218_v42  ;;  %v2369_v0 = vadd.f32 %v4359_v23, %v2279_v1  ;;  %v2370_v16 = vadd.f32 %v4359_v23, %v2280_v46  ;;  %v1889_v63 = vld [vmem:[#allocation6 + $0x88] sm:$0xff] }
 0x493   : > { %2577 = vst.msk [vmem:[#allocation8 + $0x250] sm:$0xff] %vm1976_vm7, %v2502_v55  ;;  %v1883_v55 = vld [vmem:[#allocation6 + $0x58] sm:$0xff]  ;;  %v2366_v6 = vadd.f32 %v4359_v23, %v2276_v8  ;;  %v2438_v33 = vadd.f32 %v2363_v32, %v1882_v4  ;;  %v2440_v19 = vadd.f32 %v2365_v51, %v1884_v14  ;;  %v2285_v60 = vmul.f32 %v4424_v30, %v4233_v61  ;;  %v1890_v42 = vld [vmem:[#allocation6 + $0x90] sm:$0xff]  ;;  %v1892_v61 = vld [vmem:[#allocation6 + $0xa0] sm:$0xff] }
 0x494   : > { %2503 = vst [vmem:[#allocation8] sm:$0xff] %v2428_v15  ;;  %v1885_v15 = vld [vmem:[#allocation6 + $0x68] sm:$0xff]  ;;  %v2439_v41 = vadd.f32 %v2364_v11, %v1883_v55  ;;  %v2371_v45 = vadd.f32 %v4359_v23, %v2281_v21  ;;  %v2286_v34 = vmul.f32 %v4424_v30, %v4245_v36  ;;  %v2372_v9 = vadd.f32 %v4359_v23, %v2282_v24  ;;  %v4516_v22 = vpop.permute.xlu1 %2345  ;;  %v2909_v1 = vld [vmem:[#allocation2 + $0xd8] sm:$0xff] }
 0x495   : > { %2504 = vst [vmem:[#allocation8 + $0x8] sm:$0xff] %v2429_v47  ;;  %v2368_v47 = vadd.f32 %v4359_v23, %v2278_v5  ;;  %v2441_v10 = vadd.f32 %v2366_v6, %v1885_v15  ;;  %v2287_v38 = vmul.f32 %v4424_v30, %v4229_v44  ;;  %v2444_v50 = vadd.f32 %v2369_v0, %v1888_v49  ;;  %v1893_v37 = vld [vmem:[#allocation6 + $0xa8] sm:$0xff]  ;;  %v2910_v6 = vld [vmem:[#allocation2 + $0xe0] sm:$0xff]  ;;  %v1898_v21 = vld [vmem:[#allocation6 + $0xd0] sm:$0xff] }
 0x496   : > { %2505 = vst [vmem:[#allocation8 + $0x10] sm:$0xff] %v2430_v53  ;;  %v2284_v53 = vmul.f32 %v4424_v30, %v4225_v39  ;;  %v1891_v39 = vld [vmem:[#allocation6 + $0x98] sm:$0xff]  ;;  %v2445_v8 = vadd.f32 %v2370_v16, %v1889_v63  ;;  %v2375_v36 = vadd.f32 %v4359_v23, %v2285_v60  ;;  %v2376_v31 = vadd.f32 %v4359_v23, %v2286_v34  ;;  %v2907_v30 = vld [vmem:[#allocation2 + $0xc8] sm:$0xff]  ;;  %v2908_v5 = vld [vmem:[#allocation2 + $0xd0] sm:$0xff] }
 0x497   : > { %2506 = vst [vmem:[#allocation8 + $0x18] sm:$0xff] %v2431_v26  ;;  %v2442_v26 = vadd.f32 %v2367_v18, %v1886_v48  ;;  %v2443_v56 = vadd.f32 %v2368_v47, %v1887_v28  ;;  %v2447_v44 = vadd.f32 %v2372_v9, %v1891_v39  ;;  %v2288_v32 = vmul.f32 %v2907_v30, %v4488_v17  ;;  %v1897_v46 = vld [vmem:[#allocation6 + $0xc8] sm:$0xff]  ;;  %v2911_v18 = vld [vmem:[#allocation2 + $0xe8] sm:$0xff]  ;;  %v1899_v47 = vld [vmem:[#allocation6 + $0xd8] sm:$0xff] }
 0x498   : > { %2507 = vst [vmem:[#allocation8 + $0x20] sm:$0xff] %v2432_v20  ;;  %v2373_v20 = vadd.f32 %v4359_v23, %v2283_v29  ;;  %v2374_v43 = vadd.f32 %v4359_v23, %v2284_v53  ;;  %v2377_v4 = vadd.f32 %v4359_v23, %v2287_v38  ;;  %v2289_v11 = vmul.f32 %v2908_v5, %v4488_v17  ;;  %v1900_v0 = vld [vmem:[#allocation6 + $0xe0] sm:$0xff]  ;;  %v2914_v63 = vld [vmem:[#allocation2 + $0x100] sm:$0xff] }
 0x499   : > { %2508 = vst [vmem:[#allocation8 + $0x28] sm:$0xff] %v2433_v7  ;;  %v2446_v7 = vadd.f32 %v2371_v45, %v1890_v42  ;;  %v2290_v51 = vmul.f32 %v2909_v1, %v4488_v17  ;;  %v2450_v14 = vadd.f32 %v2375_v36, %v1894_v52  ;;  %v2295_v60 = vmul.f32 %v2914_v63, %v4488_v17  ;;  %v1902_v42 = vld [vmem:[#allocation6 + $0xf0] sm:$0xff]  ;;  %v2915_v34 = vld [vmem:[#allocation2 + $0x108] sm:$0xff]  ;;  %v1903_v38 = vld [vmem:[#allocation6 + $0xf8] sm:$0xff] }
 0x49a   : > { %2509 = vst [vmem:[#allocation8 + $0x30] sm:$0xff] %v2434_v35  ;;  %v1895_v35 = vld [vmem:[#allocation6 + $0xb8] sm:$0xff]  ;;  %v2448_v59 = vadd.f32 %v2373_v20, %v1892_v61  ;;  %v2449_v55 = vadd.f32 %v2374_v43, %v1893_v37  ;;  %v2379_v23 = vadd.f32 %v4516_v22, %v2289_v11  ;;  %v2296_v9 = vmul.f32 %v2915_v34, %v4488_v17  ;;  %v2916_v20 = vld [vmem:[#allocation2 + $0x110] sm:$0xff]  ;;  %v2917_v37 = vld [vmem:[#allocation2 + $0x118] sm:$0xff] }
 0x49b   : > { %2510 = vst [vmem:[#allocation8 + $0x38] sm:$0xff] %v2435_v13  ;;  %v1896_v13 = vld [vmem:[#allocation6 + $0xc0] sm:$0xff]  ;;  %v2451_v15 = vadd.f32 %v2376_v31, %v1895_v35  ;;  %v2380_v48 = vadd.f32 %v4516_v22, %v2290_v51  ;;  %v2385_v61 = vadd.f32 %v4516_v22, %v2295_v60  ;;  %v2298_v36 = vmul.f32 %v2917_v37, %v4488_v17  ;;  %v1905_v31 = vld [vmem:[#allocation6 + $0x108] sm:$0xff] }
 0x49c   : > { %2511 = vst [vmem:[#allocation8 + $0x40] sm:$0xff] %v2436_v62  ;;  %v2378_v62 = vadd.f32 %v4516_v22, %v2288_v32  ;;  %v2452_v24 = vadd.f32 %v2377_v4, %v1896_v13  ;;  %v1906_v4 = vld [vmem:[#allocation6 + $0x110] sm:$0xff]  ;;  %v2920_v1 = vld [vmem:[#allocation2 + $0x130] sm:$0xff]  ;;  %v2306_v63 = vmul.f32 %v4488_v17, %v4242_v27  ;;  %v1915_v27 = vld [vmem:[#allocation6 + $0x158] sm:$0xff] }
 0x49d   : > { %2512 = vst [vmem:[#allocation8 + $0x48] sm:$0xff] %v2437_v12  ;;  %v2291_v12 = vmul.f32 %v2910_v6, %v4488_v17  ;;  %v2455_v39 = vadd.f32 %v2380_v48, %v1899_v47  ;;  %v2388_v11 = vadd.f32 %v4516_v22, %v2298_v36  ;;  %v2301_v51 = vmul.f32 %v2920_v1, %v4488_v17  ;;  %v2921_v6 = vld [vmem:[#allocation2 + $0x138] sm:$0xff] }
 0x49e   : > { %2513 = vst [vmem:[#allocation8 + $0x50] sm:$0xff] %v2438_v33  ;;  %v2292_v33 = vmul.f32 %v2911_v18, %v4488_v17  ;;  %v2453_v16 = vadd.f32 %v2378_v62, %v1897_v46  ;;  %v1908_v46 = vld [vmem:[#allocation6 + $0x120] sm:$0xff]  ;;  %v2922_v18 = vld [vmem:[#allocation2 + $0x140] sm:$0xff]  ;;  %v1910_v47 = vld [vmem:[#allocation6 + $0x130] sm:$0xff]  ;;  %v2311_v36 = vmul.f32 %v4488_v17, %v4287_v58 }
 0x49f   : > { %2514 = vst [vmem:[#allocation8 + $0x58] sm:$0xff] %v2439_v41  ;;  %v2912_v41 = vld [vmem:[#allocation2 + $0xf0] sm:$0xff]  ;;  %v2381_v29 = vadd.f32 %v4516_v22, %v2291_v12  ;;  %v2302_v12 = vmul.f32 %v2921_v6, %v4488_v17  ;;  %v2391_v48 = vadd.f32 %v4516_v22, %v2301_v51 }
 0x4a0   : > { %2515 = vst [vmem:[#allocation8 + $0x60] sm:$0xff] %v2440_v19  ;;  %v2293_v28 = vmul.f32 %v2912_v41, %v4488_v17  ;;  %v2913_v19 = vld [vmem:[#allocation2 + $0xf8] sm:$0xff]  ;;  %v2382_v53 = vadd.f32 %v4516_v22, %v2292_v33  ;;  %v2303_v33 = vmul.f32 %v2922_v18, %v4488_v17  ;;  %v2923_v41 = vld [vmem:[#allocation2 + $0x148] sm:$0xff] }
 0x4a1   : > { %2516 = vst [vmem:[#allocation8 + $0x68] sm:$0xff] %v2441_v10  ;;  %v2294_v49 = vmul.f32 %v2913_v19, %v4488_v17  ;;  %v1901_v10 = vld [vmem:[#allocation6 + $0xe8] sm:$0xff]  ;;  %v2456_v43 = vadd.f32 %v2381_v29, %v1900_v0  ;;  %v2392_v29 = vadd.f32 %v4516_v22, %v2302_v12  ;;  %v1911_v19 = vld [vmem:[#allocation6 + $0x138] sm:$0xff] }
 0x4a2   : > { %2517 = vst [vmem:[#allocation8 + $0x70] sm:$0xff] %v2442_v26  ;;  %v2383_v45 = vadd.f32 %v4516_v22, %v2293_v28  ;;  %v2454_v26 = vadd.f32 %v2379_v23, %v1898_v21  ;;  %v2457_v52 = vadd.f32 %v2382_v53, %v1901_v10  ;;  %v1909_v21 = vld [vmem:[#allocation6 + $0x128] sm:$0xff]  ;;  %v2304_v28 = vmul.f32 %v2923_v41, %v4488_v17  ;;  %v1912_v10 = vld [vmem:[#allocation6 + $0x140] sm:$0xff] }
 0x4a3   : > { %2518 = vst [vmem:[#allocation8 + $0x78] sm:$0xff] %v2443_v56  ;;  %v2384_v56 = vadd.f32 %v4516_v22, %v2294_v49  ;;  %v2305_v49 = vmul.f32 %v4488_v17, %v4235_v2  ;;  %v2393_v53 = vadd.f32 %v4516_v22, %v2303_v33  ;;  %v1914_v2 = vld [vmem:[#allocation6 + $0x150] sm:$0xff] }
 0x4a4   : > { %2519 = vst [vmem:[#allocation8 + $0x80] sm:$0xff] %v2444_v50  ;;  %v2297_v50 = vmul.f32 %v2916_v20, %v4488_v17  ;;  %v2458_v35 = vadd.f32 %v2383_v45, %v1902_v42  ;;  %v2394_v60 = vadd.f32 %v4516_v22, %v2304_v28  ;;  %v2307_v42 = vmul.f32 %v4488_v17, %v4252_v3  ;;  %v1916_v3 = vld [vmem:[#allocation6 + $0x160] sm:$0xff] }
 0x4a5   : > { %2520 = vst [vmem:[#allocation8 + $0x88] sm:$0xff] %v2445_v8  ;;  %v1904_v8 = vld [vmem:[#allocation6 + $0x100] sm:$0xff]  ;;  %v2459_v13 = vadd.f32 %v2384_v56, %v1903_v38  ;;  %v2395_v34 = vadd.f32 %v4516_v22, %v2305_v49  ;;  %v2308_v56 = vmul.f32 %v4488_v17, %v4264_v54  ;;  %v2467_v38 = vadd.f32 %v2392_v29, %v1911_v19  ;;  %v1917_v54 = vld [vmem:[#allocation6 + $0x168] sm:$0xff] }
 0x4a6   : > { %2521 = vst [vmem:[#allocation8 + $0x90] sm:$0xff] %v2446_v7  ;;  %v2386_v7 = vadd.f32 %v4516_v22, %v2296_v9  ;;  %v2387_v32 = vadd.f32 %v4516_v22, %v2297_v50  ;;  %v2466_v9 = vadd.f32 %v2391_v48, %v1910_v47  ;;  %v2309_v20 = vmul.f32 %v4488_v17, %v4270_v57  ;;  %v1918_v57 = vld [vmem:[#allocation6 + $0x170] sm:$0xff] }
 0x4a7   : > { %2522 = vst [vmem:[#allocation8 + $0x98] sm:$0xff] %v2447_v44  ;;  %v2918_v44 = vld [vmem:[#allocation2 + $0x120] sm:$0xff]  ;;  %v2397_v50 = vadd.f32 %v4516_v22, %v2307_v42 }
 0x4a8   : > { %2523 = vst [vmem:[#allocation8 + $0xa0] sm:$0xff] %v2448_v59  ;;  %v2299_v30 = vmul.f32 %v2918_v44, %v4488_v17  ;;  %v2919_v59 = vld [vmem:[#allocation2 + $0x128] sm:$0xff] }
 0x4a9   : > { %2524 = vst [vmem:[#allocation8 + $0xa8] sm:$0xff] %v2449_v55  ;;  %v2300_v5 = vmul.f32 %v2919_v59, %v4488_v17  ;;  %v1907_v55 = vld [vmem:[#allocation6 + $0x118] sm:$0xff] }
 0x4aa   : > { %2525 = vst [vmem:[#allocation8 + $0xb0] sm:$0xff] %v2450_v14  ;;  %v2389_v62 = vadd.f32 %v4516_v22, %v2299_v30  ;;  %v2460_v14 = vadd.f32 %v2385_v61, %v1904_v8  ;;  %v2463_v0 = vadd.f32 %v2388_v11, %v1907_v55  ;;  %v2468_v61 = vadd.f32 %v2393_v53, %v1912_v10 }
 0x4ab   : > { %2526 = vst [vmem:[#allocation8 + $0xb8] sm:$0xff] %v2451_v15  ;;  %v2390_v23 = vadd.f32 %v4516_v22, %v2300_v5  ;;  %v2461_v15 = vadd.f32 %v2386_v7, %v1905_v31  ;;  %v2398_v8 = vadd.f32 %v4516_v22, %v2308_v56  ;;  %v2399_v7 = vadd.f32 %v4516_v22, %v2309_v20  ;;  %v1921_v5 = vld [vmem:[#allocation6 + $0x188] sm:$0xff] }
 0x4ac   : > { %2527 = vst.msk [vmem:[#allocation8 + $0xc0] sm:$0xff] %vm1976_vm7, %v2452_v24  ;;  %v2462_v24 = vadd.f32 %v2387_v32, %v1906_v4  ;;  %v2312_v31 = vmul.f32 %v4488_v17, %v4289_v40  ;;  %v2401_v32 = vadd.f32 %v4516_v22, %v2311_v36  ;;  %v1920_v4 = vld [vmem:[#allocation6 + $0x180] sm:$0xff] }
 0x4ad   : > { %2528 = vst [vmem:[#allocation8 + $0xc8] sm:$0xff] %v2453_v16  ;;  %v2464_v16 = vadd.f32 %v2389_v62, %v1908_v46  ;;  %v2465_v45 = vadd.f32 %v2390_v23, %v1909_v21  ;;  %v2473_v59 = vadd.f32 %v2398_v8, %v1917_v54  ;;  %v2474_v11 = vadd.f32 %v2399_v7, %v1918_v57 }
 0x4ae   : > { %2529 = vst [vmem:[#allocation8 + $0xd0] sm:$0xff] %v2454_v26  ;;  %v1913_v26 = vld [vmem:[#allocation6 + $0x148] sm:$0xff]  ;;  %v2402_v58 = vadd.f32 %v4516_v22, %v2312_v31  ;;  %v2476_v40 = vadd.f32 %v2401_v32, %v1920_v4 }
 0x4af   : > { %2530 = vst [vmem:[#allocation8 + $0xd8] sm:$0xff] %v2455_v39  ;;  %v2396_v39 = vadd.f32 %v4516_v22, %v2306_v63  ;;  %v2469_v37 = vadd.f32 %v2394_v60, %v1913_v26 }
 0x4b0   : > { %2531 = vst [vmem:[#allocation8 + $0xe0] sm:$0xff] %v2456_v43  ;;  %v2310_v43 = vmul.f32 %v4488_v17, %v4280_v25  ;;  %v1919_v25 = vld [vmem:[#allocation6 + $0x178] sm:$0xff]  ;;  %v2477_v17 = vadd.f32 %v2402_v58, %v1921_v5 }
 0x4b1   : > { %2532 = vst [vmem:[#allocation8 + $0xe8] sm:$0xff] %v2457_v52  ;;  %v2470_v52 = vadd.f32 %v2395_v34, %v1914_v2  ;;  %v2471_v30 = vadd.f32 %v2396_v39, %v1915_v27 }
 0x4b2   : > { %2533 = vst [vmem:[#allocation8 + $0xf0] sm:$0xff] %v2458_v35  ;;  %v2400_v44 = vadd.f32 %v4516_v22, %v2310_v43  ;;  %v2472_v35 = vadd.f32 %v2397_v50, %v1916_v3 }
 0x4b3   : > { %2534 = vst [vmem:[#allocation8 + $0xf8] sm:$0xff] %v2459_v13 }
 0x4b4   : > { %2535 = vst [vmem:[#allocation8 + $0x100] sm:$0xff] %v2460_v14  ;;  %v2475_v13 = vadd.f32 %v2400_v44, %v1919_v25 }
 0x4b5   : > { %2536 = vst [vmem:[#allocation8 + $0x108] sm:$0xff] %v2461_v15 }
 0x4b6   : > { %2537 = vst [vmem:[#allocation8 + $0x110] sm:$0xff] %v2462_v24 }
 0x4b7   : > { %2538 = vst [vmem:[#allocation8 + $0x118] sm:$0xff] %v2463_v0 }
 0x4b8   : > { %2539 = vst [vmem:[#allocation8 + $0x120] sm:$0xff] %v2464_v16 }
 0x4b9   : > { %2540 = vst [vmem:[#allocation8 + $0x128] sm:$0xff] %v2465_v45 }
 0x4ba   : > { %2541 = vst [vmem:[#allocation8 + $0x130] sm:$0xff] %v2466_v9 }
 0x4bb   : > { %2542 = vst [vmem:[#allocation8 + $0x138] sm:$0xff] %v2467_v38 }
 0x4bc   : > { %2543 = vst [vmem:[#allocation8 + $0x140] sm:$0xff] %v2468_v61 }
 0x4bd   : > { %2544 = vst [vmem:[#allocation8 + $0x148] sm:$0xff] %v2469_v37 }
 0x4be   : > { %2545 = vst [vmem:[#allocation8 + $0x150] sm:$0xff] %v2470_v52 }
 0x4bf   : > { %2546 = vst [vmem:[#allocation8 + $0x158] sm:$0xff] %v2471_v30 }
 0x4c0   : > { %2547 = vst [vmem:[#allocation8 + $0x160] sm:$0xff] %v2472_v35 }
 0x4c1   : > { %2548 = vst [vmem:[#allocation8 + $0x168] sm:$0xff] %v2473_v59 }
 0x4c2   : > { %2549 = vst [vmem:[#allocation8 + $0x170] sm:$0xff] %v2474_v11 }
 0x4c3   : > { %2550 = vst [vmem:[#allocation8 + $0x178] sm:$0xff] %v2475_v13 }
 0x4c4   : > { %2551 = vst [vmem:[#allocation8 + $0x180] sm:$0xff] %v2476_v40 }
 0x4c5   : > { %2552 = vst.msk [vmem:[#allocation8 + $0x188] sm:$0xff] %vm1976_vm7, %v2477_v17 }
 0x4c6 PF: > { %p2816_p5 = scmp.eq.s32.totalorder %s3118_s25, 1  ;;  %s3061_s9 = smov [#allocation8]  }
 0x4c7   : > { %s2583_s26 = sshll.u32 %s3061_s9, 4  ;;  %s2585_s28 = sshll.u32 %s4603_s6, 4  ;;  %s2584_s26 = int_to_ptr.vmem [resolvable:$true] %s2583_s26  ;;  %s2586_s28 = int_to_ptr.hbm [resolvable:$true] %s2585_s28 }
 0x4c8   : > { %s3062_s29 = smov 3200   ;;  %s3063_s7 = smov 200  }
 0x4c9   : > { %2801 = dma.vmem_to_hbm [thread:$0]  (%p2816_p5), %s2584_s26, 9600, %s2586_s28, [#allocation5], %s3062_s29, %s3062_s29, %s3063_s7  }
 0x4ca   : > { %3037 = dma.done.wait (%p2816_p5), [#allocation5], 9600  }
 0x4cb   : > { %3039 = vsyncadd (%p2816_p5), [#allocation5], 4294957696 }
 0x4cc PF: > { %p18_p13 = scmp.ge.s32.totalorder %s3146_s11, 4   ;;  %s4763_s21 = smov %s3046_s22 }
 0x4cd   : > { %s4764_s22 = smov %s3050_s23  ;;  %s4765_s23 = smov %s3157_s15 }
 0x4ce   : > { %s4766_s24 = smov %s3146_s11  ;;  %20 = sbr.rel (!%p18_p13) target bundleno = 5 (0x5), region = 103 }
 0x4d3   :  { %2602 = vsyncpa [#allocation4], 1 }
 0x4d4   :  { %2604 = vsyncpa [#allocation4 + $0x1], 1 }
 0x4d5   :  { %2605 = vsyncpa [#allocation7], 1 }
 0x4d6   :  { %2606 = vsyncpa [#allocation5], 1 }
 0x4d7   :  { %2608 = vsyncpa [#allocation5 + $0x1], 1 }

</bundles_post_ra>
